<compile_context>
chip_gen: v5e
topology: v5e:2x2
jax: 0.10.0
libtpu: 0.0.40
codegen_flags: <defaults>
</compile_context>

<pallas_src>
import numpy as np
import jax
import jax.numpy as jnp
from jax.experimental import pallas as pl
from jax.experimental.pallas import tpu as pltpu

# hyperparameters from the module
DIM_PRE = 64
DIM_GRAPH = 64
DIM_POST = 64
NUM_PRE = 3
NUM_GRAPH = 6
NUM_POST = 3
DROPOUT_P = 0.1
INV_KEEP = 1.0 / (1.0 - DROPOUT_P)
BN_EPS = 1e-5                                # torch BatchNorm1d default
NUM_NODE_DROPS = 2 * NUM_GRAPH               # 12 dropouts on node activations
NUM_POST_DROPS = 2 * (NUM_POST - 1) + 1      # 5 dropouts on pooled activations


def create_adjacency_matrix(num_nodes, directionality=True):
    D = np.zeros((num_nodes, num_nodes))
    for i in range(num_nodes):
        for j in range(num_nodes):
            D[i, j] = abs(i - j)
    k = int(num_nodes / 3)
    A = np.zeros_like(D)
    for i in range(len(A)):
        neighbours = np.argsort(D[i])[:k]
        if directionality:
            for n in neighbours:
                A[i, n] = 0.0 if n > i else 1.0
        else:
            A[i, neighbours] = 1.0
    return A


# ---------------- the kernel ----------------
def make_gin_kernel(B, N):
    """Fused forward kernel for B graphs of N nodes each (static)."""
    M = B * N

    def kernel(x_ref, adj_ref, dn_ref, dp_ref,
               pre_w1_ref, pre_b1_ref, pre_wr_ref, pre_br_ref,
               g_w_ref, g_b_ref, bn_g_ref, bn_b_ref,
               post_w0_ref, post_b0_ref, post_wm_ref, post_bm_ref,
               post_wlt_ref, post_bl_ref, out_ref, h_scr):
        f32 = jnp.float32
        bf16 = jnp.bfloat16

        def mm(a, w):
            # bf16 MXU inputs, f32 accumulation; elementwise math stays f32.
            return jnp.dot(a.astype(bf16), w, preferred_element_type=f32)

        def bn_train(z, gamma, beta):
            # torch BatchNorm1d training mode: biased batch stats over all
            # nodes, centered two-pass variance (no cancellation).
            mean = jnp.mean(z, axis=0, keepdims=True)
            d = z - mean
            var = jnp.mean(d * d, axis=0, keepdims=True)
            return d * (jax.lax.rsqrt(var + BN_EPS) * gamma) + beta

        def dropout(z, mask_bf16):
            # binary bf16 keep mask (0/1 exact in bf16); exact f32 1/(1-p) scale.
            return z * mask_bf16.astype(f32) * INV_KEEP

        x = x_ref[...]        # [M, FIN]  f32
        adj = adj_ref[...]    # [M, M]    bf16 block-diagonal adjacency

        # ---- pre-MLP: 3 x (Linear, ReLU, Linear, ReLU) ----
        x = jnp.maximum(mm(x, pre_w1_ref[...]) + pre_b1_ref[...], 0.0)
        for li in range(2 * NUM_PRE - 1):
            x = jnp.maximum(mm(x, pre_wr_ref[li]) + pre_br_ref[li], 0.0)

        # ---- GIN layers ----
        for k in range(NUM_GRAPH):
            # GIN aggregation: one block-diagonal [M,M] @ [M,64] matmul
            # (all graphs share the adjacency; edge weights = 1, self-loops
            # included; no (1+eps)*x term in WeightedGINConv).
            z = jnp.dot(adj, x.astype(bf16), preferred_element_type=f32)

            for half in range(2):      # (Linear, BatchNorm, Dropout, ReLU) x 2
                li = 2 * k + half
                z = mm(z, g_w_ref[li]) + g_b_ref[li]
                z = bn_train(z, bn_g_ref[li], bn_b_ref[li])
                z = dropout(z, dn_ref[li])
                z = jnp.maximum(z, 0.0)
            x = z

            # global_add_pool: one batched row-sum, written straight into the
            # lane-dense pooled scratch at column offset k*64 (no concats).
            h_scr[:, k * DIM_GRAPH:(k + 1) * DIM_GRAPH] = jnp.sum(
                x.reshape(B, N, DIM_GRAPH), axis=1)

        h = h_scr[...]                 # [B, NUM_GRAPH * 64] = [B, 384]

        # ---- post-MLP ----
        h = mm(h, post_w0_ref[...]) + post_b0_ref[...]
        h = jnp.maximum(dropout(h, dp_ref[0]), 0.0)
        for li in range(2 * (NUM_POST - 1)):
            h = mm(h, post_wm_ref[li]) + post_bm_ref[li]
            h = jnp.maximum(dropout(h, dp_ref[li + 1]), 0.0)

        # Final [64 -> 1] projection as a VPU multiply + lane reduction
        # (avoids an N=1-padded MXU matmul).  Last post layer has no sigmoid.
        out_ref[...] = (jnp.sum(h * post_wlt_ref[...], axis=1, keepdims=True)
                        + post_bl_ref[...])

    return kernel


# ---------------- glue: parameters + pallas_call ----------------
def init_params(key, num_node_features):
    def lin(k, fan_in, fan_out):
        k1, k2 = jax.random.split(k)
        bound = 1.0 / np.sqrt(fan_in)
        w = jax.random.uniform(k1, (fan_in, fan_out), jnp.float32, -bound, bound)
        b = jax.random.uniform(k2, (1, fan_out), jnp.float32, -bound, bound)
        return w, b

    keys = iter(jax.random.split(key, 64))

    pre_w1, pre_b1 = lin(next(keys), num_node_features, DIM_PRE)
    pre_wr, pre_br = [], []
    for _ in range(2 * NUM_PRE - 1):
        w, b = lin(next(keys), DIM_PRE, DIM_PRE)
        pre_wr.append(w); pre_br.append(b)
    pre_wr = jnp.stack(pre_wr); pre_br = jnp.stack(pre_br)

    g_w, g_b = [], []
    for _ in range(2 * NUM_GRAPH):
        w, b = lin(next(keys), DIM_GRAPH, DIM_GRAPH)
        g_w.append(w); g_b.append(b)
    g_w = jnp.stack(g_w); g_b = jnp.stack(g_b)
    bn_g = jnp.ones((2 * NUM_GRAPH, 1, DIM_GRAPH), jnp.float32)
    bn_b = jnp.zeros((2 * NUM_GRAPH, 1, DIM_GRAPH), jnp.float32)

    post_w0, post_b0 = lin(next(keys), NUM_GRAPH * DIM_GRAPH, DIM_POST)
    post_wm, post_bm = [], []
    for _ in range(2 * (NUM_POST - 1)):
        w, b = lin(next(keys), DIM_POST, DIM_POST)
        post_wm.append(w); post_bm.append(b)
    post_wm = jnp.stack(post_wm); post_bm = jnp.stack(post_bm)
    post_wl, post_bl = lin(next(keys), DIM_POST, 1)

    return (pre_w1, pre_b1, pre_wr, pre_br,
            g_w, g_b, bn_g, bn_b,
            post_w0, post_b0, post_wm, post_bm,
            post_wl, post_bl)


def prepare_params(params):
    """Cast matmul weights to bf16 (MXU inputs); biases/BN stay f32."""
    (pre_w1, pre_b1, pre_wr, pre_br,
     g_w, g_b, bn_g, bn_b,
     post_w0, post_b0, post_wm, post_bm,
     post_wl, post_bl) = params
    bf16 = jnp.bfloat16
    return (pre_w1.astype(bf16), pre_b1, pre_wr.astype(bf16), pre_br,
            g_w.astype(bf16), g_b, bn_g, bn_b,
            post_w0.astype(bf16), post_b0, post_wm.astype(bf16), post_bm,
            post_wl.reshape(1, DIM_POST).astype(jnp.float32),  # row vec for VPU dot
            post_bl)


def gin_forward(x, adj_blk, drop_node, drop_post, kparams):
    B = drop_post.shape[1]
    M = x.shape[0]
    assert M % B == 0 and adj_blk.shape == (M, M)
    N = M // B
    args = (x, adj_blk, drop_node, drop_post) + kparams
    in_specs = [pl.BlockSpec(memory_space=pltpu.MemorySpace.VMEM) for _ in args]
    return pl.pallas_call(
        make_gin_kernel(B, N),
        out_shape=jax.ShapeDtypeStruct((B, 1), jnp.float32),
        in_specs=in_specs,
        out_specs=pl.BlockSpec(memory_space=pltpu.MemorySpace.VMEM),
        scratch_shapes=[pltpu.VMEM((B, NUM_GRAPH * DIM_GRAPH), jnp.float32)],
    )(*args)


if __name__ == "__main__":
    # small synthetic shapes consistent with the module's data pipeline
    B = 2                    # graphs in the batch
    N = 16                   # num_nodes per graph
    FIN = 8                  # num_node_features
    M = B * N

    key = jax.random.PRNGKey(0)
    kx, kp, kd1, kd2 = jax.random.split(key, 4)

    # node features, flattened over the batch of graphs (rows grouped by graph)
    x = jax.random.normal(kx, (M, FIN), jnp.float32)

    # per-graph adjacency (create_adjacency_matrix + networkx symmetrization),
    # edge weights all 1, self-loops included; shared by every graph.  The
    # shared block is expanded once (host side) to a block-diagonal [M, M]
    # matrix so the kernel does a single aggregation matmul per GIN layer.
    A = create_adjacency_matrix(N, directionality=False)
    A = np.maximum(A, A.T)
    A_blk = np.kron(np.eye(B), A)                       # [M, M] block-diagonal
    adj_blk = jnp.asarray(A_blk, jnp.float32).astype(jnp.bfloat16)

    params = init_params(kp, FIN)
    kparams = prepare_params(params)

    # training-mode dropout: binary keep masks (0/1) in bf16 (half the DMA
    # bytes); the exact 1/(1-p) rescale happens in-kernel in f32.
    # TODO(synk): dropout bit-stream differs from torch's RNG; training-mode
    # dropout + BatchNorm semantics otherwise match.
    keep = 1.0 - DROPOUT_P
    drop_node = jax.random.bernoulli(
        kd1, keep, (NUM_NODE_DROPS, M, DIM_GRAPH)).astype(jnp.bfloat16)
    drop_post = jax.random.bernoulli(
        kd2, keep, (NUM_POST_DROPS, B, DIM_POST)).astype(jnp.bfloat16)

    out = gin_forward(x, adj_blk, drop_node, drop_post, kparams)
    out = jax.block_until_ready(out)
    assert out.shape == (B, 1)
    print("KERNEL_OK")
</pallas_src>

<mosaic_0001>
module attributes {stable_mosaic.version = 11 : i64} {
  func.func @kernel(%arg0: memref<32x8xf32, #tpu.memory_space<vmem>>, %arg1: memref<32x32xbf16, #tpu.memory_space<vmem>>, %arg2: memref<12x32x64xbf16, #tpu.memory_space<vmem>>, %arg3: memref<5x2x64xbf16, #tpu.memory_space<vmem>>, %arg4: memref<8x64xbf16, #tpu.memory_space<vmem>>, %arg5: memref<1x64xf32, #tpu.memory_space<vmem>>, %arg6: memref<5x64x64xbf16, #tpu.memory_space<vmem>>, %arg7: memref<5x1x64xf32, #tpu.memory_space<vmem>>, %arg8: memref<12x64x64xbf16, #tpu.memory_space<vmem>>, %arg9: memref<12x1x64xf32, #tpu.memory_space<vmem>>, %arg10: memref<12x1x64xf32, #tpu.memory_space<vmem>>, %arg11: memref<12x1x64xf32, #tpu.memory_space<vmem>>, %arg12: memref<384x64xbf16, #tpu.memory_space<vmem>>, %arg13: memref<1x64xf32, #tpu.memory_space<vmem>>, %arg14: memref<4x64x64xbf16, #tpu.memory_space<vmem>>, %arg15: memref<4x1x64xf32, #tpu.memory_space<vmem>>, %arg16: memref<1x64xf32, #tpu.memory_space<vmem>>, %arg17: memref<1x1xf32, #tpu.memory_space<vmem>>, %arg18: memref<2x1xf32, #tpu.memory_space<vmem>>, %arg19: memref<2x384xf32, #tpu.memory_space<vmem>>) attributes {dimension_semantics = [], scalar_prefetch = 0 : i64, scratch_operands = 1 : i64, tpu.core_type = #tpu.core_type<tc>} {
    %c0 = arith.constant 0 : index
    %c0_0 = arith.constant 0 : index
    %0 = vector.load %arg0[%c0, %c0_0] : memref<32x8xf32, #tpu.memory_space<vmem>>, vector<32x8xf32>
    %c0_1 = arith.constant 0 : index
    %c0_2 = arith.constant 0 : index
    %1 = vector.load %arg1[%c0_1, %c0_2] : memref<32x32xbf16, #tpu.memory_space<vmem>>, vector<32x32xbf16>
    %c0_3 = arith.constant 0 : index
    %c0_4 = arith.constant 0 : index
    %2 = vector.load %arg4[%c0_3, %c0_4] : memref<8x64xbf16, #tpu.memory_space<vmem>>, vector<8x64xbf16>
    %3 = arith.truncf %0 : vector<32x8xf32> to vector<32x8xbf16>
    %cst = arith.constant dense<0.000000e+00> : vector<32x64xf32>
    %4 = tpu.matmul %3, %2, %cst {dimension_numbers = #tpu.dot_dimension_numbers<[1], [0], [0], [1], [0, 0, 1, 1], [], []>} : vector<32x8xbf16>, vector<8x64xbf16>, vector<32x64xf32> -> vector<32x64xf32>
    %c0_5 = arith.constant 0 : index
    %c0_6 = arith.constant 0 : index
    %5 = vector.load %arg5[%c0_5, %c0_6] : memref<1x64xf32, #tpu.memory_space<vmem>>, vector<1x64xf32>
    %6 = vector.broadcast %5 : vector<1x64xf32> to vector<32x64xf32>
    %7 = arith.addf %4, %6 : vector<32x64xf32>
    %cst_7 = arith.constant 0.000000e+00 : f32
    %8 = vector.broadcast %cst_7 : f32 to vector<32x64xf32>
    %9 = arith.maximumf %7, %8 : vector<32x64xf32>
    %c0_8 = arith.constant 0 : index
    %c0_9 = arith.constant 0 : index
    %c0_10 = arith.constant 0 : index
    %10 = vector.load %arg6[%c0_8, %c0_9, %c0_10] : memref<5x64x64xbf16, #tpu.memory_space<vmem>>, vector<1x64x64xbf16>
    %11 = vector.shape_cast %10 : vector<1x64x64xbf16> to vector<64x64xbf16>
    %12 = arith.truncf %9 : vector<32x64xf32> to vector<32x64xbf16>
    %cst_11 = arith.constant dense<0.000000e+00> : vector<32x64xf32>
    %13 = tpu.matmul %12, %11, %cst_11 {dimension_numbers = #tpu.dot_dimension_numbers<[1], [0], [0], [1], [0, 0, 1, 1], [], []>} : vector<32x64xbf16>, vector<64x64xbf16>, vector<32x64xf32> -> vector<32x64xf32>
    %c0_12 = arith.constant 0 : index
    %c0_13 = arith.constant 0 : index
    %c0_14 = arith.constant 0 : index
    %14 = vector.load %arg7[%c0_12, %c0_13, %c0_14] : memref<5x1x64xf32, #tpu.memory_space<vmem>>, vector<1x1x64xf32>
    %15 = vector.shape_cast %14 : vector<1x1x64xf32> to vector<1x64xf32>
    %16 = vector.broadcast %15 : vector<1x64xf32> to vector<32x64xf32>
    %17 = arith.addf %13, %16 : vector<32x64xf32>
    %cst_15 = arith.constant 0.000000e+00 : f32
    %18 = vector.broadcast %cst_15 : f32 to vector<32x64xf32>
    %19 = arith.maximumf %17, %18 : vector<32x64xf32>
    %c1 = arith.constant 1 : index
    %c0_16 = arith.constant 0 : index
    %c0_17 = arith.constant 0 : index
    %20 = vector.load %arg6[%c1, %c0_16, %c0_17] : memref<5x64x64xbf16, #tpu.memory_space<vmem>>, vector<1x64x64xbf16>
    %21 = vector.shape_cast %20 : vector<1x64x64xbf16> to vector<64x64xbf16>
    %22 = arith.truncf %19 : vector<32x64xf32> to vector<32x64xbf16>
    %cst_18 = arith.constant dense<0.000000e+00> : vector<32x64xf32>
    %23 = tpu.matmul %22, %21, %cst_18 {dimension_numbers = #tpu.dot_dimension_numbers<[1], [0], [0], [1], [0, 0, 1, 1], [], []>} : vector<32x64xbf16>, vector<64x64xbf16>, vector<32x64xf32> -> vector<32x64xf32>
    %c1_19 = arith.constant 1 : index
    %c0_20 = arith.constant 0 : index
    %c0_21 = arith.constant 0 : index
    %24 = vector.load %arg7[%c1_19, %c0_20, %c0_21] : memref<5x1x64xf32, #tpu.memory_space<vmem>>, vector<1x1x64xf32>
    %25 = vector.shape_cast %24 : vector<1x1x64xf32> to vector<1x64xf32>
    %26 = vector.broadcast %25 : vector<1x64xf32> to vector<32x64xf32>
    %27 = arith.addf %23, %26 : vector<32x64xf32>
    %cst_22 = arith.constant 0.000000e+00 : f32
    %28 = vector.broadcast %cst_22 : f32 to vector<32x64xf32>
    %29 = arith.maximumf %27, %28 : vector<32x64xf32>
    %c2 = arith.constant 2 : index
    %c0_23 = arith.constant 0 : index
    %c0_24 = arith.constant 0 : index
    %30 = vector.load %arg6[%c2, %c0_23, %c0_24] : memref<5x64x64xbf16, #tpu.memory_space<vmem>>, vector<1x64x64xbf16>
    %31 = vector.shape_cast %30 : vector<1x64x64xbf16> to vector<64x64xbf16>
    %32 = arith.truncf %29 : vector<32x64xf32> to vector<32x64xbf16>
    %cst_25 = arith.constant dense<0.000000e+00> : vector<32x64xf32>
    %33 = tpu.matmul %32, %31, %cst_25 {dimension_numbers = #tpu.dot_dimension_numbers<[1], [0], [0], [1], [0, 0, 1, 1], [], []>} : vector<32x64xbf16>, vector<64x64xbf16>, vector<32x64xf32> -> vector<32x64xf32>
    %c2_26 = arith.constant 2 : index
    %c0_27 = arith.constant 0 : index
    %c0_28 = arith.constant 0 : index
    %34 = vector.load %arg7[%c2_26, %c0_27, %c0_28] : memref<5x1x64xf32, #tpu.memory_space<vmem>>, vector<1x1x64xf32>
    %35 = vector.shape_cast %34 : vector<1x1x64xf32> to vector<1x64xf32>
    %36 = vector.broadcast %35 : vector<1x64xf32> to vector<32x64xf32>
    %37 = arith.addf %33, %36 : vector<32x64xf32>
    %cst_29 = arith.constant 0.000000e+00 : f32
    %38 = vector.broadcast %cst_29 : f32 to vector<32x64xf32>
    %39 = arith.maximumf %37, %38 : vector<32x64xf32>
    %c3 = arith.constant 3 : index
    %c0_30 = arith.constant 0 : index
    %c0_31 = arith.constant 0 : index
    %40 = vector.load %arg6[%c3, %c0_30, %c0_31] : memref<5x64x64xbf16, #tpu.memory_space<vmem>>, vector<1x64x64xbf16>
    %41 = vector.shape_cast %40 : vector<1x64x64xbf16> to vector<64x64xbf16>
    %42 = arith.truncf %39 : vector<32x64xf32> to vector<32x64xbf16>
    %cst_32 = arith.constant dense<0.000000e+00> : vector<32x64xf32>
    %43 = tpu.matmul %42, %41, %cst_32 {dimension_numbers = #tpu.dot_dimension_numbers<[1], [0], [0], [1], [0, 0, 1, 1], [], []>} : vector<32x64xbf16>, vector<64x64xbf16>, vector<32x64xf32> -> vector<32x64xf32>
    %c3_33 = arith.constant 3 : index
    %c0_34 = arith.constant 0 : index
    %c0_35 = arith.constant 0 : index
    %44 = vector.load %arg7[%c3_33, %c0_34, %c0_35] : memref<5x1x64xf32, #tpu.memory_space<vmem>>, vector<1x1x64xf32>
    %45 = vector.shape_cast %44 : vector<1x1x64xf32> to vector<1x64xf32>
    %46 = vector.broadcast %45 : vector<1x64xf32> to vector<32x64xf32>
    %47 = arith.addf %43, %46 : vector<32x64xf32>
    %cst_36 = arith.constant 0.000000e+00 : f32
    %48 = vector.broadcast %cst_36 : f32 to vector<32x64xf32>
    %49 = arith.maximumf %47, %48 : vector<32x64xf32>
    %c4 = arith.constant 4 : index
    %c0_37 = arith.constant 0 : index
    %c0_38 = arith.constant 0 : index
    %50 = vector.load %arg6[%c4, %c0_37, %c0_38] : memref<5x64x64xbf16, #tpu.memory_space<vmem>>, vector<1x64x64xbf16>
    %51 = vector.shape_cast %50 : vector<1x64x64xbf16> to vector<64x64xbf16>
    %52 = arith.truncf %49 : vector<32x64xf32> to vector<32x64xbf16>
    %cst_39 = arith.constant dense<0.000000e+00> : vector<32x64xf32>
    %53 = tpu.matmul %52, %51, %cst_39 {dimension_numbers = #tpu.dot_dimension_numbers<[1], [0], [0], [1], [0, 0, 1, 1], [], []>} : vector<32x64xbf16>, vector<64x64xbf16>, vector<32x64xf32> -> vector<32x64xf32>
    %c4_40 = arith.constant 4 : index
    %c0_41 = arith.constant 0 : index
    %c0_42 = arith.constant 0 : index
    %54 = vector.load %arg7[%c4_40, %c0_41, %c0_42] : memref<5x1x64xf32, #tpu.memory_space<vmem>>, vector<1x1x64xf32>
    %55 = vector.shape_cast %54 : vector<1x1x64xf32> to vector<1x64xf32>
    %56 = vector.broadcast %55 : vector<1x64xf32> to vector<32x64xf32>
    %57 = arith.addf %53, %56 : vector<32x64xf32>
    %cst_43 = arith.constant 0.000000e+00 : f32
    %58 = vector.broadcast %cst_43 : f32 to vector<32x64xf32>
    %59 = arith.maximumf %57, %58 : vector<32x64xf32>
    %60 = arith.truncf %59 : vector<32x64xf32> to vector<32x64xbf16>
    %cst_44 = arith.constant dense<0.000000e+00> : vector<32x64xf32>
    %61 = tpu.matmul %1, %60, %cst_44 {dimension_numbers = #tpu.dot_dimension_numbers<[1], [0], [0], [1], [0, 0, 1, 1], [], []>} : vector<32x32xbf16>, vector<32x64xbf16>, vector<32x64xf32> -> vector<32x64xf32>
    %c0_45 = arith.constant 0 : index
    %c0_46 = arith.constant 0 : index
    %c0_47 = arith.constant 0 : index
    %62 = vector.load %arg8[%c0_45, %c0_46, %c0_47] : memref<12x64x64xbf16, #tpu.memory_space<vmem>>, vector<1x64x64xbf16>
    %63 = vector.shape_cast %62 : vector<1x64x64xbf16> to vector<64x64xbf16>
    %64 = arith.truncf %61 : vector<32x64xf32> to vector<32x64xbf16>
    %cst_48 = arith.constant dense<0.000000e+00> : vector<32x64xf32>
    %65 = tpu.matmul %64, %63, %cst_48 {dimension_numbers = #tpu.dot_dimension_numbers<[1], [0], [0], [1], [0, 0, 1, 1], [], []>} : vector<32x64xbf16>, vector<64x64xbf16>, vector<32x64xf32> -> vector<32x64xf32>
    %c0_49 = arith.constant 0 : index
    %c0_50 = arith.constant 0 : index
    %c0_51 = arith.constant 0 : index
    %66 = vector.load %arg9[%c0_49, %c0_50, %c0_51] : memref<12x1x64xf32, #tpu.memory_space<vmem>>, vector<1x1x64xf32>
    %67 = vector.shape_cast %66 : vector<1x1x64xf32> to vector<1x64xf32>
    %68 = vector.broadcast %67 : vector<1x64xf32> to vector<32x64xf32>
    %69 = arith.addf %65, %68 : vector<32x64xf32>
    %c0_52 = arith.constant 0 : index
    %c0_53 = arith.constant 0 : index
    %c0_54 = arith.constant 0 : index
    %70 = vector.load %arg10[%c0_52, %c0_53, %c0_54] : memref<12x1x64xf32, #tpu.memory_space<vmem>>, vector<1x1x64xf32>
    %71 = vector.shape_cast %70 : vector<1x1x64xf32> to vector<1x64xf32>
    %c0_55 = arith.constant 0 : index
    %c0_56 = arith.constant 0 : index
    %c0_57 = arith.constant 0 : index
    %72 = vector.load %arg11[%c0_55, %c0_56, %c0_57] : memref<12x1x64xf32, #tpu.memory_space<vmem>>, vector<1x1x64xf32>
    %73 = vector.shape_cast %72 : vector<1x1x64xf32> to vector<1x64xf32>
    %cst_58 = arith.constant dense<0.000000e+00> : vector<64xf32>
    %74 = vector.multi_reduction <add>, %69, %cst_58 [0] : vector<32x64xf32> to vector<64xf32>
    %75 = vector.shape_cast %74 : vector<64xf32> to vector<1x64xf32>
    %cst_59 = arith.constant 3.200000e+01 : f32
    %76 = vector.broadcast %cst_59 : f32 to vector<1x64xf32>
    %77 = arith.divf %75, %76 : vector<1x64xf32>
    %78 = vector.broadcast %77 : vector<1x64xf32> to vector<32x64xf32>
    %79 = arith.subf %69, %78 : vector<32x64xf32>
    %80 = arith.mulf %79, %79 : vector<32x64xf32>
    %cst_60 = arith.constant dense<0.000000e+00> : vector<64xf32>
    %81 = vector.multi_reduction <add>, %80, %cst_60 [0] : vector<32x64xf32> to vector<64xf32>
    %82 = vector.shape_cast %81 : vector<64xf32> to vector<1x64xf32>
    %cst_61 = arith.constant 3.200000e+01 : f32
    %83 = vector.broadcast %cst_61 : f32 to vector<1x64xf32>
    %84 = arith.divf %82, %83 : vector<1x64xf32>
    %cst_62 = arith.constant 9.99999974E-6 : f32
    %85 = vector.broadcast %cst_62 : f32 to vector<1x64xf32>
    %86 = arith.addf %84, %85 : vector<1x64xf32>
    %87 = math.rsqrt %86 : vector<1x64xf32>
    %88 = arith.mulf %87, %71 : vector<1x64xf32>
    %89 = vector.broadcast %88 : vector<1x64xf32> to vector<32x64xf32>
    %90 = arith.mulf %79, %89 : vector<32x64xf32>
    %91 = vector.broadcast %73 : vector<1x64xf32> to vector<32x64xf32>
    %92 = arith.addf %90, %91 : vector<32x64xf32>
    %c0_63 = arith.constant 0 : index
    %c0_64 = arith.constant 0 : index
    %c0_65 = arith.constant 0 : index
    %93 = vector.load %arg2[%c0_63, %c0_64, %c0_65] : memref<12x32x64xbf16, #tpu.memory_space<vmem>>, vector<1x32x64xbf16>
    %94 = vector.shape_cast %93 : vector<1x32x64xbf16> to vector<32x64xbf16>
    %95 = arith.extf %94 : vector<32x64xbf16> to vector<32x64xf32>
    %96 = arith.mulf %92, %95 : vector<32x64xf32>
    %cst_66 = arith.constant 1.11111116 : f32
    %97 = vector.broadcast %cst_66 : f32 to vector<32x64xf32>
    %98 = arith.mulf %96, %97 : vector<32x64xf32>
    %cst_67 = arith.constant 0.000000e+00 : f32
    %99 = vector.broadcast %cst_67 : f32 to vector<32x64xf32>
    %100 = arith.maximumf %98, %99 : vector<32x64xf32>
    %c1_68 = arith.constant 1 : index
    %c0_69 = arith.constant 0 : index
    %c0_70 = arith.constant 0 : index
    %101 = vector.load %arg8[%c1_68, %c0_69, %c0_70] : memref<12x64x64xbf16, #tpu.memory_space<vmem>>, vector<1x64x64xbf16>
    %102 = vector.shape_cast %101 : vector<1x64x64xbf16> to vector<64x64xbf16>
    %103 = arith.truncf %100 : vector<32x64xf32> to vector<32x64xbf16>
    %cst_71 = arith.constant dense<0.000000e+00> : vector<32x64xf32>
    %104 = tpu.matmul %103, %102, %cst_71 {dimension_numbers = #tpu.dot_dimension_numbers<[1], [0], [0], [1], [0, 0, 1, 1], [], []>} : vector<32x64xbf16>, vector<64x64xbf16>, vector<32x64xf32> -> vector<32x64xf32>
    %c1_72 = arith.constant 1 : index
    %c0_73 = arith.constant 0 : index
    %c0_74 = arith.constant 0 : index
    %105 = vector.load %arg9[%c1_72, %c0_73, %c0_74] : memref<12x1x64xf32, #tpu.memory_space<vmem>>, vector<1x1x64xf32>
    %106 = vector.shape_cast %105 : vector<1x1x64xf32> to vector<1x64xf32>
    %107 = vector.broadcast %106 : vector<1x64xf32> to vector<32x64xf32>
    %108 = arith.addf %104, %107 : vector<32x64xf32>
    %c1_75 = arith.constant 1 : index
    %c0_76 = arith.constant 0 : index
    %c0_77 = arith.constant 0 : index
    %109 = vector.load %arg10[%c1_75, %c0_76, %c0_77] : memref<12x1x64xf32, #tpu.memory_space<vmem>>, vector<1x1x64xf32>
    %110 = vector.shape_cast %109 : vector<1x1x64xf32> to vector<1x64xf32>
    %c1_78 = arith.constant 1 : index
    %c0_79 = arith.constant 0 : index
    %c0_80 = arith.constant 0 : index
    %111 = vector.load %arg11[%c1_78, %c0_79, %c0_80] : memref<12x1x64xf32, #tpu.memory_space<vmem>>, vector<1x1x64xf32>
    %112 = vector.shape_cast %111 : vector<1x1x64xf32> to vector<1x64xf32>
    %cst_81 = arith.constant dense<0.000000e+00> : vector<64xf32>
    %113 = vector.multi_reduction <add>, %108, %cst_81 [0] : vector<32x64xf32> to vector<64xf32>
    %114 = vector.shape_cast %113 : vector<64xf32> to vector<1x64xf32>
    %cst_82 = arith.constant 3.200000e+01 : f32
    %115 = vector.broadcast %cst_82 : f32 to vector<1x64xf32>
    %116 = arith.divf %114, %115 : vector<1x64xf32>
    %117 = vector.broadcast %116 : vector<1x64xf32> to vector<32x64xf32>
    %118 = arith.subf %108, %117 : vector<32x64xf32>
    %119 = arith.mulf %118, %118 : vector<32x64xf32>
    %cst_83 = arith.constant dense<0.000000e+00> : vector<64xf32>
    %120 = vector.multi_reduction <add>, %119, %cst_83 [0] : vector<32x64xf32> to vector<64xf32>
    %121 = vector.shape_cast %120 : vector<64xf32> to vector<1x64xf32>
    %cst_84 = arith.constant 3.200000e+01 : f32
    %122 = vector.broadcast %cst_84 : f32 to vector<1x64xf32>
    %123 = arith.divf %121, %122 : vector<1x64xf32>
    %cst_85 = arith.constant 9.99999974E-6 : f32
    %124 = vector.broadcast %cst_85 : f32 to vector<1x64xf32>
    %125 = arith.addf %123, %124 : vector<1x64xf32>
    %126 = math.rsqrt %125 : vector<1x64xf32>
    %127 = arith.mulf %126, %110 : vector<1x64xf32>
    %128 = vector.broadcast %127 : vector<1x64xf32> to vector<32x64xf32>
    %129 = arith.mulf %118, %128 : vector<32x64xf32>
    %130 = vector.broadcast %112 : vector<1x64xf32> to vector<32x64xf32>
    %131 = arith.addf %129, %130 : vector<32x64xf32>
    %c1_86 = arith.constant 1 : index
    %c0_87 = arith.constant 0 : index
    %c0_88 = arith.constant 0 : index
    %132 = vector.load %arg2[%c1_86, %c0_87, %c0_88] : memref<12x32x64xbf16, #tpu.memory_space<vmem>>, vector<1x32x64xbf16>
    %133 = vector.shape_cast %132 : vector<1x32x64xbf16> to vector<32x64xbf16>
    %134 = arith.extf %133 : vector<32x64xbf16> to vector<32x64xf32>
    %135 = arith.mulf %131, %134 : vector<32x64xf32>
    %cst_89 = arith.constant 1.11111116 : f32
    %136 = vector.broadcast %cst_89 : f32 to vector<32x64xf32>
    %137 = arith.mulf %135, %136 : vector<32x64xf32>
    %cst_90 = arith.constant 0.000000e+00 : f32
    %138 = vector.broadcast %cst_90 : f32 to vector<32x64xf32>
    %139 = arith.maximumf %137, %138 : vector<32x64xf32>
    %140 = vector.shape_cast %139 : vector<32x64xf32> to vector<2x16x64xf32>
    %cst_91 = arith.constant dense<0.000000e+00> : vector<2x64xf32>
    %141 = vector.multi_reduction <add>, %140, %cst_91 [1] : vector<2x16x64xf32> to vector<2x64xf32>
    %c0_92 = arith.constant 0 : index
    %c0_93 = arith.constant 0 : index
    %142 = vector.load %arg19[%c0_92, %c0_93] : memref<2x384xf32, #tpu.memory_space<vmem>>, vector<2x64xf32>
    tpu.vector_store %arg19[%c0_92, %c0_93], %141 {strides = array<i32>} : memref<2x384xf32, #tpu.memory_space<vmem>>, vector<2x64xf32>,
    %143 = arith.truncf %139 : vector<32x64xf32> to vector<32x64xbf16>
    %cst_94 = arith.constant dense<0.000000e+00> : vector<32x64xf32>
    %144 = tpu.matmul %1, %143, %cst_94 {dimension_numbers = #tpu.dot_dimension_numbers<[1], [0], [0], [1], [0, 0, 1, 1], [], []>} : vector<32x32xbf16>, vector<32x64xbf16>, vector<32x64xf32> -> vector<32x64xf32>
    %c2_95 = arith.constant 2 : index
    %c0_96 = arith.constant 0 : index
    %c0_97 = arith.constant 0 : index
    %145 = vector.load %arg8[%c2_95, %c0_96, %c0_97] : memref<12x64x64xbf16, #tpu.memory_space<vmem>>, vector<1x64x64xbf16>
    %146 = vector.shape_cast %145 : vector<1x64x64xbf16> to vector<64x64xbf16>
    %147 = arith.truncf %144 : vector<32x64xf32> to vector<32x64xbf16>
    %cst_98 = arith.constant dense<0.000000e+00> : vector<32x64xf32>
    %148 = tpu.matmul %147, %146, %cst_98 {dimension_numbers = #tpu.dot_dimension_numbers<[1], [0], [0], [1], [0, 0, 1, 1], [], []>} : vector<32x64xbf16>, vector<64x64xbf16>, vector<32x64xf32> -> vector<32x64xf32>
    %c2_99 = arith.constant 2 : index
    %c0_100 = arith.constant 0 : index
    %c0_101 = arith.constant 0 : index
    %149 = vector.load %arg9[%c2_99, %c0_100, %c0_101] : memref<12x1x64xf32, #tpu.memory_space<vmem>>, vector<1x1x64xf32>
    %150 = vector.shape_cast %149 : vector<1x1x64xf32> to vector<1x64xf32>
    %151 = vector.broadcast %150 : vector<1x64xf32> to vector<32x64xf32>
    %152 = arith.addf %148, %151 : vector<32x64xf32>
    %c2_102 = arith.constant 2 : index
    %c0_103 = arith.constant 0 : index
    %c0_104 = arith.constant 0 : index
    %153 = vector.load %arg10[%c2_102, %c0_103, %c0_104] : memref<12x1x64xf32, #tpu.memory_space<vmem>>, vector<1x1x64xf32>
    %154 = vector.shape_cast %153 : vector<1x1x64xf32> to vector<1x64xf32>
    %c2_105 = arith.constant 2 : index
    %c0_106 = arith.constant 0 : index
    %c0_107 = arith.constant 0 : index
    %155 = vector.load %arg11[%c2_105, %c0_106, %c0_107] : memref<12x1x64xf32, #tpu.memory_space<vmem>>, vector<1x1x64xf32>
    %156 = vector.shape_cast %155 : vector<1x1x64xf32> to vector<1x64xf32>
    %cst_108 = arith.constant dense<0.000000e+00> : vector<64xf32>
    %157 = vector.multi_reduction <add>, %152, %cst_108 [0] : vector<32x64xf32> to vector<64xf32>
    %158 = vector.shape_cast %157 : vector<64xf32> to vector<1x64xf32>
    %cst_109 = arith.constant 3.200000e+01 : f32
    %159 = vector.broadcast %cst_109 : f32 to vector<1x64xf32>
    %160 = arith.divf %158, %159 : vector<1x64xf32>
    %161 = vector.broadcast %160 : vector<1x64xf32> to vector<32x64xf32>
    %162 = arith.subf %152, %161 : vector<32x64xf32>
    %163 = arith.mulf %162, %162 : vector<32x64xf32>
    %cst_110 = arith.constant dense<0.000000e+00> : vector<64xf32>
    %164 = vector.multi_reduction <add>, %163, %cst_110 [0] : vector<32x64xf32> to vector<64xf32>
    %165 = vector.shape_cast %164 : vector<64xf32> to vector<1x64xf32>
    %cst_111 = arith.constant 3.200000e+01 : f32
    %166 = vector.broadcast %cst_111 : f32 to vector<1x64xf32>
    %167 = arith.divf %165, %166 : vector<1x64xf32>
    %cst_112 = arith.constant 9.99999974E-6 : f32
    %168 = vector.broadcast %cst_112 : f32 to vector<1x64xf32>
    %169 = arith.addf %167, %168 : vector<1x64xf32>
    %170 = math.rsqrt %169 : vector<1x64xf32>
    %171 = arith.mulf %170, %154 : vector<1x64xf32>
    %172 = vector.broadcast %171 : vector<1x64xf32> to vector<32x64xf32>
    %173 = arith.mulf %162, %172 : vector<32x64xf32>
    %174 = vector.broadcast %156 : vector<1x64xf32> to vector<32x64xf32>
    %175 = arith.addf %173, %174 : vector<32x64xf32>
    %c2_113 = arith.constant 2 : index
    %c0_114 = arith.constant 0 : index
    %c0_115 = arith.constant 0 : index
    %176 = vector.load %arg2[%c2_113, %c0_114, %c0_115] : memref<12x32x64xbf16, #tpu.memory_space<vmem>>, vector<1x32x64xbf16>
    %177 = vector.shape_cast %176 : vector<1x32x64xbf16> to vector<32x64xbf16>
    %178 = arith.extf %177 : vector<32x64xbf16> to vector<32x64xf32>
    %179 = arith.mulf %175, %178 : vector<32x64xf32>
    %cst_116 = arith.constant 1.11111116 : f32
    %180 = vector.broadcast %cst_116 : f32 to vector<32x64xf32>
    %181 = arith.mulf %179, %180 : vector<32x64xf32>
    %cst_117 = arith.constant 0.000000e+00 : f32
    %182 = vector.broadcast %cst_117 : f32 to vector<32x64xf32>
    %183 = arith.maximumf %181, %182 : vector<32x64xf32>
    %c3_118 = arith.constant 3 : index
    %c0_119 = arith.constant 0 : index
    %c0_120 = arith.constant 0 : index
    %184 = vector.load %arg8[%c3_118, %c0_119, %c0_120] : memref<12x64x64xbf16, #tpu.memory_space<vmem>>, vector<1x64x64xbf16>
    %185 = vector.shape_cast %184 : vector<1x64x64xbf16> to vector<64x64xbf16>
    %186 = arith.truncf %183 : vector<32x64xf32> to vector<32x64xbf16>
    %cst_121 = arith.constant dense<0.000000e+00> : vector<32x64xf32>
    %187 = tpu.matmul %186, %185, %cst_121 {dimension_numbers = #tpu.dot_dimension_numbers<[1], [0], [0], [1], [0, 0, 1, 1], [], []>} : vector<32x64xbf16>, vector<64x64xbf16>, vector<32x64xf32> -> vector<32x64xf32>
    %c3_122 = arith.constant 3 : index
    %c0_123 = arith.constant 0 : index
    %c0_124 = arith.constant 0 : index
    %188 = vector.load %arg9[%c3_122, %c0_123, %c0_124] : memref<12x1x64xf32, #tpu.memory_space<vmem>>, vector<1x1x64xf32>
    %189 = vector.shape_cast %188 : vector<1x1x64xf32> to vector<1x64xf32>
    %190 = vector.broadcast %189 : vector<1x64xf32> to vector<32x64xf32>
    %191 = arith.addf %187, %190 : vector<32x64xf32>
    %c3_125 = arith.constant 3 : index
    %c0_126 = arith.constant 0 : index
    %c0_127 = arith.constant 0 : index
    %192 = vector.load %arg10[%c3_125, %c0_126, %c0_127] : memref<12x1x64xf32, #tpu.memory_space<vmem>>, vector<1x1x64xf32>
    %193 = vector.shape_cast %192 : vector<1x1x64xf32> to vector<1x64xf32>
    %c3_128 = arith.constant 3 : index
    %c0_129 = arith.constant 0 : index
    %c0_130 = arith.constant 0 : index
    %194 = vector.load %arg11[%c3_128, %c0_129, %c0_130] : memref<12x1x64xf32, #tpu.memory_space<vmem>>, vector<1x1x64xf32>
    %195 = vector.shape_cast %194 : vector<1x1x64xf32> to vector<1x64xf32>
    %cst_131 = arith.constant dense<0.000000e+00> : vector<64xf32>
    %196 = vector.multi_reduction <add>, %191, %cst_131 [0] : vector<32x64xf32> to vector<64xf32>
    %197 = vector.shape_cast %196 : vector<64xf32> to vector<1x64xf32>
    %cst_132 = arith.constant 3.200000e+01 : f32
    %198 = vector.broadcast %cst_132 : f32 to vector<1x64xf32>
    %199 = arith.divf %197, %198 : vector<1x64xf32>
    %200 = vector.broadcast %199 : vector<1x64xf32> to vector<32x64xf32>
    %201 = arith.subf %191, %200 : vector<32x64xf32>
    %202 = arith.mulf %201, %201 : vector<32x64xf32>
    %cst_133 = arith.constant dense<0.000000e+00> : vector<64xf32>
    %203 = vector.multi_reduction <add>, %202, %cst_133 [0] : vector<32x64xf32> to vector<64xf32>
    %204 = vector.shape_cast %203 : vector<64xf32> to vector<1x64xf32>
    %cst_134 = arith.constant 3.200000e+01 : f32
    %205 = vector.broadcast %cst_134 : f32 to vector<1x64xf32>
    %206 = arith.divf %204, %205 : vector<1x64xf32>
    %cst_135 = arith.constant 9.99999974E-6 : f32
    %207 = vector.broadcast %cst_135 : f32 to vector<1x64xf32>
    %208 = arith.addf %206, %207 : vector<1x64xf32>
    %209 = math.rsqrt %208 : vector<1x64xf32>
    %210 = arith.mulf %209, %193 : vector<1x64xf32>
    %211 = vector.broadcast %210 : vector<1x64xf32> to vector<32x64xf32>
    %212 = arith.mulf %201, %211 : vector<32x64xf32>
    %213 = vector.broadcast %195 : vector<1x64xf32> to vector<32x64xf32>
    %214 = arith.addf %212, %213 : vector<32x64xf32>
    %c3_136 = arith.constant 3 : index
    %c0_137 = arith.constant 0 : index
    %c0_138 = arith.constant 0 : index
    %215 = vector.load %arg2[%c3_136, %c0_137, %c0_138] : memref<12x32x64xbf16, #tpu.memory_space<vmem>>, vector<1x32x64xbf16>
    %216 = vector.shape_cast %215 : vector<1x32x64xbf16> to vector<32x64xbf16>
    %217 = arith.extf %216 : vector<32x64xbf16> to vector<32x64xf32>
    %218 = arith.mulf %214, %217 : vector<32x64xf32>
    %cst_139 = arith.constant 1.11111116 : f32
    %219 = vector.broadcast %cst_139 : f32 to vector<32x64xf32>
    %220 = arith.mulf %218, %219 : vector<32x64xf32>
    %cst_140 = arith.constant 0.000000e+00 : f32
    %221 = vector.broadcast %cst_140 : f32 to vector<32x64xf32>
    %222 = arith.maximumf %220, %221 : vector<32x64xf32>
    %223 = vector.shape_cast %222 : vector<32x64xf32> to vector<2x16x64xf32>
    %cst_141 = arith.constant dense<0.000000e+00> : vector<2x64xf32>
    %224 = vector.multi_reduction <add>, %223, %cst_141 [1] : vector<2x16x64xf32> to vector<2x64xf32>
    %c0_142 = arith.constant 0 : index
    %c64 = arith.constant 64 : index
    %225 = vector.load %arg19[%c0_142, %c64] : memref<2x384xf32, #tpu.memory_space<vmem>>, vector<2x64xf32>
    tpu.vector_store %arg19[%c0_142, %c64], %224 {strides = array<i32>} : memref<2x384xf32, #tpu.memory_space<vmem>>, vector<2x64xf32>,
    %226 = arith.truncf %222 : vector<32x64xf32> to vector<32x64xbf16>
    %cst_143 = arith.constant dense<0.000000e+00> : vector<32x64xf32>
    %227 = tpu.matmul %1, %226, %cst_143 {dimension_numbers = #tpu.dot_dimension_numbers<[1], [0], [0], [1], [0, 0, 1, 1], [], []>} : vector<32x32xbf16>, vector<32x64xbf16>, vector<32x64xf32> -> vector<32x64xf32>
    %c4_144 = arith.constant 4 : index
    %c0_145 = arith.constant 0 : index
    %c0_146 = arith.constant 0 : index
    %228 = vector.load %arg8[%c4_144, %c0_145, %c0_146] : memref<12x64x64xbf16, #tpu.memory_space<vmem>>, vector<1x64x64xbf16>
    %229 = vector.shape_cast %228 : vector<1x64x64xbf16> to vector<64x64xbf16>
    %230 = arith.truncf %227 : vector<32x64xf32> to vector<32x64xbf16>
    %cst_147 = arith.constant dense<0.000000e+00> : vector<32x64xf32>
    %231 = tpu.matmul %230, %229, %cst_147 {dimension_numbers = #tpu.dot_dimension_numbers<[1], [0], [0], [1], [0, 0, 1, 1], [], []>} : vector<32x64xbf16>, vector<64x64xbf16>, vector<32x64xf32> -> vector<32x64xf32>
    %c4_148 = arith.constant 4 : index
    %c0_149 = arith.constant 0 : index
    %c0_150 = arith.constant 0 : index
    %232 = vector.load %arg9[%c4_148, %c0_149, %c0_150] : memref<12x1x64xf32, #tpu.memory_space<vmem>>, vector<1x1x64xf32>
    %233 = vector.shape_cast %232 : vector<1x1x64xf32> to vector<1x64xf32>
    %234 = vector.broadcast %233 : vector<1x64xf32> to vector<32x64xf32>
    %235 = arith.addf %231, %234 : vector<32x64xf32>
    %c4_151 = arith.constant 4 : index
    %c0_152 = arith.constant 0 : index
    %c0_153 = arith.constant 0 : index
    %236 = vector.load %arg10[%c4_151, %c0_152, %c0_153] : memref<12x1x64xf32, #tpu.memory_space<vmem>>, vector<1x1x64xf32>
    %237 = vector.shape_cast %236 : vector<1x1x64xf32> to vector<1x64xf32>
    %c4_154 = arith.constant 4 : index
    %c0_155 = arith.constant 0 : index
    %c0_156 = arith.constant 0 : index
    %238 = vector.load %arg11[%c4_154, %c0_155, %c0_156] : memref<12x1x64xf32, #tpu.memory_space<vmem>>, vector<1x1x64xf32>
    %239 = vector.shape_cast %238 : vector<1x1x64xf32> to vector<1x64xf32>
    %cst_157 = arith.constant dense<0.000000e+00> : vector<64xf32>
    %240 = vector.multi_reduction <add>, %235, %cst_157 [0] : vector<32x64xf32> to vector<64xf32>
    %241 = vector.shape_cast %240 : vector<64xf32> to vector<1x64xf32>
    %cst_158 = arith.constant 3.200000e+01 : f32
    %242 = vector.broadcast %cst_158 : f32 to vector<1x64xf32>
    %243 = arith.divf %241, %242 : vector<1x64xf32>
    %244 = vector.broadcast %243 : vector<1x64xf32> to vector<32x64xf32>
    %245 = arith.subf %235, %244 : vector<32x64xf32>
    %246 = arith.mulf %245, %245 : vector<32x64xf32>
    %cst_159 = arith.constant dense<0.000000e+00> : vector<64xf32>
    %247 = vector.multi_reduction <add>, %246, %cst_159 [0] : vector<32x64xf32> to vector<64xf32>
    %248 = vector.shape_cast %247 : vector<64xf32> to vector<1x64xf32>
    %cst_160 = arith.constant 3.200000e+01 : f32
    %249 = vector.broadcast %cst_160 : f32 to vector<1x64xf32>
    %250 = arith.divf %248, %249 : vector<1x64xf32>
    %cst_161 = arith.constant 9.99999974E-6 : f32
    %251 = vector.broadcast %cst_161 : f32 to vector<1x64xf32>
    %252 = arith.addf %250, %251 : vector<1x64xf32>
    %253 = math.rsqrt %252 : vector<1x64xf32>
    %254 = arith.mulf %253, %237 : vector<1x64xf32>
    %255 = vector.broadcast %254 : vector<1x64xf32> to vector<32x64xf32>
    %256 = arith.mulf %245, %255 : vector<32x64xf32>
    %257 = vector.broadcast %239 : vector<1x64xf32> to vector<32x64xf32>
    %258 = arith.addf %256, %257 : vector<32x64xf32>
    %c4_162 = arith.constant 4 : index
    %c0_163 = arith.constant 0 : index
    %c0_164 = arith.constant 0 : index
    %259 = vector.load %arg2[%c4_162, %c0_163, %c0_164] : memref<12x32x64xbf16, #tpu.memory_space<vmem>>, vector<1x32x64xbf16>
    %260 = vector.shape_cast %259 : vector<1x32x64xbf16> to vector<32x64xbf16>
    %261 = arith.extf %260 : vector<32x64xbf16> to vector<32x64xf32>
    %262 = arith.mulf %258, %261 : vector<32x64xf32>
    %cst_165 = arith.constant 1.11111116 : f32
    %263 = vector.broadcast %cst_165 : f32 to vector<32x64xf32>
    %264 = arith.mulf %262, %263 : vector<32x64xf32>
    %cst_166 = arith.constant 0.000000e+00 : f32
    %265 = vector.broadcast %cst_166 : f32 to vector<32x64xf32>
    %266 = arith.maximumf %264, %265 : vector<32x64xf32>
    %c5 = arith.constant 5 : index
    %c0_167 = arith.constant 0 : index
    %c0_168 = arith.constant 0 : index
    %267 = vector.load %arg8[%c5, %c0_167, %c0_168] : memref<12x64x64xbf16, #tpu.memory_space<vmem>>, vector<1x64x64xbf16>
    %268 = vector.shape_cast %267 : vector<1x64x64xbf16> to vector<64x64xbf16>
    %269 = arith.truncf %266 : vector<32x64xf32> to vector<32x64xbf16>
    %cst_169 = arith.constant dense<0.000000e+00> : vector<32x64xf32>
    %270 = tpu.matmul %269, %268, %cst_169 {dimension_numbers = #tpu.dot_dimension_numbers<[1], [0], [0], [1], [0, 0, 1, 1], [], []>} : vector<32x64xbf16>, vector<64x64xbf16>, vector<32x64xf32> -> vector<32x64xf32>
    %c5_170 = arith.constant 5 : index
    %c0_171 = arith.constant 0 : index
    %c0_172 = arith.constant 0 : index
    %271 = vector.load %arg9[%c5_170, %c0_171, %c0_172] : memref<12x1x64xf32, #tpu.memory_space<vmem>>, vector<1x1x64xf32>
    %272 = vector.shape_cast %271 : vector<1x1x64xf32> to vector<1x64xf32>
    %273 = vector.broadcast %272 : vector<1x64xf32> to vector<32x64xf32>
    %274 = arith.addf %270, %273 : vector<32x64xf32>
    %c5_173 = arith.constant 5 : index
    %c0_174 = arith.constant 0 : index
    %c0_175 = arith.constant 0 : index
    %275 = vector.load %arg10[%c5_173, %c0_174, %c0_175] : memref<12x1x64xf32, #tpu.memory_space<vmem>>, vector<1x1x64xf32>
    %276 = vector.shape_cast %275 : vector<1x1x64xf32> to vector<1x64xf32>
    %c5_176 = arith.constant 5 : index
    %c0_177 = arith.constant 0 : index
    %c0_178 = arith.constant 0 : index
    %277 = vector.load %arg11[%c5_176, %c0_177, %c0_178] : memref<12x1x64xf32, #tpu.memory_space<vmem>>, vector<1x1x64xf32>
    %278 = vector.shape_cast %277 : vector<1x1x64xf32> to vector<1x64xf32>
    %cst_179 = arith.constant dense<0.000000e+00> : vector<64xf32>
    %279 = vector.multi_reduction <add>, %274, %cst_179 [0] : vector<32x64xf32> to vector<64xf32>
    %280 = vector.shape_cast %279 : vector<64xf32> to vector<1x64xf32>
    %cst_180 = arith.constant 3.200000e+01 : f32
    %281 = vector.broadcast %cst_180 : f32 to vector<1x64xf32>
    %282 = arith.divf %280, %281 : vector<1x64xf32>
    %283 = vector.broadcast %282 : vector<1x64xf32> to vector<32x64xf32>
    %284 = arith.subf %274, %283 : vector<32x64xf32>
    %285 = arith.mulf %284, %284 : vector<32x64xf32>
    %cst_181 = arith.constant dense<0.000000e+00> : vector<64xf32>
    %286 = vector.multi_reduction <add>, %285, %cst_181 [0] : vector<32x64xf32> to vector<64xf32>
    %287 = vector.shape_cast %286 : vector<64xf32> to vector<1x64xf32>
    %cst_182 = arith.constant 3.200000e+01 : f32
    %288 = vector.broadcast %cst_182 : f32 to vector<1x64xf32>
    %289 = arith.divf %287, %288 : vector<1x64xf32>
    %cst_183 = arith.constant 9.99999974E-6 : f32
    %290 = vector.broadcast %cst_183 : f32 to vector<1x64xf32>
    %291 = arith.addf %289, %290 : vector<1x64xf32>
    %292 = math.rsqrt %291 : vector<1x64xf32>
    %293 = arith.mulf %292, %276 : vector<1x64xf32>
    %294 = vector.broadcast %293 : vector<1x64xf32> to vector<32x64xf32>
    %295 = arith.mulf %284, %294 : vector<32x64xf32>
    %296 = vector.broadcast %278 : vector<1x64xf32> to vector<32x64xf32>
    %297 = arith.addf %295, %296 : vector<32x64xf32>
    %c5_184 = arith.constant 5 : index
    %c0_185 = arith.constant 0 : index
    %c0_186 = arith.constant 0 : index
    %298 = vector.load %arg2[%c5_184, %c0_185, %c0_186] : memref<12x32x64xbf16, #tpu.memory_space<vmem>>, vector<1x32x64xbf16>
    %299 = vector.shape_cast %298 : vector<1x32x64xbf16> to vector<32x64xbf16>
    %300 = arith.extf %299 : vector<32x64xbf16> to vector<32x64xf32>
    %301 = arith.mulf %297, %300 : vector<32x64xf32>
    %cst_187 = arith.constant 1.11111116 : f32
    %302 = vector.broadcast %cst_187 : f32 to vector<32x64xf32>
    %303 = arith.mulf %301, %302 : vector<32x64xf32>
    %cst_188 = arith.constant 0.000000e+00 : f32
    %304 = vector.broadcast %cst_188 : f32 to vector<32x64xf32>
    %305 = arith.maximumf %303, %304 : vector<32x64xf32>
    %306 = vector.shape_cast %305 : vector<32x64xf32> to vector<2x16x64xf32>
    %cst_189 = arith.constant dense<0.000000e+00> : vector<2x64xf32>
    %307 = vector.multi_reduction <add>, %306, %cst_189 [1] : vector<2x16x64xf32> to vector<2x64xf32>
    %c0_190 = arith.constant 0 : index
    %c128 = arith.constant 128 : index
    %308 = vector.load %arg19[%c0_190, %c128] : memref<2x384xf32, #tpu.memory_space<vmem>>, vector<2x64xf32>
    tpu.vector_store %arg19[%c0_190, %c128], %307 {strides = array<i32>} : memref<2x384xf32, #tpu.memory_space<vmem>>, vector<2x64xf32>,
    %309 = arith.truncf %305 : vector<32x64xf32> to vector<32x64xbf16>
    %cst_191 = arith.constant dense<0.000000e+00> : vector<32x64xf32>
    %310 = tpu.matmul %1, %309, %cst_191 {dimension_numbers = #tpu.dot_dimension_numbers<[1], [0], [0], [1], [0, 0, 1, 1], [], []>} : vector<32x32xbf16>, vector<32x64xbf16>, vector<32x64xf32> -> vector<32x64xf32>
    %c6 = arith.constant 6 : index
    %c0_192 = arith.constant 0 : index
    %c0_193 = arith.constant 0 : index
    %311 = vector.load %arg8[%c6, %c0_192, %c0_193] : memref<12x64x64xbf16, #tpu.memory_space<vmem>>, vector<1x64x64xbf16>
    %312 = vector.shape_cast %311 : vector<1x64x64xbf16> to vector<64x64xbf16>
    %313 = arith.truncf %310 : vector<32x64xf32> to vector<32x64xbf16>
    %cst_194 = arith.constant dense<0.000000e+00> : vector<32x64xf32>
    %314 = tpu.matmul %313, %312, %cst_194 {dimension_numbers = #tpu.dot_dimension_numbers<[1], [0], [0], [1], [0, 0, 1, 1], [], []>} : vector<32x64xbf16>, vector<64x64xbf16>, vector<32x64xf32> -> vector<32x64xf32>
    %c6_195 = arith.constant 6 : index
    %c0_196 = arith.constant 0 : index
    %c0_197 = arith.constant 0 : index
    %315 = vector.load %arg9[%c6_195, %c0_196, %c0_197] : memref<12x1x64xf32, #tpu.memory_space<vmem>>, vector<1x1x64xf32>
    %316 = vector.shape_cast %315 : vector<1x1x64xf32> to vector<1x64xf32>
    %317 = vector.broadcast %316 : vector<1x64xf32> to vector<32x64xf32>
    %318 = arith.addf %314, %317 : vector<32x64xf32>
    %c6_198 = arith.constant 6 : index
    %c0_199 = arith.constant 0 : index
    %c0_200 = arith.constant 0 : index
    %319 = vector.load %arg10[%c6_198, %c0_199, %c0_200] : memref<12x1x64xf32, #tpu.memory_space<vmem>>, vector<1x1x64xf32>
    %320 = vector.shape_cast %319 : vector<1x1x64xf32> to vector<1x64xf32>
    %c6_201 = arith.constant 6 : index
    %c0_202 = arith.constant 0 : index
    %c0_203 = arith.constant 0 : index
    %321 = vector.load %arg11[%c6_201, %c0_202, %c0_203] : memref<12x1x64xf32, #tpu.memory_space<vmem>>, vector<1x1x64xf32>
    %322 = vector.shape_cast %321 : vector<1x1x64xf32> to vector<1x64xf32>
    %cst_204 = arith.constant dense<0.000000e+00> : vector<64xf32>
    %323 = vector.multi_reduction <add>, %318, %cst_204 [0] : vector<32x64xf32> to vector<64xf32>
    %324 = vector.shape_cast %323 : vector<64xf32> to vector<1x64xf32>
    %cst_205 = arith.constant 3.200000e+01 : f32
    %325 = vector.broadcast %cst_205 : f32 to vector<1x64xf32>
    %326 = arith.divf %324, %325 : vector<1x64xf32>
    %327 = vector.broadcast %326 : vector<1x64xf32> to vector<32x64xf32>
    %328 = arith.subf %318, %327 : vector<32x64xf32>
    %329 = arith.mulf %328, %328 : vector<32x64xf32>
    %cst_206 = arith.constant dense<0.000000e+00> : vector<64xf32>
    %330 = vector.multi_reduction <add>, %329, %cst_206 [0] : vector<32x64xf32> to vector<64xf32>
    %331 = vector.shape_cast %330 : vector<64xf32> to vector<1x64xf32>
    %cst_207 = arith.constant 3.200000e+01 : f32
    %332 = vector.broadcast %cst_207 : f32 to vector<1x64xf32>
    %333 = arith.divf %331, %332 : vector<1x64xf32>
    %cst_208 = arith.constant 9.99999974E-6 : f32
    %334 = vector.broadcast %cst_208 : f32 to vector<1x64xf32>
    %335 = arith.addf %333, %334 : vector<1x64xf32>
    %336 = math.rsqrt %335 : vector<1x64xf32>
    %337 = arith.mulf %336, %320 : vector<1x64xf32>
    %338 = vector.broadcast %337 : vector<1x64xf32> to vector<32x64xf32>
    %339 = arith.mulf %328, %338 : vector<32x64xf32>
    %340 = vector.broadcast %322 : vector<1x64xf32> to vector<32x64xf32>
    %341 = arith.addf %339, %340 : vector<32x64xf32>
    %c6_209 = arith.constant 6 : index
    %c0_210 = arith.constant 0 : index
    %c0_211 = arith.constant 0 : index
    %342 = vector.load %arg2[%c6_209, %c0_210, %c0_211] : memref<12x32x64xbf16, #tpu.memory_space<vmem>>, vector<1x32x64xbf16>
    %343 = vector.shape_cast %342 : vector<1x32x64xbf16> to vector<32x64xbf16>
    %344 = arith.extf %343 : vector<32x64xbf16> to vector<32x64xf32>
    %345 = arith.mulf %341, %344 : vector<32x64xf32>
    %cst_212 = arith.constant 1.11111116 : f32
    %346 = vector.broadcast %cst_212 : f32 to vector<32x64xf32>
    %347 = arith.mulf %345, %346 : vector<32x64xf32>
    %cst_213 = arith.constant 0.000000e+00 : f32
    %348 = vector.broadcast %cst_213 : f32 to vector<32x64xf32>
    %349 = arith.maximumf %347, %348 : vector<32x64xf32>
    %c7 = arith.constant 7 : index
    %c0_214 = arith.constant 0 : index
    %c0_215 = arith.constant 0 : index
    %350 = vector.load %arg8[%c7, %c0_214, %c0_215] : memref<12x64x64xbf16, #tpu.memory_space<vmem>>, vector<1x64x64xbf16>
    %351 = vector.shape_cast %350 : vector<1x64x64xbf16> to vector<64x64xbf16>
    %352 = arith.truncf %349 : vector<32x64xf32> to vector<32x64xbf16>
    %cst_216 = arith.constant dense<0.000000e+00> : vector<32x64xf32>
    %353 = tpu.matmul %352, %351, %cst_216 {dimension_numbers = #tpu.dot_dimension_numbers<[1], [0], [0], [1], [0, 0, 1, 1], [], []>} : vector<32x64xbf16>, vector<64x64xbf16>, vector<32x64xf32> -> vector<32x64xf32>
    %c7_217 = arith.constant 7 : index
    %c0_218 = arith.constant 0 : index
    %c0_219 = arith.constant 0 : index
    %354 = vector.load %arg9[%c7_217, %c0_218, %c0_219] : memref<12x1x64xf32, #tpu.memory_space<vmem>>, vector<1x1x64xf32>
    %355 = vector.shape_cast %354 : vector<1x1x64xf32> to vector<1x64xf32>
    %356 = vector.broadcast %355 : vector<1x64xf32> to vector<32x64xf32>
    %357 = arith.addf %353, %356 : vector<32x64xf32>
    %c7_220 = arith.constant 7 : index
    %c0_221 = arith.constant 0 : index
    %c0_222 = arith.constant 0 : index
    %358 = vector.load %arg10[%c7_220, %c0_221, %c0_222] : memref<12x1x64xf32, #tpu.memory_space<vmem>>, vector<1x1x64xf32>
    %359 = vector.shape_cast %358 : vector<1x1x64xf32> to vector<1x64xf32>
    %c7_223 = arith.constant 7 : index
    %c0_224 = arith.constant 0 : index
    %c0_225 = arith.constant 0 : index
    %360 = vector.load %arg11[%c7_223, %c0_224, %c0_225] : memref<12x1x64xf32, #tpu.memory_space<vmem>>, vector<1x1x64xf32>
    %361 = vector.shape_cast %360 : vector<1x1x64xf32> to vector<1x64xf32>
    %cst_226 = arith.constant dense<0.000000e+00> : vector<64xf32>
    %362 = vector.multi_reduction <add>, %357, %cst_226 [0] : vector<32x64xf32> to vector<64xf32>
    %363 = vector.shape_cast %362 : vector<64xf32> to vector<1x64xf32>
    %cst_227 = arith.constant 3.200000e+01 : f32
    %364 = vector.broadcast %cst_227 : f32 to vector<1x64xf32>
    %365 = arith.divf %363, %364 : vector<1x64xf32>
    %366 = vector.broadcast %365 : vector<1x64xf32> to vector<32x64xf32>
    %367 = arith.subf %357, %366 : vector<32x64xf32>
    %368 = arith.mulf %367, %367 : vector<32x64xf32>
    %cst_228 = arith.constant dense<0.000000e+00> : vector<64xf32>
    %369 = vector.multi_reduction <add>, %368, %cst_228 [0] : vector<32x64xf32> to vector<64xf32>
    %370 = vector.shape_cast %369 : vector<64xf32> to vector<1x64xf32>
    %cst_229 = arith.constant 3.200000e+01 : f32
    %371 = vector.broadcast %cst_229 : f32 to vector<1x64xf32>
    %372 = arith.divf %370, %371 : vector<1x64xf32>
    %cst_230 = arith.constant 9.99999974E-6 : f32
    %373 = vector.broadcast %cst_230 : f32 to vector<1x64xf32>
    %374 = arith.addf %372, %373 : vector<1x64xf32>
    %375 = math.rsqrt %374 : vector<1x64xf32>
    %376 = arith.mulf %375, %359 : vector<1x64xf32>
    %377 = vector.broadcast %376 : vector<1x64xf32> to vector<32x64xf32>
    %378 = arith.mulf %367, %377 : vector<32x64xf32>
    %379 = vector.broadcast %361 : vector<1x64xf32> to vector<32x64xf32>
    %380 = arith.addf %378, %379 : vector<32x64xf32>
    %c7_231 = arith.constant 7 : index
    %c0_232 = arith.constant 0 : index
    %c0_233 = arith.constant 0 : index
    %381 = vector.load %arg2[%c7_231, %c0_232, %c0_233] : memref<12x32x64xbf16, #tpu.memory_space<vmem>>, vector<1x32x64xbf16>
    %382 = vector.shape_cast %381 : vector<1x32x64xbf16> to vector<32x64xbf16>
    %383 = arith.extf %382 : vector<32x64xbf16> to vector<32x64xf32>
    %384 = arith.mulf %380, %383 : vector<32x64xf32>
    %cst_234 = arith.constant 1.11111116 : f32
    %385 = vector.broadcast %cst_234 : f32 to vector<32x64xf32>
    %386 = arith.mulf %384, %385 : vector<32x64xf32>
    %cst_235 = arith.constant 0.000000e+00 : f32
    %387 = vector.broadcast %cst_235 : f32 to vector<32x64xf32>
    %388 = arith.maximumf %386, %387 : vector<32x64xf32>
    %389 = vector.shape_cast %388 : vector<32x64xf32> to vector<2x16x64xf32>
    %cst_236 = arith.constant dense<0.000000e+00> : vector<2x64xf32>
    %390 = vector.multi_reduction <add>, %389, %cst_236 [1] : vector<2x16x64xf32> to vector<2x64xf32>
    %c0_237 = arith.constant 0 : index
    %c192 = arith.constant 192 : index
    %391 = vector.load %arg19[%c0_237, %c192] : memref<2x384xf32, #tpu.memory_space<vmem>>, vector<2x64xf32>
    tpu.vector_store %arg19[%c0_237, %c192], %390 {strides = array<i32>} : memref<2x384xf32, #tpu.memory_space<vmem>>, vector<2x64xf32>,
    %392 = arith.truncf %388 : vector<32x64xf32> to vector<32x64xbf16>
    %cst_238 = arith.constant dense<0.000000e+00> : vector<32x64xf32>
    %393 = tpu.matmul %1, %392, %cst_238 {dimension_numbers = #tpu.dot_dimension_numbers<[1], [0], [0], [1], [0, 0, 1, 1], [], []>} : vector<32x32xbf16>, vector<32x64xbf16>, vector<32x64xf32> -> vector<32x64xf32>
    %c8 = arith.constant 8 : index
    %c0_239 = arith.constant 0 : index
    %c0_240 = arith.constant 0 : index
    %394 = vector.load %arg8[%c8, %c0_239, %c0_240] : memref<12x64x64xbf16, #tpu.memory_space<vmem>>, vector<1x64x64xbf16>
    %395 = vector.shape_cast %394 : vector<1x64x64xbf16> to vector<64x64xbf16>
    %396 = arith.truncf %393 : vector<32x64xf32> to vector<32x64xbf16>
    %cst_241 = arith.constant dense<0.000000e+00> : vector<32x64xf32>
    %397 = tpu.matmul %396, %395, %cst_241 {dimension_numbers = #tpu.dot_dimension_numbers<[1], [0], [0], [1], [0, 0, 1, 1], [], []>} : vector<32x64xbf16>, vector<64x64xbf16>, vector<32x64xf32> -> vector<32x64xf32>
    %c8_242 = arith.constant 8 : index
    %c0_243 = arith.constant 0 : index
    %c0_244 = arith.constant 0 : index
    %398 = vector.load %arg9[%c8_242, %c0_243, %c0_244] : memref<12x1x64xf32, #tpu.memory_space<vmem>>, vector<1x1x64xf32>
    %399 = vector.shape_cast %398 : vector<1x1x64xf32> to vector<1x64xf32>
    %400 = vector.broadcast %399 : vector<1x64xf32> to vector<32x64xf32>
    %401 = arith.addf %397, %400 : vector<32x64xf32>
    %c8_245 = arith.constant 8 : index
    %c0_246 = arith.constant 0 : index
    %c0_247 = arith.constant 0 : index
    %402 = vector.load %arg10[%c8_245, %c0_246, %c0_247] : memref<12x1x64xf32, #tpu.memory_space<vmem>>, vector<1x1x64xf32>
    %403 = vector.shape_cast %402 : vector<1x1x64xf32> to vector<1x64xf32>
    %c8_248 = arith.constant 8 : index
    %c0_249 = arith.constant 0 : index
    %c0_250 = arith.constant 0 : index
    %404 = vector.load %arg11[%c8_248, %c0_249, %c0_250] : memref<12x1x64xf32, #tpu.memory_space<vmem>>, vector<1x1x64xf32>
    %405 = vector.shape_cast %404 : vector<1x1x64xf32> to vector<1x64xf32>
    %cst_251 = arith.constant dense<0.000000e+00> : vector<64xf32>
    %406 = vector.multi_reduction <add>, %401, %cst_251 [0] : vector<32x64xf32> to vector<64xf32>
    %407 = vector.shape_cast %406 : vector<64xf32> to vector<1x64xf32>
    %cst_252 = arith.constant 3.200000e+01 : f32
    %408 = vector.broadcast %cst_252 : f32 to vector<1x64xf32>
    %409 = arith.divf %407, %408 : vector<1x64xf32>
    %410 = vector.broadcast %409 : vector<1x64xf32> to vector<32x64xf32>
    %411 = arith.subf %401, %410 : vector<32x64xf32>
    %412 = arith.mulf %411, %411 : vector<32x64xf32>
    %cst_253 = arith.constant dense<0.000000e+00> : vector<64xf32>
    %413 = vector.multi_reduction <add>, %412, %cst_253 [0] : vector<32x64xf32> to vector<64xf32>
    %414 = vector.shape_cast %413 : vector<64xf32> to vector<1x64xf32>
    %cst_254 = arith.constant 3.200000e+01 : f32
    %415 = vector.broadcast %cst_254 : f32 to vector<1x64xf32>
    %416 = arith.divf %414, %415 : vector<1x64xf32>
    %cst_255 = arith.constant 9.99999974E-6 : f32
    %417 = vector.broadcast %cst_255 : f32 to vector<1x64xf32>
    %418 = arith.addf %416, %417 : vector<1x64xf32>
    %419 = math.rsqrt %418 : vector<1x64xf32>
    %420 = arith.mulf %419, %403 : vector<1x64xf32>
    %421 = vector.broadcast %420 : vector<1x64xf32> to vector<32x64xf32>
    %422 = arith.mulf %411, %421 : vector<32x64xf32>
    %423 = vector.broadcast %405 : vector<1x64xf32> to vector<32x64xf32>
    %424 = arith.addf %422, %423 : vector<32x64xf32>
    %c8_256 = arith.constant 8 : index
    %c0_257 = arith.constant 0 : index
    %c0_258 = arith.constant 0 : index
    %425 = vector.load %arg2[%c8_256, %c0_257, %c0_258] : memref<12x32x64xbf16, #tpu.memory_space<vmem>>, vector<1x32x64xbf16>
    %426 = vector.shape_cast %425 : vector<1x32x64xbf16> to vector<32x64xbf16>
    %427 = arith.extf %426 : vector<32x64xbf16> to vector<32x64xf32>
    %428 = arith.mulf %424, %427 : vector<32x64xf32>
    %cst_259 = arith.constant 1.11111116 : f32
    %429 = vector.broadcast %cst_259 : f32 to vector<32x64xf32>
    %430 = arith.mulf %428, %429 : vector<32x64xf32>
    %cst_260 = arith.constant 0.000000e+00 : f32
    %431 = vector.broadcast %cst_260 : f32 to vector<32x64xf32>
    %432 = arith.maximumf %430, %431 : vector<32x64xf32>
    %c9 = arith.constant 9 : index
    %c0_261 = arith.constant 0 : index
    %c0_262 = arith.constant 0 : index
    %433 = vector.load %arg8[%c9, %c0_261, %c0_262] : memref<12x64x64xbf16, #tpu.memory_space<vmem>>, vector<1x64x64xbf16>
    %434 = vector.shape_cast %433 : vector<1x64x64xbf16> to vector<64x64xbf16>
    %435 = arith.truncf %432 : vector<32x64xf32> to vector<32x64xbf16>
    %cst_263 = arith.constant dense<0.000000e+00> : vector<32x64xf32>
    %436 = tpu.matmul %435, %434, %cst_263 {dimension_numbers = #tpu.dot_dimension_numbers<[1], [0], [0], [1], [0, 0, 1, 1], [], []>} : vector<32x64xbf16>, vector<64x64xbf16>, vector<32x64xf32> -> vector<32x64xf32>
    %c9_264 = arith.constant 9 : index
    %c0_265 = arith.constant 0 : index
    %c0_266 = arith.constant 0 : index
    %437 = vector.load %arg9[%c9_264, %c0_265, %c0_266] : memref<12x1x64xf32, #tpu.memory_space<vmem>>, vector<1x1x64xf32>
    %438 = vector.shape_cast %437 : vector<1x1x64xf32> to vector<1x64xf32>
    %439 = vector.broadcast %438 : vector<1x64xf32> to vector<32x64xf32>
    %440 = arith.addf %436, %439 : vector<32x64xf32>
    %c9_267 = arith.constant 9 : index
    %c0_268 = arith.constant 0 : index
    %c0_269 = arith.constant 0 : index
    %441 = vector.load %arg10[%c9_267, %c0_268, %c0_269] : memref<12x1x64xf32, #tpu.memory_space<vmem>>, vector<1x1x64xf32>
    %442 = vector.shape_cast %441 : vector<1x1x64xf32> to vector<1x64xf32>
    %c9_270 = arith.constant 9 : index
    %c0_271 = arith.constant 0 : index
    %c0_272 = arith.constant 0 : index
    %443 = vector.load %arg11[%c9_270, %c0_271, %c0_272] : memref<12x1x64xf32, #tpu.memory_space<vmem>>, vector<1x1x64xf32>
    %444 = vector.shape_cast %443 : vector<1x1x64xf32> to vector<1x64xf32>
    %cst_273 = arith.constant dense<0.000000e+00> : vector<64xf32>
    %445 = vector.multi_reduction <add>, %440, %cst_273 [0] : vector<32x64xf32> to vector<64xf32>
    %446 = vector.shape_cast %445 : vector<64xf32> to vector<1x64xf32>
    %cst_274 = arith.constant 3.200000e+01 : f32
    %447 = vector.broadcast %cst_274 : f32 to vector<1x64xf32>
    %448 = arith.divf %446, %447 : vector<1x64xf32>
    %449 = vector.broadcast %448 : vector<1x64xf32> to vector<32x64xf32>
    %450 = arith.subf %440, %449 : vector<32x64xf32>
    %451 = arith.mulf %450, %450 : vector<32x64xf32>
    %cst_275 = arith.constant dense<0.000000e+00> : vector<64xf32>
    %452 = vector.multi_reduction <add>, %451, %cst_275 [0] : vector<32x64xf32> to vector<64xf32>
    %453 = vector.shape_cast %452 : vector<64xf32> to vector<1x64xf32>
    %cst_276 = arith.constant 3.200000e+01 : f32
    %454 = vector.broadcast %cst_276 : f32 to vector<1x64xf32>
    %455 = arith.divf %453, %454 : vector<1x64xf32>
    %cst_277 = arith.constant 9.99999974E-6 : f32
    %456 = vector.broadcast %cst_277 : f32 to vector<1x64xf32>
    %457 = arith.addf %455, %456 : vector<1x64xf32>
    %458 = math.rsqrt %457 : vector<1x64xf32>
    %459 = arith.mulf %458, %442 : vector<1x64xf32>
    %460 = vector.broadcast %459 : vector<1x64xf32> to vector<32x64xf32>
    %461 = arith.mulf %450, %460 : vector<32x64xf32>
    %462 = vector.broadcast %444 : vector<1x64xf32> to vector<32x64xf32>
    %463 = arith.addf %461, %462 : vector<32x64xf32>
    %c9_278 = arith.constant 9 : index
    %c0_279 = arith.constant 0 : index
    %c0_280 = arith.constant 0 : index
    %464 = vector.load %arg2[%c9_278, %c0_279, %c0_280] : memref<12x32x64xbf16, #tpu.memory_space<vmem>>, vector<1x32x64xbf16>
    %465 = vector.shape_cast %464 : vector<1x32x64xbf16> to vector<32x64xbf16>
    %466 = arith.extf %465 : vector<32x64xbf16> to vector<32x64xf32>
    %467 = arith.mulf %463, %466 : vector<32x64xf32>
    %cst_281 = arith.constant 1.11111116 : f32
    %468 = vector.broadcast %cst_281 : f32 to vector<32x64xf32>
    %469 = arith.mulf %467, %468 : vector<32x64xf32>
    %cst_282 = arith.constant 0.000000e+00 : f32
    %470 = vector.broadcast %cst_282 : f32 to vector<32x64xf32>
    %471 = arith.maximumf %469, %470 : vector<32x64xf32>
    %472 = vector.shape_cast %471 : vector<32x64xf32> to vector<2x16x64xf32>
    %cst_283 = arith.constant dense<0.000000e+00> : vector<2x64xf32>
    %473 = vector.multi_reduction <add>, %472, %cst_283 [1] : vector<2x16x64xf32> to vector<2x64xf32>
    %c0_284 = arith.constant 0 : index
    %c256 = arith.constant 256 : index
    %474 = vector.load %arg19[%c0_284, %c256] : memref<2x384xf32, #tpu.memory_space<vmem>>, vector<2x64xf32>
    tpu.vector_store %arg19[%c0_284, %c256], %473 {strides = array<i32>} : memref<2x384xf32, #tpu.memory_space<vmem>>, vector<2x64xf32>,
    %475 = arith.truncf %471 : vector<32x64xf32> to vector<32x64xbf16>
    %cst_285 = arith.constant dense<0.000000e+00> : vector<32x64xf32>
    %476 = tpu.matmul %1, %475, %cst_285 {dimension_numbers = #tpu.dot_dimension_numbers<[1], [0], [0], [1], [0, 0, 1, 1], [], []>} : vector<32x32xbf16>, vector<32x64xbf16>, vector<32x64xf32> -> vector<32x64xf32>
    %c10 = arith.constant 10 : index
    %c0_286 = arith.constant 0 : index
    %c0_287 = arith.constant 0 : index
    %477 = vector.load %arg8[%c10, %c0_286, %c0_287] : memref<12x64x64xbf16, #tpu.memory_space<vmem>>, vector<1x64x64xbf16>
    %478 = vector.shape_cast %477 : vector<1x64x64xbf16> to vector<64x64xbf16>
    %479 = arith.truncf %476 : vector<32x64xf32> to vector<32x64xbf16>
    %cst_288 = arith.constant dense<0.000000e+00> : vector<32x64xf32>
    %480 = tpu.matmul %479, %478, %cst_288 {dimension_numbers = #tpu.dot_dimension_numbers<[1], [0], [0], [1], [0, 0, 1, 1], [], []>} : vector<32x64xbf16>, vector<64x64xbf16>, vector<32x64xf32> -> vector<32x64xf32>
    %c10_289 = arith.constant 10 : index
    %c0_290 = arith.constant 0 : index
    %c0_291 = arith.constant 0 : index
    %481 = vector.load %arg9[%c10_289, %c0_290, %c0_291] : memref<12x1x64xf32, #tpu.memory_space<vmem>>, vector<1x1x64xf32>
    %482 = vector.shape_cast %481 : vector<1x1x64xf32> to vector<1x64xf32>
    %483 = vector.broadcast %482 : vector<1x64xf32> to vector<32x64xf32>
    %484 = arith.addf %480, %483 : vector<32x64xf32>
    %c10_292 = arith.constant 10 : index
    %c0_293 = arith.constant 0 : index
    %c0_294 = arith.constant 0 : index
    %485 = vector.load %arg10[%c10_292, %c0_293, %c0_294] : memref<12x1x64xf32, #tpu.memory_space<vmem>>, vector<1x1x64xf32>
    %486 = vector.shape_cast %485 : vector<1x1x64xf32> to vector<1x64xf32>
    %c10_295 = arith.constant 10 : index
    %c0_296 = arith.constant 0 : index
    %c0_297 = arith.constant 0 : index
    %487 = vector.load %arg11[%c10_295, %c0_296, %c0_297] : memref<12x1x64xf32, #tpu.memory_space<vmem>>, vector<1x1x64xf32>
    %488 = vector.shape_cast %487 : vector<1x1x64xf32> to vector<1x64xf32>
    %cst_298 = arith.constant dense<0.000000e+00> : vector<64xf32>
    %489 = vector.multi_reduction <add>, %484, %cst_298 [0] : vector<32x64xf32> to vector<64xf32>
    %490 = vector.shape_cast %489 : vector<64xf32> to vector<1x64xf32>
    %cst_299 = arith.constant 3.200000e+01 : f32
    %491 = vector.broadcast %cst_299 : f32 to vector<1x64xf32>
    %492 = arith.divf %490, %491 : vector<1x64xf32>
    %493 = vector.broadcast %492 : vector<1x64xf32> to vector<32x64xf32>
    %494 = arith.subf %484, %493 : vector<32x64xf32>
    %495 = arith.mulf %494, %494 : vector<32x64xf32>
    %cst_300 = arith.constant dense<0.000000e+00> : vector<64xf32>
    %496 = vector.multi_reduction <add>, %495, %cst_300 [0] : vector<32x64xf32> to vector<64xf32>
    %497 = vector.shape_cast %496 : vector<64xf32> to vector<1x64xf32>
    %cst_301 = arith.constant 3.200000e+01 : f32
    %498 = vector.broadcast %cst_301 : f32 to vector<1x64xf32>
    %499 = arith.divf %497, %498 : vector<1x64xf32>
    %cst_302 = arith.constant 9.99999974E-6 : f32
    %500 = vector.broadcast %cst_302 : f32 to vector<1x64xf32>
    %501 = arith.addf %499, %500 : vector<1x64xf32>
    %502 = math.rsqrt %501 : vector<1x64xf32>
    %503 = arith.mulf %502, %486 : vector<1x64xf32>
    %504 = vector.broadcast %503 : vector<1x64xf32> to vector<32x64xf32>
    %505 = arith.mulf %494, %504 : vector<32x64xf32>
    %506 = vector.broadcast %488 : vector<1x64xf32> to vector<32x64xf32>
    %507 = arith.addf %505, %506 : vector<32x64xf32>
    %c10_303 = arith.constant 10 : index
    %c0_304 = arith.constant 0 : index
    %c0_305 = arith.constant 0 : index
    %508 = vector.load %arg2[%c10_303, %c0_304, %c0_305] : memref<12x32x64xbf16, #tpu.memory_space<vmem>>, vector<1x32x64xbf16>
    %509 = vector.shape_cast %508 : vector<1x32x64xbf16> to vector<32x64xbf16>
    %510 = arith.extf %509 : vector<32x64xbf16> to vector<32x64xf32>
    %511 = arith.mulf %507, %510 : vector<32x64xf32>
    %cst_306 = arith.constant 1.11111116 : f32
    %512 = vector.broadcast %cst_306 : f32 to vector<32x64xf32>
    %513 = arith.mulf %511, %512 : vector<32x64xf32>
    %cst_307 = arith.constant 0.000000e+00 : f32
    %514 = vector.broadcast %cst_307 : f32 to vector<32x64xf32>
    %515 = arith.maximumf %513, %514 : vector<32x64xf32>
    %c11 = arith.constant 11 : index
    %c0_308 = arith.constant 0 : index
    %c0_309 = arith.constant 0 : index
    %516 = vector.load %arg8[%c11, %c0_308, %c0_309] : memref<12x64x64xbf16, #tpu.memory_space<vmem>>, vector<1x64x64xbf16>
    %517 = vector.shape_cast %516 : vector<1x64x64xbf16> to vector<64x64xbf16>
    %518 = arith.truncf %515 : vector<32x64xf32> to vector<32x64xbf16>
    %cst_310 = arith.constant dense<0.000000e+00> : vector<32x64xf32>
    %519 = tpu.matmul %518, %517, %cst_310 {dimension_numbers = #tpu.dot_dimension_numbers<[1], [0], [0], [1], [0, 0, 1, 1], [], []>} : vector<32x64xbf16>, vector<64x64xbf16>, vector<32x64xf32> -> vector<32x64xf32>
    %c11_311 = arith.constant 11 : index
    %c0_312 = arith.constant 0 : index
    %c0_313 = arith.constant 0 : index
    %520 = vector.load %arg9[%c11_311, %c0_312, %c0_313] : memref<12x1x64xf32, #tpu.memory_space<vmem>>, vector<1x1x64xf32>
    %521 = vector.shape_cast %520 : vector<1x1x64xf32> to vector<1x64xf32>
    %522 = vector.broadcast %521 : vector<1x64xf32> to vector<32x64xf32>
    %523 = arith.addf %519, %522 : vector<32x64xf32>
    %c11_314 = arith.constant 11 : index
    %c0_315 = arith.constant 0 : index
    %c0_316 = arith.constant 0 : index
    %524 = vector.load %arg10[%c11_314, %c0_315, %c0_316] : memref<12x1x64xf32, #tpu.memory_space<vmem>>, vector<1x1x64xf32>
    %525 = vector.shape_cast %524 : vector<1x1x64xf32> to vector<1x64xf32>
    %c11_317 = arith.constant 11 : index
    %c0_318 = arith.constant 0 : index
    %c0_319 = arith.constant 0 : index
    %526 = vector.load %arg11[%c11_317, %c0_318, %c0_319] : memref<12x1x64xf32, #tpu.memory_space<vmem>>, vector<1x1x64xf32>
    %527 = vector.shape_cast %526 : vector<1x1x64xf32> to vector<1x64xf32>
    %cst_320 = arith.constant dense<0.000000e+00> : vector<64xf32>
    %528 = vector.multi_reduction <add>, %523, %cst_320 [0] : vector<32x64xf32> to vector<64xf32>
    %529 = vector.shape_cast %528 : vector<64xf32> to vector<1x64xf32>
    %cst_321 = arith.constant 3.200000e+01 : f32
    %530 = vector.broadcast %cst_321 : f32 to vector<1x64xf32>
    %531 = arith.divf %529, %530 : vector<1x64xf32>
    %532 = vector.broadcast %531 : vector<1x64xf32> to vector<32x64xf32>
    %533 = arith.subf %523, %532 : vector<32x64xf32>
    %534 = arith.mulf %533, %533 : vector<32x64xf32>
    %cst_322 = arith.constant dense<0.000000e+00> : vector<64xf32>
    %535 = vector.multi_reduction <add>, %534, %cst_322 [0] : vector<32x64xf32> to vector<64xf32>
    %536 = vector.shape_cast %535 : vector<64xf32> to vector<1x64xf32>
    %cst_323 = arith.constant 3.200000e+01 : f32
    %537 = vector.broadcast %cst_323 : f32 to vector<1x64xf32>
    %538 = arith.divf %536, %537 : vector<1x64xf32>
    %cst_324 = arith.constant 9.99999974E-6 : f32
    %539 = vector.broadcast %cst_324 : f32 to vector<1x64xf32>
    %540 = arith.addf %538, %539 : vector<1x64xf32>
    %541 = math.rsqrt %540 : vector<1x64xf32>
    %542 = arith.mulf %541, %525 : vector<1x64xf32>
    %543 = vector.broadcast %542 : vector<1x64xf32> to vector<32x64xf32>
    %544 = arith.mulf %533, %543 : vector<32x64xf32>
    %545 = vector.broadcast %527 : vector<1x64xf32> to vector<32x64xf32>
    %546 = arith.addf %544, %545 : vector<32x64xf32>
    %c11_325 = arith.constant 11 : index
    %c0_326 = arith.constant 0 : index
    %c0_327 = arith.constant 0 : index
    %547 = vector.load %arg2[%c11_325, %c0_326, %c0_327] : memref<12x32x64xbf16, #tpu.memory_space<vmem>>, vector<1x32x64xbf16>
    %548 = vector.shape_cast %547 : vector<1x32x64xbf16> to vector<32x64xbf16>
    %549 = arith.extf %548 : vector<32x64xbf16> to vector<32x64xf32>
    %550 = arith.mulf %546, %549 : vector<32x64xf32>
    %cst_328 = arith.constant 1.11111116 : f32
    %551 = vector.broadcast %cst_328 : f32 to vector<32x64xf32>
    %552 = arith.mulf %550, %551 : vector<32x64xf32>
    %cst_329 = arith.constant 0.000000e+00 : f32
    %553 = vector.broadcast %cst_329 : f32 to vector<32x64xf32>
    %554 = arith.maximumf %552, %553 : vector<32x64xf32>
    %555 = vector.shape_cast %554 : vector<32x64xf32> to vector<2x16x64xf32>
    %cst_330 = arith.constant dense<0.000000e+00> : vector<2x64xf32>
    %556 = vector.multi_reduction <add>, %555, %cst_330 [1] : vector<2x16x64xf32> to vector<2x64xf32>
    %c0_331 = arith.constant 0 : index
    %c320 = arith.constant 320 : index
    %557 = vector.load %arg19[%c0_331, %c320] : memref<2x384xf32, #tpu.memory_space<vmem>>, vector<2x64xf32>
    tpu.vector_store %arg19[%c0_331, %c320], %556 {strides = array<i32>} : memref<2x384xf32, #tpu.memory_space<vmem>>, vector<2x64xf32>,
    %c0_332 = arith.constant 0 : index
    %c0_333 = arith.constant 0 : index
    %558 = vector.load %arg19[%c0_332, %c0_333] : memref<2x384xf32, #tpu.memory_space<vmem>>, vector<2x384xf32>
    %c0_334 = arith.constant 0 : index
    %c0_335 = arith.constant 0 : index
    %559 = vector.load %arg12[%c0_334, %c0_335] : memref<384x64xbf16, #tpu.memory_space<vmem>>, vector<384x64xbf16>
    %560 = arith.truncf %558 : vector<2x384xf32> to vector<2x384xbf16>
    %cst_336 = arith.constant dense<0.000000e+00> : vector<2x64xf32>
    %561 = tpu.matmul %560, %559, %cst_336 {dimension_numbers = #tpu.dot_dimension_numbers<[1], [0], [0], [1], [0, 0, 1, 1], [], []>} : vector<2x384xbf16>, vector<384x64xbf16>, vector<2x64xf32> -> vector<2x64xf32>
    %c0_337 = arith.constant 0 : index
    %c0_338 = arith.constant 0 : index
    %562 = vector.load %arg13[%c0_337, %c0_338] : memref<1x64xf32, #tpu.memory_space<vmem>>, vector<1x64xf32>
    %563 = vector.broadcast %562 : vector<1x64xf32> to vector<2x64xf32>
    %564 = arith.addf %561, %563 : vector<2x64xf32>
    %c0_339 = arith.constant 0 : index
    %c0_340 = arith.constant 0 : index
    %c0_341 = arith.constant 0 : index
    %565 = vector.load %arg3[%c0_339, %c0_340, %c0_341] : memref<5x2x64xbf16, #tpu.memory_space<vmem>>, vector<1x2x64xbf16>
    %566 = vector.shape_cast %565 : vector<1x2x64xbf16> to vector<2x64xbf16>
    %567 = arith.extf %566 : vector<2x64xbf16> to vector<2x64xf32>
    %568 = arith.mulf %564, %567 : vector<2x64xf32>
    %cst_342 = arith.constant 1.11111116 : f32
    %569 = vector.broadcast %cst_342 : f32 to vector<2x64xf32>
    %570 = arith.mulf %568, %569 : vector<2x64xf32>
    %cst_343 = arith.constant 0.000000e+00 : f32
    %571 = vector.broadcast %cst_343 : f32 to vector<2x64xf32>
    %572 = arith.maximumf %570, %571 : vector<2x64xf32>
    %c0_344 = arith.constant 0 : index
    %c0_345 = arith.constant 0 : index
    %c0_346 = arith.constant 0 : index
    %573 = vector.load %arg14[%c0_344, %c0_345, %c0_346] : memref<4x64x64xbf16, #tpu.memory_space<vmem>>, vector<1x64x64xbf16>
    %574 = vector.shape_cast %573 : vector<1x64x64xbf16> to vector<64x64xbf16>
    %575 = arith.truncf %572 : vector<2x64xf32> to vector<2x64xbf16>
    %cst_347 = arith.constant dense<0.000000e+00> : vector<2x64xf32>
    %576 = tpu.matmul %575, %574, %cst_347 {dimension_numbers = #tpu.dot_dimension_numbers<[1], [0], [0], [1], [0, 0, 1, 1], [], []>} : vector<2x64xbf16>, vector<64x64xbf16>, vector<2x64xf32> -> vector<2x64xf32>
    %c0_348 = arith.constant 0 : index
    %c0_349 = arith.constant 0 : index
    %c0_350 = arith.constant 0 : index
    %577 = vector.load %arg15[%c0_348, %c0_349, %c0_350] : memref<4x1x64xf32, #tpu.memory_space<vmem>>, vector<1x1x64xf32>
    %578 = vector.shape_cast %577 : vector<1x1x64xf32> to vector<1x64xf32>
    %579 = vector.broadcast %578 : vector<1x64xf32> to vector<2x64xf32>
    %580 = arith.addf %576, %579 : vector<2x64xf32>
    %c1_351 = arith.constant 1 : index
    %c0_352 = arith.constant 0 : index
    %c0_353 = arith.constant 0 : index
    %581 = vector.load %arg3[%c1_351, %c0_352, %c0_353] : memref<5x2x64xbf16, #tpu.memory_space<vmem>>, vector<1x2x64xbf16>
    %582 = vector.shape_cast %581 : vector<1x2x64xbf16> to vector<2x64xbf16>
    %583 = arith.extf %582 : vector<2x64xbf16> to vector<2x64xf32>
    %584 = arith.mulf %580, %583 : vector<2x64xf32>
    %cst_354 = arith.constant 1.11111116 : f32
    %585 = vector.broadcast %cst_354 : f32 to vector<2x64xf32>
    %586 = arith.mulf %584, %585 : vector<2x64xf32>
    %cst_355 = arith.constant 0.000000e+00 : f32
    %587 = vector.broadcast %cst_355 : f32 to vector<2x64xf32>
    %588 = arith.maximumf %586, %587 : vector<2x64xf32>
    %c1_356 = arith.constant 1 : index
    %c0_357 = arith.constant 0 : index
    %c0_358 = arith.constant 0 : index
    %589 = vector.load %arg14[%c1_356, %c0_357, %c0_358] : memref<4x64x64xbf16, #tpu.memory_space<vmem>>, vector<1x64x64xbf16>
    %590 = vector.shape_cast %589 : vector<1x64x64xbf16> to vector<64x64xbf16>
    %591 = arith.truncf %588 : vector<2x64xf32> to vector<2x64xbf16>
    %cst_359 = arith.constant dense<0.000000e+00> : vector<2x64xf32>
    %592 = tpu.matmul %591, %590, %cst_359 {dimension_numbers = #tpu.dot_dimension_numbers<[1], [0], [0], [1], [0, 0, 1, 1], [], []>} : vector<2x64xbf16>, vector<64x64xbf16>, vector<2x64xf32> -> vector<2x64xf32>
    %c1_360 = arith.constant 1 : index
    %c0_361 = arith.constant 0 : index
    %c0_362 = arith.constant 0 : index
    %593 = vector.load %arg15[%c1_360, %c0_361, %c0_362] : memref<4x1x64xf32, #tpu.memory_space<vmem>>, vector<1x1x64xf32>
    %594 = vector.shape_cast %593 : vector<1x1x64xf32> to vector<1x64xf32>
    %595 = vector.broadcast %594 : vector<1x64xf32> to vector<2x64xf32>
    %596 = arith.addf %592, %595 : vector<2x64xf32>
    %c2_363 = arith.constant 2 : index
    %c0_364 = arith.constant 0 : index
    %c0_365 = arith.constant 0 : index
    %597 = vector.load %arg3[%c2_363, %c0_364, %c0_365] : memref<5x2x64xbf16, #tpu.memory_space<vmem>>, vector<1x2x64xbf16>
    %598 = vector.shape_cast %597 : vector<1x2x64xbf16> to vector<2x64xbf16>
    %599 = arith.extf %598 : vector<2x64xbf16> to vector<2x64xf32>
    %600 = arith.mulf %596, %599 : vector<2x64xf32>
    %cst_366 = arith.constant 1.11111116 : f32
    %601 = vector.broadcast %cst_366 : f32 to vector<2x64xf32>
    %602 = arith.mulf %600, %601 : vector<2x64xf32>
    %cst_367 = arith.constant 0.000000e+00 : f32
    %603 = vector.broadcast %cst_367 : f32 to vector<2x64xf32>
    %604 = arith.maximumf %602, %603 : vector<2x64xf32>
    %c2_368 = arith.constant 2 : index
    %c0_369 = arith.constant 0 : index
    %c0_370 = arith.constant 0 : index
    %605 = vector.load %arg14[%c2_368, %c0_369, %c0_370] : memref<4x64x64xbf16, #tpu.memory_space<vmem>>, vector<1x64x64xbf16>
    %606 = vector.shape_cast %605 : vector<1x64x64xbf16> to vector<64x64xbf16>
    %607 = arith.truncf %604 : vector<2x64xf32> to vector<2x64xbf16>
    %cst_371 = arith.constant dense<0.000000e+00> : vector<2x64xf32>
    %608 = tpu.matmul %607, %606, %cst_371 {dimension_numbers = #tpu.dot_dimension_numbers<[1], [0], [0], [1], [0, 0, 1, 1], [], []>} : vector<2x64xbf16>, vector<64x64xbf16>, vector<2x64xf32> -> vector<2x64xf32>
    %c2_372 = arith.constant 2 : index
    %c0_373 = arith.constant 0 : index
    %c0_374 = arith.constant 0 : index
    %609 = vector.load %arg15[%c2_372, %c0_373, %c0_374] : memref<4x1x64xf32, #tpu.memory_space<vmem>>, vector<1x1x64xf32>
    %610 = vector.shape_cast %609 : vector<1x1x64xf32> to vector<1x64xf32>
    %611 = vector.broadcast %610 : vector<1x64xf32> to vector<2x64xf32>
    %612 = arith.addf %608, %611 : vector<2x64xf32>
    %c3_375 = arith.constant 3 : index
    %c0_376 = arith.constant 0 : index
    %c0_377 = arith.constant 0 : index
    %613 = vector.load %arg3[%c3_375, %c0_376, %c0_377] : memref<5x2x64xbf16, #tpu.memory_space<vmem>>, vector<1x2x64xbf16>
    %614 = vector.shape_cast %613 : vector<1x2x64xbf16> to vector<2x64xbf16>
    %615 = arith.extf %614 : vector<2x64xbf16> to vector<2x64xf32>
    %616 = arith.mulf %612, %615 : vector<2x64xf32>
    %cst_378 = arith.constant 1.11111116 : f32
    %617 = vector.broadcast %cst_378 : f32 to vector<2x64xf32>
    %618 = arith.mulf %616, %617 : vector<2x64xf32>
    %cst_379 = arith.constant 0.000000e+00 : f32
    %619 = vector.broadcast %cst_379 : f32 to vector<2x64xf32>
    %620 = arith.maximumf %618, %619 : vector<2x64xf32>
    %c3_380 = arith.constant 3 : index
    %c0_381 = arith.constant 0 : index
    %c0_382 = arith.constant 0 : index
    %621 = vector.load %arg14[%c3_380, %c0_381, %c0_382] : memref<4x64x64xbf16, #tpu.memory_space<vmem>>, vector<1x64x64xbf16>
    %622 = vector.shape_cast %621 : vector<1x64x64xbf16> to vector<64x64xbf16>
    %623 = arith.truncf %620 : vector<2x64xf32> to vector<2x64xbf16>
    %cst_383 = arith.constant dense<0.000000e+00> : vector<2x64xf32>
    %624 = tpu.matmul %623, %622, %cst_383 {dimension_numbers = #tpu.dot_dimension_numbers<[1], [0], [0], [1], [0, 0, 1, 1], [], []>} : vector<2x64xbf16>, vector<64x64xbf16>, vector<2x64xf32> -> vector<2x64xf32>
    %c3_384 = arith.constant 3 : index
    %c0_385 = arith.constant 0 : index
    %c0_386 = arith.constant 0 : index
    %625 = vector.load %arg15[%c3_384, %c0_385, %c0_386] : memref<4x1x64xf32, #tpu.memory_space<vmem>>, vector<1x1x64xf32>
    %626 = vector.shape_cast %625 : vector<1x1x64xf32> to vector<1x64xf32>
    %627 = vector.broadcast %626 : vector<1x64xf32> to vector<2x64xf32>
    %628 = arith.addf %624, %627 : vector<2x64xf32>
    %c4_387 = arith.constant 4 : index
    %c0_388 = arith.constant 0 : index
    %c0_389 = arith.constant 0 : index
    %629 = vector.load %arg3[%c4_387, %c0_388, %c0_389] : memref<5x2x64xbf16, #tpu.memory_space<vmem>>, vector<1x2x64xbf16>
    %630 = vector.shape_cast %629 : vector<1x2x64xbf16> to vector<2x64xbf16>
    %631 = arith.extf %630 : vector<2x64xbf16> to vector<2x64xf32>
    %632 = arith.mulf %628, %631 : vector<2x64xf32>
    %cst_390 = arith.constant 1.11111116 : f32
    %633 = vector.broadcast %cst_390 : f32 to vector<2x64xf32>
    %634 = arith.mulf %632, %633 : vector<2x64xf32>
    %cst_391 = arith.constant 0.000000e+00 : f32
    %635 = vector.broadcast %cst_391 : f32 to vector<2x64xf32>
    %636 = arith.maximumf %634, %635 : vector<2x64xf32>
    %c0_392 = arith.constant 0 : index
    %c0_393 = arith.constant 0 : index
    %637 = vector.load %arg16[%c0_392, %c0_393] : memref<1x64xf32, #tpu.memory_space<vmem>>, vector<1x64xf32>
    %638 = vector.broadcast %637 : vector<1x64xf32> to vector<2x64xf32>
    %639 = arith.mulf %636, %638 : vector<2x64xf32>
    %cst_394 = arith.constant dense<0.000000e+00> : vector<2xf32>
    %640 = vector.multi_reduction <add>, %639, %cst_394 [1] : vector<2x64xf32> to vector<2xf32>
    %641 = vector.shape_cast %640 : vector<2xf32> to vector<2x1xf32>
    %c0_395 = arith.constant 0 : index
    %c0_396 = arith.constant 0 : index
    %642 = vector.load %arg17[%c0_395, %c0_396] : memref<1x1xf32, #tpu.memory_space<vmem>>, vector<1x1xf32>
    %643 = vector.broadcast %642 : vector<1x1xf32> to vector<2x1xf32>
    %644 = arith.addf %641, %643 : vector<2x1xf32>
    %c0_397 = arith.constant 0 : index
    %c0_398 = arith.constant 0 : index
    %645 = vector.load %arg18[%c0_397, %c0_398] : memref<2x1xf32, #tpu.memory_space<vmem>>, vector<2x1xf32>
    tpu.vector_store %arg18[%c0_397, %c0_398], %644 {strides = array<i32>} : memref<2x1xf32, #tpu.memory_space<vmem>>, vector<2x1xf32>,
    return
  }
}

</mosaic_0001>

<bundles_post_ra>
// kernel: tpu_custom_call.1
= control target key start
LH: loop header
LB: loop body
LE: loop exit
PB: predicated region body
PF: predicated region fallthrough
CT: control target
= control target key end

     0   :  { %s4979_s0 = inlined_call_operand.vmem [shape: f32[32,8], index: 0, kind: input, shape index: {}]   ;;  %s4980_s1 = inlined_call_operand.hbm [shape: bf16[32,32], index: 1, kind: input, shape index: {}]   ;;  %s4981_s2 = inlined_call_operand.vmem [shape: bf16[12,32,64], index: 2, kind: input, shape index: {}]   ;;  %s4982_s3 = inlined_call_operand.hbm [shape: bf16[5,2,64], index: 3, kind: input, shape index: {}]   ;;  %s4983_s4 = inlined_call_operand.hbm [shape: bf16[8,64], index: 4, kind: input, shape index: {}]   ;;  %s4984_s5 = inlined_call_operand.vmem [shape: f32[1,64], index: 5, kind: input, shape index: {}]   ;;  %s4985_s6 = inlined_call_operand.hbm [shape: bf16[5,64,64], index: 6, kind: input, shape index: {}]   ;;  %s4986_s7 = inlined_call_operand.hbm [shape: f32[5,1,64], index: 7, kind: input, shape index: {}]   ;;  %s4987_s8 = inlined_call_operand.hbm [shape: bf16[12,64,64], index: 8, kind: input, shape index: {}]   ;;  %s4988_s9 = inlined_call_operand.vmem [shape: f32[12,1,64], index: 9, kind: input, shape index: {}]   ;;  %s4989_s10 = inlined_call_operand.hbm [shape: f32[12,1,64], index: 10, kind: input, shape index: {}]   ;;  %s4990_s11 = inlined_call_operand.hbm [shape: f32[12,1,64], index: 11, kind: input, shape index: {}]   ;;  %s4991_s12 = inlined_call_operand.vmem [shape: bf16[384,64], index: 12, kind: input, shape index: {}]   ;;  %s4992_s13 = inlined_call_operand.vmem [shape: f32[1,64], index: 13, kind: input, shape index: {}]   ;;  %s4993_s14 = inlined_call_operand.vmem [shape: bf16[4,64,64], index: 14, kind: input, shape index: {}]   ;;  %s4994_s15 = inlined_call_operand.vmem [shape: f32[4,1,64], index: 15, kind: input, shape index: {}]   ;;  %s4995_s16 = inlined_call_operand.vmem [shape: f32[1,64], index: 16, kind: input, shape index: {}]   ;;  %s4996_s17 = inlined_call_operand.<no memory space> [shape: f32[1,1], index: 17, kind: input, shape index: {}]   ;;  %s4997_s18 = inlined_call_operand.vmem [shape: f32[2,1], index: 18, kind: output, shape index: {}]  }
   0x1   :  { %5000 = sst [smem:[#allocation22_spill]] %s4979_s0  ;;  %v23_v0 = vstv %s4996_s17 }
   0x2   :  { %5001 = sst [smem:[#allocation23_spill]] %s4980_s1  ;;  %24 = vst [vmem:[#allocation3] sm:$0x1] %v23_v0 }
   0x3   :  { %5002 = sst [smem:[#allocation24_spill]] %s4981_s2 }
   0x4   :  { %25 = vsyncpa [#allocation5], 0 }
   0x5   :  { %26 = vsyncpa [#allocation7], 0 }
   0x6   :  { %27 = vsyncpa [#allocation10], 0 }
   0x7   :  { %28 = vsyncpa [#allocation13], 0  ;;  %s51_s0 = sshll.u32 %s4982_s3, 4  ;;  %s52_s0 = int_to_ptr.hbm [resolvable:$true] %s51_s0 }
   0x8   :  { %29 = vsyncpa [#allocation16], 0  ;;  %s4312_s19 = smov [#allocation6]   ;;  %s4313_s20 = smov 16  }
   0x9   :  { %s53_s1 = sshll.u32 %s4312_s19, 4  ;;  %s4314_s21 = smov 1   ;;  %s54_s1 = int_to_ptr.vmem [resolvable:$true] %s53_s1 }
   0xa   :  { %59 = dma.hbm_to_vmem [thread:$0]  %s52_s0, 80, %s54_s1, [#allocation7], %s4313_s20, %s4313_s20, %s4314_s21  }
   0xb   :  { %s77_s2 = sshll.u32 %s4985_s6, 4  ;;  %s4315_s23 = smov [#allocation9]   ;;  %s78_s2 = int_to_ptr.hbm [resolvable:$true] %s77_s2 }
   0xc   :  { %s79_s24 = sshll.u32 %s4315_s23, 4  ;;  %s103_s26 = sshll.u32 %s4987_s8, 4  ;;  %s80_s24 = int_to_ptr.vmem [resolvable:$true] %s79_s24  ;;  %s104_s26 = int_to_ptr.hbm [resolvable:$true] %s103_s26 }
   0xd   :  { %s4316_s27 = smov 64   ;;  %s4317_s28 = smov 4  }
   0xe   :  { %85 = dma.hbm_to_vmem [thread:$0]  %s78_s2, 2560, %s80_s24, [#allocation10], %s4316_s27, %s4316_s27, %s4317_s28  }
   0xf   :  { %s5003_s0 = sld [smem:[#allocation23_spill]]  ;;  %s4318_s1 = smov [#allocation12]  }
  0x10   :  { %s105_s6 = sshll.u32 %s4318_s1, 4  ;;  %s4319_s17 = smov [#allocation4]   ;;  %s106_s6 = int_to_ptr.vmem [resolvable:$true] %s105_s6 }
  0x11   :  { %111 = dma.hbm_to_vmem [thread:$0]  %s104_s26, 6144, %s106_s6, [#allocation13], %s4316_s27, %s4316_s27, %s4317_s28  }
  0x12   :  { %s38_s8 = sshll.u32 %s4319_s17, 4  ;;  %s65_s25 = sshll.u32 %s4983_s4, 4  ;;  %s39_s8 = int_to_ptr.vmem [resolvable:$true] %s38_s8  ;;  %s66_s25 = int_to_ptr.hbm [resolvable:$true] %s65_s25 }
  0x13   :  { %s90_s3 = sshll.u32 %s4986_s7, 4  ;;  %s4320_s29 = smov [#allocation8]   ;;  %s91_s3 = int_to_ptr.hbm [resolvable:$true] %s90_s3 }
  0x14   :  { %s67_s30 = sshll.u32 %s4320_s29, 4  ;;  %s4321_s26 = smov [#allocation11]   ;;  %s68_s30 = int_to_ptr.vmem [resolvable:$true] %s67_s30 }
  0x15   :  { %s36_s19 = sshll.u32 %s5003_s0, 4  ;;  %s92_s0 = sshll.u32 %s4321_s26, 4  ;;  %s37_s19 = int_to_ptr.hbm [resolvable:$true] %s36_s19  ;;  %s93_s0 = int_to_ptr.vmem [resolvable:$true] %s92_s0 }
  0x16   :  { %44 = dma.hbm_to_vmem [thread:$0]  %s37_s19, 256, %s39_s8, [#allocation5], %s4316_s27, %s4316_s27, %s4317_s28  }
  0x17   :  { %70 = dma.hbm_to_vmem [thread:$0]  %s66_s25, 64, %s68_s30, [#allocation7]  }
  0x18   :  { %s118_s4 = sshll.u32 %s4989_s10, 4  ;;  %s131_s7 = sshll.u32 %s4990_s11, 4  ;;  %s119_s4 = int_to_ptr.hbm [resolvable:$true] %s118_s4  ;;  %s132_s7 = int_to_ptr.hbm [resolvable:$true] %s131_s7 }
  0x19   :  { %98 = dma.hbm_to_vmem [thread:$0]  %s91_s3, 80, %s93_s0, [#allocation10], %s4313_s20, %s4313_s20, %s4314_s21  }
  0x1a   :  { %s4322_s17 = smov [#allocation14]   ;;  %s4323_s22 = smov [#allocation15]  }
  0x1b   :  { %s120_s8 = sshll.u32 %s4322_s17, 4  ;;  %s133_s10 = sshll.u32 %s4323_s22, 4  ;;  %s121_s8 = int_to_ptr.vmem [resolvable:$true] %s120_s8  ;;  %s134_s10 = int_to_ptr.vmem [resolvable:$true] %s133_s10 }
  0x1c   :  { %126 = dma.hbm_to_vmem [thread:$0]  %s119_s4, 192, %s121_s8, [#allocation13], %s4313_s20, %s4313_s20, %s4314_s21  }
  0x1d   :  { %139 = dma.hbm_to_vmem [thread:$0]  %s132_s7, 192, %s134_s10, [#allocation16], %s4313_s20, %s4313_s20, %s4314_s21  }
  0x1e   :  { %4302 = dma.done.wait [#allocation5], 256  }
  0x1f   :  { %4303 = vsyncadd [#allocation5], 4294967040 }
  0x20   :  { %4304 = dma.done.wait [#allocation7], 144  }
  0x21   :  { %4305 = vsyncadd [#allocation7], 4294967152 }
  0x22   :  { %4306 = dma.done.wait [#allocation10], 2640  }
  0x23   :  { %4307 = vsyncadd [#allocation10], 4294964656 }
  0x24   :  { %4308 = dma.done.wait [#allocation13], 6336  }
  0x25   :  { %4309 = vsyncadd [#allocation13], 4294960960 }
  0x26   :  { %4310 = dma.done.wait [#allocation16], 192  }
  0x27   :  { %4311 = vsyncadd [#allocation16], 4294967104  ;;  %vm207_vm0 = vcmask 1043456   ;;  %v193_v1 = vld [vmem:[#allocation8] sm:$0xf]  ;;  %s5004_s25 = sld [smem:[#allocation22_spill]] }
  0x28   :  { %v209_v4 = vsel %vm207_vm0, %v193_v1, 0  ;;  %vm200_vm1 = vcmask 64512   ;;  %v3808_v9 = vld [vmem:[#allocation9 + $0x18] sm:$0xff]  ;;  %v3807_v10 = vld [vmem:[#allocation9 + $0x10] sm:$0xff]  ;;  %v3806_v11 = vld [vmem:[#allocation9 + $0x8] sm:$0xff]  ;;  %vm272_vm2 = vcmask 523264  }
  0x29   :  { %218 = vmatpush.bf16.msra.mxu0 %v209_v4  ;;  %283 = vmatpush.bf16.msra.mxu1 %v3808_v9  ;;  %v3805_v12 = vld [vmem:[#allocation9] sm:$0xff]  ;;  %v4045_v14 = vld [vmem:[%s4984_s5] ss:$0 sm:$0xff]  ;;  %v3812_v28 = vld [vmem:[#allocation9 + $0x38] sm:$0xff]  ;;  %vm590_vm3 = vcmask 261120   ;;  %s5005_s4 = sld [smem:[#allocation24_spill]] }
  0x2a   :  { %352 = vmatpush.bf16.msra.mxu2 %v3812_v28  ;;  %v3811_v29 = vld [vmem:[#allocation9 + $0x30] sm:$0xff]  ;;  %v3810_v30 = vld [vmem:[#allocation9 + $0x28] sm:$0xff]  ;;  %v3809_v31 = vld [vmem:[#allocation9 + $0x20] sm:$0xff]  ;;  %vm943_vm11 = vcmask 1041409   ;;  %vm945_vm12 = vcmask 1043459   ;;  %vm947_vm13 = vcmask 1045509  }
  0x2b   :  { %v4046_v33 = vld [vmem:[#allocation11] ss:$0 sm:$0xff]  ;;  %v3816_v47 = vld [vmem:[#allocation9 + $0x58] sm:$0xff]  ;;  %v3815_v48 = vld [vmem:[#allocation9 + $0x50] sm:$0xff]  ;;  %vm949_vm14 = vcmask 1047559   ;;  %vm952_vm15 = vcmask 517120  }
  0x2c   :  { %421 = vmatpush.bf16.msra.mxu3 %v3816_v47  ;;  %v3814_v49 = vld [vmem:[#allocation9 + $0x48] sm:$0xff]  ;;  %v3813_v50 = vld [vmem:[#allocation9 + $0x40] sm:$0xff] }
  0x2d   :  { %v185_v2 = vld [vmem:[%s5004_s25] sm:$0xff]  ;;  %v186_v3 = vld [vmem:[%s5004_s25 + $0x8] sm:$0xff]  ;;  %v187_v6 = vld [vmem:[%s5004_s25 + $0x10] sm:$0xff]  ;;  %284 = vmatpush.bf16.msra.mxu1 %v3807_v10 }
  0x2e   :  { %v194_v5 = vpack.c.bf16 %v186_v3, %v185_v2  ;;  %v188_v7 = vld [vmem:[%s5004_s25 + $0x18] sm:$0xff]  ;;  %353 = vmatpush.bf16.msra.mxu2 %v3811_v29  ;;  %v4047_v52 = vld [vmem:[#allocation11 + $0x1] ss:$0 sm:$0xff]  ;;  %v3820_v2 = vld [vmem:[#allocation9 + $0x78] sm:$0xff] }
  0x2f   :  { %v195_v8 = vpack.c.bf16 %v188_v7, %v187_v6  ;;  %490 = vmatpush.bf16.msrb.mxu0 %v3820_v2  ;;  %v3819_v3 = vld [vmem:[#allocation9 + $0x70] sm:$0xff]  ;;  %v3818_v4 = vld [vmem:[#allocation9 + $0x68] sm:$0xff]  ;;  %v4048_v7 = vld [vmem:[#allocation11 + $0x2] ss:$0 sm:$0xff] }
  0x30   :  { %3229 = vmatmul.msk.bf16.vlgmr.msra.gmra.mxu0 %vm200_vm1, %v194_v5  ;;  %422 = vmatpush.bf16.msra.mxu3 %v3815_v48  ;;  %v3817_v5 = vld [vmem:[#allocation9 + $0x60] sm:$0xff] }
  0x31   :  { %285 = vmatpush.bf16.msra.mxu1 %v3806_v11 }
  0x32   :  { %354 = vmatpush.bf16.msra.mxu2 %v3810_v30 }
  0x33   :  { %491 = vmatpush.bf16.msrb.mxu0 %v3819_v3 }
  0x34   :  { %423 = vmatpush.bf16.msra.mxu3 %v3814_v49 }
  0x35   :  { %286 = vmatpush.bf16.msra.mxu1 %v3805_v12 }
  0x36   :  { %355 = vmatpush.bf16.msra.mxu2 %v3809_v31 }
  0x37   :  { %492 = vmatpush.bf16.msrb.mxu0 %v3818_v4 }
  0x38   :  { %424 = vmatpush.bf16.msra.mxu3 %v3813_v50 }
  0x3b   :  { %493 = vmatpush.bf16.msrb.mxu0 %v3817_v5  ;;  %v4324_v5 = vmov 32.0  }
  0x3c   :  { %4082 = vrcp.f32 %v4324_v5 }
  0x40   :  { %3230 = vmatmul.msk.bf16.gmra.mxu0 %vm200_vm1, %v195_v8 }
  0xad   :  { %v220_v13 = vpop.f32.mrf.mxu0 }
  0xae   :  { %v221_v15 = vadd.f32 %v4045_v14, %v220_v13 }
  0xb0   :  { %v230_v18 = vmax.f32 %v221_v15, 0.0 }
  0xb5   :  { %v222_v16 = vpop.f32.mrf.mxu0 }
  0xb6   :  { %v223_v17 = vadd.f32 %v4045_v14, %v222_v16 }
  0xb8   :  { %v231_v19 = vmax.f32 %v223_v17, 0.0 }
  0xba   :  { %v242_v20 = vpack.c.bf16 %v231_v19, %v230_v18 }
  0xbc   :  { %3247 = vmatmul.msk.bf16.vlgmr.msra.gmra.mxu1 %vm272_vm2, %v242_v20 }
  0xbd   :  { %v225_v21 = vpop.f32.mrf.mxu0 }
  0xbe   :  { %v226_v22 = vadd.f32 %v4045_v14, %v225_v21  ;;  %v3824_v21 = vld [vmem:[#allocation9 + $0x98] sm:$0xff] }
  0xbf   :  { %559 = vmatpush.bf16.msrb.mxu1 %v3824_v21 }
  0xc0   :  { %v232_v25 = vmax.f32 %v226_v22, 0.0  ;;  %v3823_v22 = vld [vmem:[#allocation9 + $0x90] sm:$0xff] }
  0xc3   :  { %560 = vmatpush.bf16.msrb.mxu1 %v3823_v22 }
  0xc5   :  { %v227_v23 = vpop.f32.mrf.mxu0 }
  0xc6   :  { %v228_v24 = vadd.f32 %v4045_v14, %v227_v23  ;;  %v3822_v23 = vld [vmem:[#allocation9 + $0x88] sm:$0xff] }
  0xc7   :  { %561 = vmatpush.bf16.msrb.mxu1 %v3822_v23 }
  0xc8   :  { %v233_v26 = vmax.f32 %v228_v24, 0.0  ;;  %v3821_v24 = vld [vmem:[#allocation9 + $0x80] sm:$0xff] }
  0xca   :  { %v243_v27 = vpack.c.bf16 %v233_v26, %v232_v25  ;;  %v4049_v26 = vld [vmem:[#allocation11 + $0x3] ss:$0 sm:$0xff] }
  0xcb   :  { %562 = vmatpush.bf16.msrb.mxu1 %v3821_v24 }
  0xcc   :  { %3248 = vmatmul.msk.bf16.gmra.mxu1 %vm272_vm2, %v243_v27 }
 0x139   :  { %v288_v32 = vpop.f32.mrf.mxu1 }
 0x13a   :  { %v289_v34 = vadd.f32 %v4046_v33, %v288_v32 }
 0x13c   :  { %v298_v37 = vmax.f32 %v289_v34, 0.0 }
 0x141   :  { %v290_v35 = vpop.f32.mrf.mxu1 }
 0x142   :  { %v291_v36 = vadd.f32 %v4046_v33, %v290_v35 }
 0x144   :  { %v299_v38 = vmax.f32 %v291_v36, 0.0 }
 0x146   :  { %v311_v39 = vpack.c.bf16 %v299_v38, %v298_v37 }
 0x148   :  { %3265 = vmatmul.msk.bf16.vlgmr.msra.gmra.mxu2 %vm272_vm2, %v311_v39 }
 0x149   :  { %v293_v40 = vpop.f32.mrf.mxu1 }
 0x14a   :  { %v294_v41 = vadd.f32 %v4046_v33, %v293_v40 }
 0x14c   :  { %v300_v44 = vmax.f32 %v294_v41, 0.0 }
 0x151   :  { %v295_v42 = vpop.f32.mrf.mxu1 }
 0x152   :  { %v296_v43 = vadd.f32 %v4046_v33, %v295_v42 }
 0x154   :  { %v301_v45 = vmax.f32 %v296_v43, 0.0  ;;  %v4050_v43 = vld [vmem:[#allocation11 + $0x4] ss:$0 sm:$0xff] }
 0x156   :  { %v312_v46 = vpack.c.bf16 %v301_v45, %v300_v44  ;;  %v3828_v44 = vld [vmem:[#allocation12 + $0x18] sm:$0xff] }
 0x157   :  { %664 = vmatpush.bf16.msrb.mxu3 %v3828_v44 }
 0x158   :  { %3266 = vmatmul.msk.bf16.gmra.mxu2 %vm272_vm2, %v312_v46 }
 0x1cb   :  { %v357_v51 = vpop.f32.mrf.mxu2 }
 0x1cc   :  { %v358_v53 = vadd.f32 %v4047_v52, %v357_v51 }
 0x1ce   :  { %v367_v56 = vmax.f32 %v358_v53, 0.0 }
 0x1d3   :  { %v359_v54 = vpop.f32.mrf.mxu2 }
 0x1d4   :  { %v360_v55 = vadd.f32 %v4047_v52, %v359_v54 }
 0x1d6   :  { %v368_v57 = vmax.f32 %v360_v55, 0.0 }
 0x1d8   :  { %v380_v58 = vpack.c.bf16 %v368_v57, %v367_v56  ;;  %v4490_v56 = vld [vmem:[#allocation4] sm:$0xff]  ;;  %v4494_v57 = vld [vmem:[#allocation4 + $0x8] sm:$0xff] }
 0x1da   :  { %3283 = vmatmul.msk.bf16.vlgmr.msra.gmra.mxu3 %vm272_vm2, %v380_v58  ;;  %v3827_v58 = vld [vmem:[#allocation12 + $0x10] sm:$0xff] }
 0x1db   :  { %v362_v59 = vpop.f32.mrf.mxu2  ;;  %665 = vmatpush.bf16.msrb.mxu3 %v3827_v58 }
 0x1dc   :  { %v363_v60 = vadd.f32 %v4047_v52, %v362_v59  ;;  %v3826_v59 = vld [vmem:[#allocation12 + $0x8] sm:$0xff] }
 0x1de   :  { %v369_v63 = vmax.f32 %v363_v60, 0.0  ;;  %v3825_v60 = vld [vmem:[#allocation12] sm:$0xff] }
 0x1df   :  { %666 = vmatpush.bf16.msrb.mxu3 %v3826_v59  ;;  %v3829_v59 = vld [vmem:[#allocation12 + $0x20] sm:$0xff] }
 0x1e3   :  { %v364_v61 = vpop.f32.mrf.mxu2  ;;  %667 = vmatpush.bf16.msrb.mxu3 %v3825_v60 }
 0x1e4   :  { %v365_v62 = vadd.f32 %v4047_v52, %v364_v61 }
 0x1e6   :  { %v370_v0 = vmax.f32 %v365_v62, 0.0 }
 0x1e8   :  { %v381_v1 = vpack.c.bf16 %v370_v0, %v369_v63 }
 0x1ea   :  { %3284 = vmatmul.msk.bf16.gmra.mxu3 %vm272_vm2, %v381_v1 }
 0x25d   :  { %v426_v6 = vpop.f32.mrf.mxu3 }
 0x25e   :  { %v427_v8 = vadd.f32 %v4048_v7, %v426_v6  ;;  %v4051_v6 = vld [vmem:[%s4988_s9] ss:$0 sm:$0xff] }
 0x260   :  { %v436_v11 = vmax.f32 %v427_v8, 0.0 }
 0x265   :  { %v428_v9 = vpop.f32.mrf.mxu3 }
 0x266   :  { %v429_v10 = vadd.f32 %v4048_v7, %v428_v9 }
 0x268   :  { %v437_v12 = vmax.f32 %v429_v10, 0.0 }
 0x26a   :  { %v449_v13 = vpack.c.bf16 %v437_v12, %v436_v11  ;;  %v4083_v11 = vpop.eup %4082 }
 0x26b   :  { %vm699_vm4 = vweird.f32 %v4083_v11 }
 0x26c   :  { %3301 = vmatmul.msk.bf16.vlgmr.msrb.gmra.mxu0 %vm272_vm2, %v449_v13 }
 0x26d   :  { %v431_v14 = vpop.f32.mrf.mxu3 }
 0x26e   :  { %v432_v15 = vadd.f32 %v4048_v7, %v431_v14 }
 0x270   :  { %v438_v18 = vmax.f32 %v432_v15, 0.0  ;;  %v695_v15 = vmul.f32 32.0, %v4083_v11 }
 0x272   :  { %v696_v21 = vsub.f32 1.0, %v695_v15 }
 0x274   :  { %v697_v24 = vmul.f32 %v4083_v11, %v696_v21 }
 0x275   :  { %v433_v16 = vpop.f32.mrf.mxu3 }
 0x276   :  { %v434_v17 = vadd.f32 %v4048_v7, %v433_v16 }
 0x278   :  { %v439_v19 = vmax.f32 %v434_v17, 0.0 }
 0x27a   :  { %v450_v20 = vpack.c.bf16 %v439_v19, %v438_v18 }
 0x27c   :  { %3302 = vmatmul.msk.bf16.gmra.mxu0 %vm272_vm2, %v450_v20 }
 0x2e9   :  { %v495_v25 = vpop.f32.mrf.mxu0 }
 0x2ea   :  { %v496_v27 = vadd.f32 %v4049_v26, %v495_v25 }
 0x2ec   :  { %v505_v30 = vmax.f32 %v496_v27, 0.0  ;;  %v698_v27 = vadd.f32 %v4083_v11, %v697_v24 }
 0x2f1   :  { %v497_v28 = vpop.f32.mrf.mxu0 }
 0x2f2   :  { %v498_v29 = vadd.f32 %v4049_v26, %v497_v28 }
 0x2f4   :  { %v506_v31 = vmax.f32 %v498_v29, 0.0 }
 0x2f6   :  { %v518_v32 = vpack.c.bf16 %v506_v31, %v505_v30  ;;  %v4507_v30 = vsel %vm699_vm4, %v4083_v11, %v698_v27 }
 0x2f8   :  { %3319 = vmatmul.msk.bf16.vlgmr.msrb.gmra.mxu1 %vm272_vm2, %v518_v32 }
 0x2f9   :  { %v500_v33 = vpop.f32.mrf.mxu0 }
 0x2fa   :  { %v501_v34 = vadd.f32 %v4049_v26, %v500_v33 }
 0x2fc   :  { %v507_v37 = vmax.f32 %v501_v34, 0.0 }
 0x301   :  { %v502_v35 = vpop.f32.mrf.mxu0 }
 0x302   :  { %v503_v36 = vadd.f32 %v4049_v26, %v502_v35 }
 0x304   :  { %v508_v38 = vmax.f32 %v503_v36, 0.0 }
 0x306   :  { %v519_v39 = vpack.c.bf16 %v508_v38, %v507_v37 }
 0x308   :  { %3320 = vmatmul.msk.bf16.gmra.mxu1 %vm272_vm2, %v519_v39 }
 0x375   :  { %v564_v40 = vpop.f32.mrf.mxu1 }
 0x376   :  { %v565_v49 = vadd.f32 %v4050_v43, %v564_v40 }
 0x378   :  { %v574_v54 = vmax.f32 %v565_v49, 0.0  ;;  %v3832_v49 = vld [vmem:[#allocation12 + $0x38] sm:$0xff] }
 0x379   :  { %818 = vmatpush.bf16.msra.mxu0 %v3832_v49 }
 0x37d   :  { %v566_v41 = vpop.f32.mrf.mxu1 }
 0x37e   :  { %v567_v47 = vadd.f32 %v4050_v43, %v566_v41 }
 0x380   :  { %v575_v52 = vmax.f32 %v567_v47, 0.0 }
 0x382   :  { %v578_v55 = vpack.c.bf16 %v575_v52, %v574_v54  ;;  %v3831_v52 = vld [vmem:[#allocation12 + $0x30] sm:$0xff] }
 0x383   :  { %819 = vmatpush.bf16.msra.mxu0 %v3831_v52 }
 0x385   :  { %v569_v42 = vpop.f32.mrf.mxu1 }
 0x386   :  { %v570_v45 = vadd.f32 %v4050_v43, %v569_v42 }
 0x388   :  { %v576_v50 = vmax.f32 %v570_v45, 0.0 }
 0x38d   :  { %v571_v46 = vpop.f32.mrf.mxu1 }
 0x38e   :  { %v572_v48 = vadd.f32 %v4050_v43, %v571_v46 }
 0x390   :  { %v577_v51 = vmax.f32 %v572_v48, 0.0 }
 0x392   :  { %v579_v53 = vpack.c.bf16 %v577_v51, %v576_v50 }
 0x394   :  { %603 = vmatpush.bf16.msrb.mxu2 %v579_v53 }
 0x398   :  { %604 = vmatpush.bf16.msrb.mxu2 %v578_v55  ;;  %v3830_v55 = vld [vmem:[#allocation12 + $0x28] sm:$0xff] }
 0x399   :  { %820 = vmatpush.bf16.msra.mxu0 %v3830_v55 }
 0x39b   :  { %3329 = vmatmul.msk.bf16.vlgmr.msrb.gmra.mxu2 %vm590_vm3, %v4490_v56 }
 0x39d   :  { %821 = vmatpush.bf16.msra.mxu0 %v3829_v59 }
 0x3ab   :  { %3330 = vmatmul.msk.bf16.gmra.mxu2 %vm590_vm3, %v4494_v57 }
 0x41e   :  { %v606_v61 = vpop.f32.mrf.mxu2 }
 0x426   :  { %v608_v62 = vpop.f32.mrf.mxu2 }
 0x427   :  { %v624_v63 = vpack.c.bf16 %v608_v62, %v606_v61 }
 0x429   :  { %3347 = vmatmul.msk.bf16.vlgmr.msrb.gmra.mxu3 %vm272_vm2, %v624_v63 }
 0x42e   :  { %v611_v0 = vpop.f32.mrf.mxu2 }
 0x436   :  { %v613_v1 = vpop.f32.mrf.mxu2 }
 0x437   :  { %v625_v2 = vpack.c.bf16 %v613_v1, %v611_v0 }
 0x439   :  { %3348 = vmatmul.msk.bf16.gmra.mxu3 %vm272_vm2, %v625_v2 }
 0x4ac   :  { %v669_v3 = vpop.f32.mrf.mxu3 }
 0x4ad   :  { %v670_v9 = vadd.f32 %v4051_v6, %v669_v3  ;;  %v679_v3 = vld [vmem:[#allocation14] sm:$0x1] }
 0x4af   :  { %v681_v13 = vsel %vm272_vm2, %v670_v9, 0.0 }
 0x4b4   :  { %v671_v4 = vpop.f32.mrf.mxu3 }
 0x4b5   :  { %v672_v8 = vadd.f32 %v4051_v6, %v671_v4 }
 0x4b7   :  { %v682_v12 = vsel %vm272_vm2, %v672_v8, 0.0 }
 0x4b8   :  { %v683_v16 = vadd.f32 %v682_v12, %v681_v13 }
 0x4bc   :  { %v674_v7 = vpop.f32.mrf.mxu3 }
 0x4bd   :  { %v675_v10 = vadd.f32 %v4051_v6, %v674_v7  ;;  %v3914_v7 = vld [vmem:[%s5005_s4] sm:$0xff]  }
 0x4be   :  { %v3915_v12 = vunpack.c.l.bf16 %v3914_v7  ;;  %v3916_v13 = vunpack.c.h.bf16 %v3914_v7 }
 0x4bf   :  { %v684_v14 = vsel %vm272_vm2, %v675_v10, 0.0 }
 0x4c0   :  { %v685_v19 = vadd.f32 %v684_v14, %v683_v16 }
 0x4c4   :  { %v676_v17 = vpop.f32.mrf.mxu3 }
 0x4c5   :  { %v677_v18 = vadd.f32 %v4051_v6, %v676_v17 }
 0x4c7   :  { %v686_v20 = vsel %vm272_vm2, %v677_v18, 0.0 }
 0x4c8   :  { %v687_v22 = vadd.f32 %v686_v20, %v685_v19 }
 0x4ca   :  { %v688_v23 = vrot.slane %v687_v22, 4 }
 0x4cc   :  { %v689_v25 = vadd.f32 %v688_v23, %v687_v22  ;;  %v4009_v22 = vld [vmem:[%s5005_s4 + $0x8] sm:$0xff]  }
 0x4ce   :  { %v690_v26 = vrot.slane %v689_v25, 2 }
 0x4d0   :  { %v691_v28 = vadd.f32 %v690_v26, %v689_v25  ;;  %v3919_v25 = vunpack.c.l.bf16 %v4009_v22 }
 0x4d2   :  { %v692_v29 = vrot.slane %v691_v28, 1 }
 0x4d4   :  { %v693_v31 = vadd.f32 %v692_v29, %v691_v28  ;;  %v3920_v29 = vunpack.c.h.bf16 %v4009_v22 }
 0x4d6   :  { %v701_v32 = vmul.f32 %v4507_v30, %v693_v31 }
 0x4d8   :  { %v702_v33 = vsub.f32 %v670_v9, %v701_v32  ;;  %v703_v34 = vsub.f32 %v672_v8, %v701_v32  ;;  %v704_v35 = vsub.f32 %v675_v10, %v701_v32  ;;  %v705_v36 = vsub.f32 %v677_v18, %v701_v32  ;;  %v4052_v9 = vld [vmem:[#allocation15] ss:$0 sm:$0xff] }
 0x4da   :  { %v706_v37 = vmul.f32 %v702_v33, %v702_v33  ;;  %v707_v38 = vmul.f32 %v703_v34, %v703_v34  ;;  %v708_v39 = vmul.f32 %v704_v35, %v704_v35  ;;  %v709_v40 = vmul.f32 %v705_v36, %v705_v36 }
 0x4dc   :  { %v710_v41 = vsel %vm272_vm2, %v706_v37, 0.0  ;;  %v711_v42 = vsel %vm272_vm2, %v707_v38, 0.0  ;;  %v713_v44 = vsel %vm272_vm2, %v708_v39, 0.0  ;;  %v715_v46 = vsel %vm272_vm2, %v709_v40, 0.0  ;;  %v4053_v40 = vld [vmem:[%s4988_s9 + $0x1] ss:$0 sm:$0xff] }
 0x4dd   :  { %v712_v43 = vadd.f32 %v711_v42, %v710_v41 }
 0x4df   :  { %v714_v45 = vadd.f32 %v713_v44, %v712_v43 }
 0x4e1   :  { %v716_v47 = vadd.f32 %v715_v46, %v714_v45 }
 0x4e3   :  { %v717_v48 = vrot.slane %v716_v47, 4 }
 0x4e5   :  { %v718_v50 = vadd.f32 %v717_v48, %v716_v47 }
 0x4e7   :  { %v719_v51 = vrot.slane %v718_v50, 2 }
 0x4e9   :  { %v720_v53 = vadd.f32 %v719_v51, %v718_v50 }
 0x4eb   :  { %v721_v54 = vrot.slane %v720_v53, 1 }
 0x4ed   :  { %v722_v58 = vadd.f32 %v721_v54, %v720_v53 }
 0x4ef   :  { %v723_v60 = vmul.f32 %v722_v58, %v4507_v30 }
 0x4f1   :  { %v724_v61 = vadd.f32 1e-05, %v723_v60 }
 0x4f3   :  { %4084 = vrsqrt.f32 %v724_v61  ;;  %vm731_vm6 = vweird.f32 %v724_v61 }
 0x4f9   :  { %v4085_v62 = vpop.eup %4084 }
 0x4fa   :  { %v726_v63 = vmul.f32 %v4085_v62, %v724_v61  ;;  %vm732_vm5 = vweird.f32 %v4085_v62 }
 0x4fb   :  { %vm733_vm7 = vmor %vm731_vm6, %vm732_vm5 }
 0x4fc   :  { %v727_v0 = vmul.f32 %v4085_v62, %v726_v63 }
 0x4fe   :  { %v728_v1 = vmul.f32 0.5, %v727_v0 }
 0x500   :  { %v729_v2 = vsub.f32 1.5, %v728_v1 }
 0x502   :  { %v730_v4 = vmul.f32 %v4085_v62, %v729_v2 }
 0x504   :  { %v734_v5 = vsel %vm733_vm7, %v4085_v62, %v730_v4 }
 0x505   :  { %v735_v6 = vmul.f32 %v734_v5, %v679_v3 }
 0x507   :  { %v736_v8 = vperm.slane %v735_v6, 0 }
 0x509   :  { %v737_v10 = vmul.f32 %v736_v8, %v702_v33  ;;  %v738_v11 = vmul.f32 %v736_v8, %v703_v34  ;;  %v740_v18 = vmul.f32 %v736_v8, %v705_v36  ;;  %v739_v21 = vmul.f32 %v736_v8, %v704_v35 }
 0x50b   :  { %v744_v14 = vadd.f32 %v4052_v9, %v737_v10  ;;  %v745_v15 = vadd.f32 %v4052_v9, %v738_v11  ;;  %v747_v26 = vadd.f32 %v4052_v9, %v740_v18  ;;  %v746_v28 = vadd.f32 %v4052_v9, %v739_v21 }
 0x50d   :  { %v756_v16 = vmul.f32 %v3915_v12, %v744_v14  ;;  %v757_v17 = vmul.f32 %v3916_v13, %v745_v15  ;;  %v758_v31 = vmul.f32 %v3919_v25, %v746_v28  ;;  %v759_v32 = vmul.f32 %v3920_v29, %v747_v26 }
 0x50f   :  { %v760_v19 = vmul.f32 1.1111112, %v756_v16  ;;  %v761_v20 = vmul.f32 1.1111112, %v757_v17  ;;  %v762_v33 = vmul.f32 1.1111112, %v758_v31 }
 0x510   :  { %v763_v34 = vmul.f32 1.1111112, %v759_v32  ;;  %v4011_v32 = vld [vmem:[%s5005_s4 + $0x18] sm:$0xff]  }
 0x511   :  { %v764_v23 = vmax.f32 %v760_v19, 0.0  ;;  %v765_v24 = vmax.f32 %v761_v20, 0.0  ;;  %v766_v36 = vmax.f32 %v762_v33, 0.0  ;;  %v4010_v33 = vld [vmem:[%s5005_s4 + $0x10] sm:$0xff]  }
 0x512   :  { %v767_v37 = vmax.f32 %v763_v34, 0.0 }
 0x513   :  { %v777_v27 = vpack.c.bf16 %v765_v24, %v764_v23 }
 0x514   :  { %v778_v35 = vpack.c.bf16 %v767_v37, %v766_v36  ;;  %v4054_v36 = vld [vmem:[#allocation15 + $0x1] ss:$0 sm:$0xff]  ;;  %v3928_v37 = vunpack.c.h.bf16 %v4011_v32 }
 0x515   :  { %3366 = vmatmul.msk.bf16.vlgmr.msra.gmra.mxu0 %vm272_vm2, %v777_v27  ;;  %v834_v27 = vld [vmem:[#allocation14 + $0x1] sm:$0x1] }
 0x525   :  { %3367 = vmatmul.msk.bf16.gmra.mxu0 %vm272_vm2, %v778_v35  ;;  %v3927_v35 = vunpack.c.l.bf16 %v4011_v32 }
 0x592   :  { %v823_v38 = vpop.f32.mrf.mxu0 }
 0x593   :  { %v824_v43 = vadd.f32 %v4053_v40, %v823_v38  ;;  %v3923_v38 = vunpack.c.l.bf16 %v4010_v33 }
 0x595   :  { %v837_v46 = vsel %vm272_vm2, %v824_v43, 0.0 }
 0x59a   :  { %v825_v39 = vpop.f32.mrf.mxu0 }
 0x59b   :  { %v826_v42 = vadd.f32 %v4053_v40, %v825_v39  ;;  %v3924_v39 = vunpack.c.h.bf16 %v4010_v33 }
 0x59d   :  { %v838_v45 = vsel %vm272_vm2, %v826_v42, 0.0 }
 0x59e   :  { %v839_v48 = vadd.f32 %v838_v45, %v837_v46 }
 0x5a2   :  { %v828_v41 = vpop.f32.mrf.mxu0 }
 0x5a3   :  { %v829_v44 = vadd.f32 %v4053_v40, %v828_v41 }
 0x5a5   :  { %v840_v47 = vsel %vm272_vm2, %v829_v44, 0.0 }
 0x5a6   :  { %v841_v51 = vadd.f32 %v840_v47, %v839_v48  ;;  %v3836_v48 = vld [vmem:[#allocation12 + $0x58] sm:$0xff] }
 0x5a7   :  { %1025 = vmatpush.bf16.msra.mxu2 %v3836_v48 }
 0x5aa   :  { %v830_v49 = vpop.f32.mrf.mxu0 }
 0x5ab   :  { %v831_v50 = vadd.f32 %v4053_v40, %v830_v49 }
 0x5ad   :  { %v842_v52 = vsel %vm272_vm2, %v831_v50, 0.0 }
 0x5ae   :  { %v843_v53 = vadd.f32 %v842_v52, %v841_v51 }
 0x5b0   :  { %v844_v54 = vrot.slane %v843_v53, 4 }
 0x5b2   :  { %v845_v55 = vadd.f32 %v844_v54, %v843_v53 }
 0x5b4   :  { %v846_v58 = vrot.slane %v845_v55, 2 }
 0x5b6   :  { %v847_v59 = vadd.f32 %v846_v58, %v845_v55 }
 0x5b8   :  { %v848_v60 = vrot.slane %v847_v59, 1 }
 0x5ba   :  { %v849_v61 = vadd.f32 %v848_v60, %v847_v59 }
 0x5bc   :  { %v850_v62 = vmul.f32 %v849_v61, %v4507_v30 }
 0x5be   :  { %v851_v63 = vsub.f32 %v824_v43, %v850_v62  ;;  %v852_v0 = vsub.f32 %v826_v42, %v850_v62  ;;  %v853_v1 = vsub.f32 %v829_v44, %v850_v62  ;;  %v854_v2 = vsub.f32 %v831_v50, %v850_v62 }
 0x5c0   :  { %v855_v3 = vmul.f32 %v851_v63, %v851_v63  ;;  %v856_v4 = vmul.f32 %v852_v0, %v852_v0  ;;  %v857_v5 = vmul.f32 %v853_v1, %v853_v1  ;;  %v858_v6 = vmul.f32 %v854_v2, %v854_v2 }
 0x5c2   :  { %v859_v7 = vsel %vm272_vm2, %v855_v3, 0.0  ;;  %v860_v8 = vsel %vm272_vm2, %v856_v4, 0.0  ;;  %v862_v10 = vsel %vm272_vm2, %v857_v5, 0.0  ;;  %v864_v12 = vsel %vm272_vm2, %v858_v6, 0.0 }
 0x5c3   :  { %v861_v9 = vadd.f32 %v860_v8, %v859_v7 }
 0x5c5   :  { %v863_v11 = vadd.f32 %v862_v10, %v861_v9 }
 0x5c7   :  { %v865_v13 = vadd.f32 %v864_v12, %v863_v11 }
 0x5c9   :  { %v866_v14 = vrot.slane %v865_v13, 4 }
 0x5cb   :  { %v867_v15 = vadd.f32 %v866_v14, %v865_v13 }
 0x5cd   :  { %v868_v16 = vrot.slane %v867_v15, 2 }
 0x5cf   :  { %v869_v17 = vadd.f32 %v868_v16, %v867_v15 }
 0x5d1   :  { %v870_v18 = vrot.slane %v869_v17, 1 }
 0x5d3   :  { %v871_v19 = vadd.f32 %v870_v18, %v869_v17 }
 0x5d5   :  { %v872_v20 = vmul.f32 %v871_v19, %v4507_v30 }
 0x5d7   :  { %v873_v21 = vadd.f32 1e-05, %v872_v20 }
 0x5d9   :  { %4086 = vrsqrt.f32 %v873_v21  ;;  %vm880_vm9 = vweird.f32 %v873_v21 }
 0x5df   :  { %v4087_v22 = vpop.eup %4086 }
 0x5e0   :  { %v875_v23 = vmul.f32 %v4087_v22, %v873_v21  ;;  %vm881_vm8 = vweird.f32 %v4087_v22 }
 0x5e1   :  { %vm882_vm10 = vmor %vm880_vm9, %vm881_vm8  ;;  %vm1305_vm8 = vcmask 1041920  }
 0x5e2   :  { %v876_v24 = vmul.f32 %v4087_v22, %v875_v23 }
 0x5e4   :  { %v877_v25 = vmul.f32 0.5, %v876_v24  ;;  %v3835_v24 = vld [vmem:[#allocation12 + $0x50] sm:$0xff] }
 0x5e5   :  { %1026 = vmatpush.bf16.msra.mxu2 %v3835_v24 }
 0x5e6   :  { %v878_v26 = vsub.f32 1.5, %v877_v25  ;;  %v3834_v25 = vld [vmem:[#allocation12 + $0x48] sm:$0xff] }
 0x5e8   :  { %v879_v28 = vmul.f32 %v4087_v22, %v878_v26  ;;  %v3833_v26 = vld [vmem:[#allocation12 + $0x40] sm:$0xff] }
 0x5e9   :  { %1027 = vmatpush.bf16.msra.mxu2 %v3834_v25 }
 0x5ea   :  { %v883_v29 = vsel %vm882_vm10, %v4087_v22, %v879_v28 }
 0x5eb   :  { %v884_v31 = vmul.f32 %v883_v29, %v834_v27 }
 0x5ed   :  { %v885_v34 = vperm.slane %v884_v31, 0  ;;  %1028 = vmatpush.bf16.msra.mxu2 %v3833_v26 }
 0x5ef   :  { %v889_v40 = vmul.f32 %v885_v34, %v854_v2  ;;  %v888_v41 = vmul.f32 %v885_v34, %v853_v1  ;;  %v886_v42 = vmul.f32 %v885_v34, %v851_v63  ;;  %v887_v43 = vmul.f32 %v885_v34, %v852_v0 }
 0x5f1   :  { %v896_v44 = vadd.f32 %v4054_v36, %v889_v40  ;;  %v895_v45 = vadd.f32 %v4054_v36, %v888_v41  ;;  %v893_v46 = vadd.f32 %v4054_v36, %v886_v42  ;;  %v894_v47 = vadd.f32 %v4054_v36, %v887_v43 }
 0x5f3   :  { %v909_v49 = vmul.f32 %v3928_v37, %v896_v44  ;;  %v908_v50 = vmul.f32 %v3927_v35, %v895_v45  ;;  %v906_v51 = vmul.f32 %v3923_v38, %v893_v46  ;;  %v907_v52 = vmul.f32 %v3924_v39, %v894_v47  ;;  %v4055_v37 = vld [vmem:[%s4988_s9 + $0x2] ss:$0 sm:$0xff] }
 0x5f5   :  { %v913_v53 = vmul.f32 1.1111112, %v909_v49  ;;  %v912_v54 = vmul.f32 1.1111112, %v908_v50  ;;  %v910_v55 = vmul.f32 1.1111112, %v906_v51 }
 0x5f6   :  { %v911_v58 = vmul.f32 1.1111112, %v907_v52 }
 0x5f7   :  { %v916_v59 = vmax.f32 %v912_v54, 0.0  ;;  %v917_v60 = vmax.f32 %v913_v53, 0.0  ;;  %v914_v61 = vmax.f32 %v910_v55, 0.0 }
 0x5f8   :  { %v915_v62 = vmax.f32 %v911_v58, 0.0 }
 0x5f9   :  { %v927_v63 = vsel %vm272_vm2, %v916_v59, 0.0  ;;  %v928_v0 = vsel %vm272_vm2, %v917_v60, 0.0  ;;  %v955_v1 = vpack.c.bf16 %v917_v60, %v916_v59  ;;  %v918_v2 = vsel %vm272_vm2, %v914_v61, 0.0 }
 0x5fa   :  { %v929_v3 = vadd.f32 %v928_v0, %v927_v63  ;;  %v919_v4 = vsel %vm272_vm2, %v915_v62, 0.0  ;;  %v954_v8 = vpack.c.bf16 %v915_v62, %v914_v61 }
 0x5fb   :  { %962 = vmatpush.bf16.msra.mxu1 %v955_v1  ;;  %v920_v5 = vadd.f32 %v919_v4, %v918_v2 }
 0x5fc   :  { %v930_v6 = vrot.slane %v929_v3, 4 }
 0x5fd   :  { %v921_v7 = vrot.slane %v920_v5, 4 }
 0x5fe   :  { %v931_v9 = vadd.f32 %v930_v6, %v929_v3 }
 0x5ff   :  { %v922_v10 = vadd.f32 %v921_v7, %v920_v5  ;;  %963 = vmatpush.bf16.msra.mxu1 %v954_v8 }
 0x600   :  { %v932_v11 = vrot.slane %v931_v9, 2 }
 0x601   :  { %v923_v12 = vrot.slane %v922_v10, 2 }
 0x602   :  { %v933_v13 = vadd.f32 %v932_v11, %v931_v9  ;;  %3372 = vmatmul.msk.bf16.vlgmr.msra.gmra.mxu1 %vm590_vm3, %v4490_v56 }
 0x603   :  { %v924_v14 = vadd.f32 %v923_v12, %v922_v10  ;;  %v3840_v12 = vld [vmem:[#allocation12 + $0x78] sm:$0xff] }
 0x604   :  { %v934_v15 = vrot.slane %v933_v13, 1  ;;  %1175 = vmatpush.bf16.msra.mxu3 %v3840_v12 }
 0x605   :  { %v925_v16 = vrot.slane %v924_v14, 1 }
 0x606   :  { %v935_v17 = vadd.f32 %v934_v15, %v933_v13  ;;  %v3839_v15 = vld [vmem:[#allocation12 + $0x70] sm:$0xff] }
 0x607   :  { %v926_v18 = vadd.f32 %v925_v16, %v924_v14 }
 0x608   :  { %v942_v19 = vrot.slane %v935_v17, 7  ;;  %1176 = vmatpush.bf16.msra.mxu3 %v3839_v15  ;;  %v3838_v17 = vld [vmem:[#allocation12 + $0x68] sm:$0xff] }
 0x60a   :  { %v944_v20 = vsel %vm943_vm11, %v942_v19, %v926_v18 }
 0x60b   :  { %v946_v21 = vsel %vm945_vm12, %v942_v19, %v944_v20  ;;  %v3837_v20 = vld [vmem:[#allocation12 + $0x60] sm:$0xff] }
 0x60c   :  { %v948_v22 = vsel %vm947_vm13, %v942_v19, %v946_v21  ;;  %1177 = vmatpush.bf16.msra.mxu3 %v3838_v17 }
 0x60d   :  { %v950_v23 = vsel %vm949_vm14, %v942_v19, %v948_v22 }
 0x60e   :  { %953 = vst.msk [vmem:[#allocation2] sm:$0x3] %vm952_vm15, %v950_v23 }
 0x610   :  { %1178 = vmatpush.bf16.msra.mxu3 %v3837_v20 }
 0x612   :  { %3373 = vmatmul.msk.bf16.gmra.mxu1 %vm590_vm3, %v4494_v57 }
 0x67f   :  { %v965_v27 = vpop.f32.mrf.mxu1 }
 0x687   :  { %v967_v28 = vpop.f32.mrf.mxu1 }
 0x688   :  { %v984_v29 = vpack.c.bf16 %v967_v28, %v965_v27  ;;  %v1041_v27 = vld [vmem:[#allocation14 + $0x2] sm:$0x1] }
 0x68a   :  { %3391 = vmatmul.msk.bf16.vlgmr.msra.gmra.mxu2 %vm272_vm2, %v984_v29 }
 0x68f   :  { %v970_v31 = vpop.f32.mrf.mxu1 }
 0x697   :  { %v972_v32 = vpop.f32.mrf.mxu1 }
 0x698   :  { %v985_v33 = vpack.c.bf16 %v972_v32, %v970_v31  ;;  %v4012_v32 = vld [vmem:[%s5005_s4 + $0x20] sm:$0xff]  }
 0x69a   :  { %3392 = vmatmul.msk.bf16.gmra.mxu2 %vm272_vm2, %v985_v33 }
 0x70d   :  { %v1030_v34 = vpop.f32.mrf.mxu2 }
 0x70e   :  { %v1031_v39 = vadd.f32 %v4055_v37, %v1030_v34  ;;  %v4056_v34 = vld [vmem:[#allocation15 + $0x2] ss:$0 sm:$0xff] }
 0x710   :  { %v1044_v42 = vsel %vm272_vm2, %v1031_v39, 0.0 }
 0x715   :  { %v1032_v36 = vpop.f32.mrf.mxu2 }
 0x716   :  { %v1033_v38 = vadd.f32 %v4055_v37, %v1032_v36 }
 0x718   :  { %v1045_v41 = vsel %vm272_vm2, %v1033_v38, 0.0 }
 0x719   :  { %v1046_v44 = vadd.f32 %v1045_v41, %v1044_v42 }
 0x71d   :  { %v1035_v35 = vpop.f32.mrf.mxu2 }
 0x71e   :  { %v1036_v40 = vadd.f32 %v4055_v37, %v1035_v35  ;;  %v3931_v35 = vunpack.c.l.bf16 %v4012_v32 }
 0x720   :  { %v1047_v43 = vsel %vm272_vm2, %v1036_v40, 0.0 }
 0x721   :  { %v1048_v47 = vadd.f32 %v1047_v43, %v1046_v44 }
 0x725   :  { %v1037_v45 = vpop.f32.mrf.mxu2 }
 0x726   :  { %v1038_v46 = vadd.f32 %v4055_v37, %v1037_v45 }
 0x728   :  { %v1049_v48 = vsel %vm272_vm2, %v1038_v46, 0.0 }
 0x729   :  { %v1050_v49 = vadd.f32 %v1049_v48, %v1048_v47  ;;  %v4013_v47 = vld [vmem:[%s5005_s4 + $0x28] sm:$0xff]  }
 0x72b   :  { %v1051_v50 = vrot.slane %v1050_v49, 4 }
 0x72d   :  { %v1052_v51 = vadd.f32 %v1051_v50, %v1050_v49  ;;  %v3935_v50 = vunpack.c.l.bf16 %v4013_v47 }
 0x72f   :  { %v1053_v52 = vrot.slane %v1052_v51, 2 }
 0x731   :  { %v1054_v53 = vadd.f32 %v1053_v52, %v1052_v51 }
 0x733   :  { %v1055_v54 = vrot.slane %v1054_v53, 1 }
 0x735   :  { %v1056_v55 = vadd.f32 %v1055_v54, %v1054_v53  ;;  %v3936_v54 = vunpack.c.h.bf16 %v4013_v47 }
 0x737   :  { %v1057_v58 = vmul.f32 %v1056_v55, %v4507_v30 }
 0x739   :  { %v1058_v59 = vsub.f32 %v1031_v39, %v1057_v58  ;;  %v1059_v60 = vsub.f32 %v1033_v38, %v1057_v58  ;;  %v1060_v61 = vsub.f32 %v1036_v40, %v1057_v58  ;;  %v1061_v62 = vsub.f32 %v1038_v46, %v1057_v58 }
 0x73a   :  { %v3932_v38 = vunpack.c.h.bf16 %v4012_v32 }
 0x73b   :  { %v1062_v63 = vmul.f32 %v1058_v59, %v1058_v59  ;;  %v1063_v0 = vmul.f32 %v1059_v60, %v1059_v60  ;;  %v1064_v1 = vmul.f32 %v1060_v61, %v1060_v61  ;;  %v1065_v2 = vmul.f32 %v1061_v62, %v1061_v62 }
 0x73d   :  { %v1066_v3 = vsel %vm272_vm2, %v1062_v63, 0.0  ;;  %v1067_v4 = vsel %vm272_vm2, %v1063_v0, 0.0  ;;  %v1069_v6 = vsel %vm272_vm2, %v1064_v1, 0.0  ;;  %v1071_v8 = vsel %vm272_vm2, %v1065_v2, 0.0  ;;  %v4057_v2 = vld [vmem:[%s4988_s9 + $0x3] ss:$0 sm:$0xff] }
 0x73e   :  { %v1068_v5 = vadd.f32 %v1067_v4, %v1066_v3 }
 0x740   :  { %v1070_v7 = vadd.f32 %v1069_v6, %v1068_v5 }
 0x742   :  { %v1072_v9 = vadd.f32 %v1071_v8, %v1070_v7 }
 0x744   :  { %v1073_v10 = vrot.slane %v1072_v9, 4 }
 0x746   :  { %v1074_v11 = vadd.f32 %v1073_v10, %v1072_v9 }
 0x748   :  { %v1075_v13 = vrot.slane %v1074_v11, 2 }
 0x74a   :  { %v1076_v14 = vadd.f32 %v1075_v13, %v1074_v11 }
 0x74c   :  { %v1077_v16 = vrot.slane %v1076_v14, 1 }
 0x74e   :  { %v1078_v18 = vadd.f32 %v1077_v16, %v1076_v14 }
 0x750   :  { %v1079_v19 = vmul.f32 %v1078_v18, %v4507_v30 }
 0x752   :  { %v1080_v21 = vadd.f32 1e-05, %v1079_v19 }
 0x754   :  { %4088 = vrsqrt.f32 %v1080_v21  ;;  %vm1087_vm1 = vweird.f32 %v1080_v21 }
 0x75a   :  { %v4089_v22 = vpop.eup %4088 }
 0x75b   :  { %v1082_v23 = vmul.f32 %v4089_v22, %v1080_v21  ;;  %vm1088_vm0 = vweird.f32 %v4089_v22 }
 0x75c   :  { %vm1089_vm4 = vmor %vm1087_vm1, %vm1088_vm0 }
 0x75d   :  { %v1083_v24 = vmul.f32 %v4089_v22, %v1082_v23 }
 0x75f   :  { %v1084_v25 = vmul.f32 0.5, %v1083_v24 }
 0x761   :  { %v1085_v26 = vsub.f32 1.5, %v1084_v25 }
 0x763   :  { %v1086_v28 = vmul.f32 %v4089_v22, %v1085_v26 }
 0x765   :  { %v1090_v29 = vsel %vm1089_vm4, %v4089_v22, %v1086_v28 }
 0x766   :  { %v1091_v31 = vmul.f32 %v1090_v29, %v1041_v27 }
 0x768   :  { %v1092_v33 = vperm.slane %v1091_v31, 0 }
 0x76a   :  { %v1093_v36 = vmul.f32 %v1092_v33, %v1058_v59  ;;  %v1094_v37 = vmul.f32 %v1092_v33, %v1059_v60  ;;  %v1096_v43 = vmul.f32 %v1092_v33, %v1061_v62  ;;  %v1095_v46 = vmul.f32 %v1092_v33, %v1060_v61 }
 0x76c   :  { %v1100_v39 = vadd.f32 %v4056_v34, %v1093_v36  ;;  %v1101_v40 = vadd.f32 %v4056_v34, %v1094_v37  ;;  %v1103_v51 = vadd.f32 %v4056_v34, %v1096_v43  ;;  %v1102_v53 = vadd.f32 %v4056_v34, %v1095_v46 }
 0x76e   :  { %v1113_v41 = vmul.f32 %v3931_v35, %v1100_v39  ;;  %v1114_v42 = vmul.f32 %v3932_v38, %v1101_v40  ;;  %v1115_v55 = vmul.f32 %v3935_v50, %v1102_v53  ;;  %v1116_v58 = vmul.f32 %v3936_v54, %v1103_v51 }
 0x770   :  { %v1117_v44 = vmul.f32 1.1111112, %v1113_v41  ;;  %v1118_v45 = vmul.f32 1.1111112, %v1114_v42  ;;  %v1119_v59 = vmul.f32 1.1111112, %v1115_v55 }
 0x771   :  { %v1120_v60 = vmul.f32 1.1111112, %v1116_v58  ;;  %v4015_v58 = vld [vmem:[%s5005_s4 + $0x38] sm:$0xff]  }
 0x772   :  { %v1121_v48 = vmax.f32 %v1117_v44, 0.0  ;;  %v1122_v49 = vmax.f32 %v1118_v45, 0.0  ;;  %v1123_v62 = vmax.f32 %v1119_v59, 0.0  ;;  %v4014_v59 = vld [vmem:[%s5005_s4 + $0x30] sm:$0xff]  }
 0x773   :  { %v1124_v63 = vmax.f32 %v1120_v60, 0.0 }
 0x774   :  { %v1134_v52 = vpack.c.bf16 %v1122_v49, %v1121_v48 }
 0x775   :  { %v1135_v61 = vpack.c.bf16 %v1124_v63, %v1123_v62  ;;  %v4058_v62 = vld [vmem:[#allocation15 + $0x3] ss:$0 sm:$0xff]  ;;  %v3944_v63 = vunpack.c.h.bf16 %v4015_v58 }
 0x776   :  { %3414 = vmatmul.msk.bf16.vlgmr.msra.gmra.mxu3 %vm272_vm2, %v1134_v52  ;;  %v1191_v52 = vld [vmem:[#allocation14 + $0x3] sm:$0x1] }
 0x786   :  { %3415 = vmatmul.msk.bf16.gmra.mxu3 %vm272_vm2, %v1135_v61  ;;  %v3943_v61 = vunpack.c.l.bf16 %v4015_v58 }
 0x7f9   :  { %v1180_v0 = vpop.f32.mrf.mxu3 }
 0x7fa   :  { %v1181_v5 = vadd.f32 %v4057_v2, %v1180_v0  ;;  %v3939_v0 = vunpack.c.l.bf16 %v4014_v59 }
 0x7fc   :  { %v1194_v8 = vsel %vm272_vm2, %v1181_v5, 0.0 }
 0x801   :  { %v1182_v1 = vpop.f32.mrf.mxu3 }
 0x802   :  { %v1183_v4 = vadd.f32 %v4057_v2, %v1182_v1  ;;  %v3940_v1 = vunpack.c.h.bf16 %v4014_v59 }
 0x804   :  { %v1195_v7 = vsel %vm272_vm2, %v1183_v4, 0.0 }
 0x805   :  { %v1196_v10 = vadd.f32 %v1195_v7, %v1194_v8 }
 0x809   :  { %v1185_v3 = vpop.f32.mrf.mxu3 }
 0x80a   :  { %v1186_v6 = vadd.f32 %v4057_v2, %v1185_v3 }
 0x80c   :  { %v1197_v9 = vsel %vm272_vm2, %v1186_v6, 0.0 }
 0x80d   :  { %v1198_v13 = vadd.f32 %v1197_v9, %v1196_v10  ;;  %v3844_v10 = vld [vmem:[#allocation12 + $0x98] sm:$0xff] }
 0x80e   :  { %1378 = vmatpush.bf16.msrb.mxu1 %v3844_v10 }
 0x811   :  { %v1187_v11 = vpop.f32.mrf.mxu3 }
 0x812   :  { %v1188_v12 = vadd.f32 %v4057_v2, %v1187_v11 }
 0x814   :  { %v1199_v14 = vsel %vm272_vm2, %v1188_v12, 0.0 }
 0x815   :  { %v1200_v15 = vadd.f32 %v1199_v14, %v1198_v13 }
 0x817   :  { %v1201_v16 = vrot.slane %v1200_v15, 4 }
 0x819   :  { %v1202_v17 = vadd.f32 %v1201_v16, %v1200_v15 }
 0x81b   :  { %v1203_v18 = vrot.slane %v1202_v17, 2 }
 0x81d   :  { %v1204_v19 = vadd.f32 %v1203_v18, %v1202_v17 }
 0x81f   :  { %v1205_v20 = vrot.slane %v1204_v19, 1 }
 0x821   :  { %v1206_v21 = vadd.f32 %v1205_v20, %v1204_v19 }
 0x823   :  { %v1207_v22 = vmul.f32 %v1206_v21, %v4507_v30 }
 0x825   :  { %v1208_v23 = vsub.f32 %v1181_v5, %v1207_v22  ;;  %v1209_v24 = vsub.f32 %v1183_v4, %v1207_v22  ;;  %v1210_v25 = vsub.f32 %v1186_v6, %v1207_v22  ;;  %v1211_v26 = vsub.f32 %v1188_v12, %v1207_v22 }
 0x827   :  { %v1212_v27 = vmul.f32 %v1208_v23, %v1208_v23  ;;  %v1213_v28 = vmul.f32 %v1209_v24, %v1209_v24  ;;  %v1214_v29 = vmul.f32 %v1210_v25, %v1210_v25  ;;  %v1215_v31 = vmul.f32 %v1211_v26, %v1211_v26 }
 0x829   :  { %v1216_v32 = vsel %vm272_vm2, %v1212_v27, 0.0  ;;  %v1217_v33 = vsel %vm272_vm2, %v1213_v28, 0.0  ;;  %v1219_v36 = vsel %vm272_vm2, %v1214_v29, 0.0  ;;  %v1221_v35 = vsel %vm272_vm2, %v1215_v31, 0.0 }
 0x82a   :  { %v1218_v34 = vadd.f32 %v1217_v33, %v1216_v32 }
 0x82c   :  { %v1220_v37 = vadd.f32 %v1219_v36, %v1218_v34 }
 0x82e   :  { %v1222_v38 = vadd.f32 %v1221_v35, %v1220_v37 }
 0x830   :  { %v1223_v39 = vrot.slane %v1222_v38, 4 }
 0x832   :  { %v1224_v40 = vadd.f32 %v1223_v39, %v1222_v38 }
 0x834   :  { %v1225_v41 = vrot.slane %v1224_v40, 2 }
 0x836   :  { %v1226_v42 = vadd.f32 %v1225_v41, %v1224_v40 }
 0x838   :  { %v1227_v43 = vrot.slane %v1226_v42, 1 }
 0x83a   :  { %v1228_v44 = vadd.f32 %v1227_v43, %v1226_v42 }
 0x83c   :  { %v1229_v45 = vmul.f32 %v1228_v44, %v4507_v30 }
 0x83e   :  { %v1230_v46 = vadd.f32 1e-05, %v1229_v45 }
 0x840   :  { %4090 = vrsqrt.f32 %v1230_v46  ;;  %vm1237_vm6 = vweird.f32 %v1230_v46 }
 0x846   :  { %v4091_v47 = vpop.eup %4090 }
 0x847   :  { %v1232_v48 = vmul.f32 %v4091_v47, %v1230_v46  ;;  %vm1238_vm5 = vweird.f32 %v4091_v47 }
 0x848   :  { %vm1239_vm7 = vmor %vm1237_vm6, %vm1238_vm5 }
 0x849   :  { %v1233_v49 = vmul.f32 %v4091_v47, %v1232_v48 }
 0x84b   :  { %v1234_v50 = vmul.f32 0.5, %v1233_v49  ;;  %v3842_v49 = vld [vmem:[#allocation12 + $0x88] sm:$0xff] }
 0x84d   :  { %v1235_v51 = vsub.f32 1.5, %v1234_v50  ;;  %v3841_v50 = vld [vmem:[#allocation12 + $0x80] sm:$0xff] }
 0x84f   :  { %v1236_v53 = vmul.f32 %v4091_v47, %v1235_v51 }
 0x851   :  { %v1240_v54 = vsel %vm1239_vm7, %v4091_v47, %v1236_v53 }
 0x852   :  { %v1241_v55 = vmul.f32 %v1240_v54, %v1191_v52 }
 0x854   :  { %v1242_v60 = vperm.slane %v1241_v55, 0 }
 0x856   :  { %v1246_v2 = vmul.f32 %v1242_v60, %v1211_v26  ;;  %v1245_v3 = vmul.f32 %v1242_v60, %v1210_v25  ;;  %v1243_v4 = vmul.f32 %v1242_v60, %v1208_v23  ;;  %v1244_v5 = vmul.f32 %v1242_v60, %v1209_v24 }
 0x858   :  { %v1253_v6 = vadd.f32 %v4058_v62, %v1246_v2  ;;  %v1252_v7 = vadd.f32 %v4058_v62, %v1245_v3  ;;  %v1250_v8 = vadd.f32 %v4058_v62, %v1243_v4  ;;  %v1251_v9 = vadd.f32 %v4058_v62, %v1244_v5  ;;  %v4059_v62 = vld [vmem:[%s4988_s9 + $0x4] ss:$0 sm:$0xff] }
 0x85a   :  { %v1266_v11 = vmul.f32 %v3944_v63, %v1253_v6  ;;  %v1265_v12 = vmul.f32 %v3943_v61, %v1252_v7  ;;  %v1263_v13 = vmul.f32 %v3939_v0, %v1250_v8  ;;  %v1264_v14 = vmul.f32 %v3940_v1, %v1251_v9 }
 0x85c   :  { %v1270_v15 = vmul.f32 1.1111112, %v1266_v11  ;;  %v1269_v16 = vmul.f32 1.1111112, %v1265_v12  ;;  %v1267_v17 = vmul.f32 1.1111112, %v1263_v13 }
 0x85d   :  { %v1268_v18 = vmul.f32 1.1111112, %v1264_v14 }
 0x85e   :  { %v1273_v19 = vmax.f32 %v1269_v16, 0.0  ;;  %v1274_v20 = vmax.f32 %v1270_v15, 0.0  ;;  %v1271_v21 = vmax.f32 %v1267_v17, 0.0 }
 0x85f   :  { %v1272_v22 = vmax.f32 %v1268_v18, 0.0 }
 0x860   :  { %v1284_v23 = vsel %vm272_vm2, %v1273_v19, 0.0  ;;  %v1285_v24 = vsel %vm272_vm2, %v1274_v20, 0.0  ;;  %v1308_v25 = vpack.c.bf16 %v1274_v20, %v1273_v19  ;;  %v1275_v26 = vsel %vm272_vm2, %v1271_v21, 0.0 }
 0x861   :  { %v1286_v27 = vadd.f32 %v1285_v24, %v1284_v23  ;;  %v1276_v28 = vsel %vm272_vm2, %v1272_v22, 0.0  ;;  %v1307_v33 = vpack.c.bf16 %v1272_v22, %v1271_v21 }
 0x862   :  { %1315 = vmatpush.bf16.msrb.mxu0 %v1308_v25  ;;  %v1277_v29 = vadd.f32 %v1276_v28, %v1275_v26 }
 0x863   :  { %v1287_v31 = vrot.slane %v1286_v27, 4 }
 0x864   :  { %v1278_v32 = vrot.slane %v1277_v29, 4 }
 0x865   :  { %v1288_v34 = vadd.f32 %v1287_v31, %v1286_v27 }
 0x866   :  { %v1279_v36 = vadd.f32 %v1278_v32, %v1277_v29  ;;  %1316 = vmatpush.bf16.msrb.mxu0 %v1307_v33 }
 0x867   :  { %v1289_v37 = vrot.slane %v1288_v34, 2 }
 0x868   :  { %v1280_v35 = vrot.slane %v1279_v36, 2 }
 0x869   :  { %3420 = vmatmul.msk.bf16.vlgmr.msrb.gmra.mxu0 %vm590_vm3, %v4490_v56  ;;  %v1290_v38 = vadd.f32 %v1289_v37, %v1288_v34  ;;  %v3843_v56 = vld [vmem:[#allocation12 + $0x90] sm:$0xff]  ;;  %v3848_v37 = vld [vmem:[#allocation12 + $0xb8] sm:$0xff] }
 0x86a   :  { %v1281_v39 = vadd.f32 %v1280_v35, %v1279_v36  ;;  %1379 = vmatpush.bf16.msrb.mxu1 %v3843_v56  ;;  %1528 = vmatpush.bf16.msrb.mxu2 %v3848_v37 }
 0x86b   :  { %v1291_v40 = vrot.slane %v1290_v38, 1 }
 0x86c   :  { %v1282_v41 = vrot.slane %v1281_v39, 1 }
 0x86d   :  { %v1292_v42 = vadd.f32 %v1291_v40, %v1290_v38 }
 0x86e   :  { %v1283_v43 = vadd.f32 %v1282_v41, %v1281_v39  ;;  %1380 = vmatpush.bf16.msrb.mxu1 %v3842_v49  ;;  %v3847_v39 = vld [vmem:[#allocation12 + $0xb0] sm:$0xff]  ;;  %v3846_v41 = vld [vmem:[#allocation12 + $0xa8] sm:$0xff] }
 0x86f   :  { %v1297_v44 = vrot.slane %v1292_v42, 7  ;;  %1529 = vmatpush.bf16.msrb.mxu2 %v3847_v39 }
 0x871   :  { %v1298_v45 = vsel %vm943_vm11, %v1297_v44, %v1283_v43 }
 0x872   :  { %v1299_v46 = vsel %vm945_vm12, %v1297_v44, %v1298_v45  ;;  %1381 = vmatpush.bf16.msrb.mxu1 %v3841_v50  ;;  %v1394_v50 = vld [vmem:[#allocation14 + $0x4] sm:$0x1] }
 0x873   :  { %v1300_v47 = vsel %vm947_vm13, %v1297_v44, %v1299_v46  ;;  %1530 = vmatpush.bf16.msrb.mxu2 %v3846_v41 }
 0x874   :  { %v1301_v48 = vsel %vm949_vm14, %v1297_v44, %v1300_v47  ;;  %v3845_v44 = vld [vmem:[#allocation12 + $0xa0] sm:$0xff] }
 0x875   :  { %1302 = vrot.lane.b32.xlu0 %v1301_v48, %s4316_s27 }
 0x877   :  { %1531 = vmatpush.bf16.msrb.mxu2 %v3845_v44 }
 0x879   :  { %3421 = vmatmul.msk.bf16.gmra.mxu0 %vm590_vm3, %v4494_v57 }
 0x8e6   :  { %v1318_v51 = vpop.f32.mrf.mxu0 }
 0x8e7   :  { %v1303_v52 = vpop.permute.xlu0 %1302 }
 0x8e8   :  { %1306 = vst.msk [vmem:[#allocation2] sm:$0x3] %vm1305_vm8, %v1303_v52 }
 0x8ee   :  { %v1320_v53 = vpop.f32.mrf.mxu0 }
 0x8ef   :  { %v1337_v54 = vpack.c.bf16 %v1320_v53, %v1318_v51 }
 0x8f1   :  { %3439 = vmatmul.msk.bf16.vlgmr.msrb.gmra.mxu1 %vm272_vm2, %v1337_v54  ;;  %v4016_v54 = vld [vmem:[%s5005_s4 + $0x40] sm:$0xff]  }
 0x8f6   :  { %v1323_v55 = vpop.f32.mrf.mxu0 }
 0x8fe   :  { %v1325_v58 = vpop.f32.mrf.mxu0 }
 0x8ff   :  { %v1338_v59 = vpack.c.bf16 %v1325_v58, %v1323_v55  ;;  %v4060_v58 = vld [vmem:[#allocation15 + $0x4] ss:$0 sm:$0xff] }
 0x901   :  { %3440 = vmatmul.msk.bf16.gmra.mxu1 %vm272_vm2, %v1338_v59 }
 0x96e   :  { %v1383_v57 = vpop.f32.mrf.mxu1 }
 0x96f   :  { %v1384_v0 = vadd.f32 %v4059_v62, %v1383_v57 }
 0x971   :  { %v1397_v3 = vsel %vm272_vm2, %v1384_v0, 0.0 }
 0x976   :  { %v1385_v60 = vpop.f32.mrf.mxu1 }
 0x977   :  { %v1386_v61 = vadd.f32 %v4059_v62, %v1385_v60  ;;  %v3947_v60 = vunpack.c.l.bf16 %v4016_v54 }
 0x979   :  { %v1398_v2 = vsel %vm272_vm2, %v1386_v61, 0.0 }
 0x97a   :  { %v1399_v5 = vadd.f32 %v1398_v2, %v1397_v3 }
 0x97e   :  { %v1388_v63 = vpop.f32.mrf.mxu1 }
 0x97f   :  { %v1389_v1 = vadd.f32 %v4059_v62, %v1388_v63 }
 0x981   :  { %v1400_v4 = vsel %vm272_vm2, %v1389_v1, 0.0 }
 0x982   :  { %v1401_v8 = vadd.f32 %v1400_v4, %v1399_v5 }
 0x986   :  { %v1390_v6 = vpop.f32.mrf.mxu1 }
 0x987   :  { %v1391_v7 = vadd.f32 %v4059_v62, %v1390_v6  ;;  %v3948_v62 = vunpack.c.h.bf16 %v4016_v54  ;;  %v4017_v6 = vld [vmem:[%s5005_s4 + $0x48] sm:$0xff]  }
 0x989   :  { %v1402_v9 = vsel %vm272_vm2, %v1391_v7, 0.0 }
 0x98a   :  { %v1403_v10 = vadd.f32 %v1402_v9, %v1401_v8  ;;  %v3951_v9 = vunpack.c.l.bf16 %v4017_v6 }
 0x98c   :  { %v1404_v11 = vrot.slane %v1403_v10, 4 }
 0x98e   :  { %v1405_v12 = vadd.f32 %v1404_v11, %v1403_v10 }
 0x990   :  { %v1406_v13 = vrot.slane %v1405_v12, 2 }
 0x992   :  { %v1407_v14 = vadd.f32 %v1406_v13, %v1405_v12  ;;  %v3952_v13 = vunpack.c.h.bf16 %v4017_v6 }
 0x994   :  { %v1408_v15 = vrot.slane %v1407_v14, 1 }
 0x996   :  { %v1409_v16 = vadd.f32 %v1408_v15, %v1407_v14 }
 0x998   :  { %v1410_v17 = vmul.f32 %v1409_v16, %v4507_v30 }
 0x99a   :  { %v1411_v18 = vsub.f32 %v1384_v0, %v1410_v17  ;;  %v1412_v19 = vsub.f32 %v1386_v61, %v1410_v17  ;;  %v1413_v20 = vsub.f32 %v1389_v1, %v1410_v17  ;;  %v1414_v21 = vsub.f32 %v1391_v7, %v1410_v17 }
 0x99c   :  { %v1415_v22 = vmul.f32 %v1411_v18, %v1411_v18  ;;  %v1416_v23 = vmul.f32 %v1412_v19, %v1412_v19  ;;  %v1417_v24 = vmul.f32 %v1413_v20, %v1413_v20  ;;  %v1418_v25 = vmul.f32 %v1414_v21, %v1414_v21 }
 0x99e   :  { %v1419_v26 = vsel %vm272_vm2, %v1415_v22, 0.0  ;;  %v1420_v27 = vsel %vm272_vm2, %v1416_v23, 0.0  ;;  %v1422_v29 = vsel %vm272_vm2, %v1417_v24, 0.0  ;;  %v1424_v32 = vsel %vm272_vm2, %v1418_v25, 0.0  ;;  %v4061_v23 = vld [vmem:[%s4988_s9 + $0x5] ss:$0 sm:$0xff] }
 0x99f   :  { %v1421_v28 = vadd.f32 %v1420_v27, %v1419_v26 }
 0x9a1   :  { %v1423_v31 = vadd.f32 %v1422_v29, %v1421_v28 }
 0x9a3   :  { %v1425_v33 = vadd.f32 %v1424_v32, %v1423_v31 }
 0x9a5   :  { %v1426_v34 = vrot.slane %v1425_v33, 4 }
 0x9a7   :  { %v1427_v36 = vadd.f32 %v1426_v34, %v1425_v33 }
 0x9a9   :  { %v1428_v35 = vrot.slane %v1427_v36, 2 }
 0x9ab   :  { %v1429_v38 = vadd.f32 %v1428_v35, %v1427_v36 }
 0x9ad   :  { %v1430_v40 = vrot.slane %v1429_v38, 1 }
 0x9af   :  { %v1431_v42 = vadd.f32 %v1430_v40, %v1429_v38 }
 0x9b1   :  { %v1432_v43 = vmul.f32 %v1431_v42, %v4507_v30 }
 0x9b3   :  { %v1433_v45 = vadd.f32 1e-05, %v1432_v43 }
 0x9b5   :  { %4092 = vrsqrt.f32 %v1433_v45  ;;  %vm1440_vm10 = vweird.f32 %v1433_v45 }
 0x9bb   :  { %v4093_v46 = vpop.eup %4092 }
 0x9bc   :  { %v1435_v47 = vmul.f32 %v4093_v46, %v1433_v45  ;;  %vm1441_vm9 = vweird.f32 %v4093_v46 }
 0x9bd   :  { %vm1442_vm0 = vmor %vm1440_vm10, %vm1441_vm9 }
 0x9be   :  { %v1436_v48 = vmul.f32 %v4093_v46, %v1435_v47 }
 0x9c0   :  { %v1437_v56 = vmul.f32 0.5, %v1436_v48 }
 0x9c2   :  { %v1438_v49 = vsub.f32 1.5, %v1437_v56 }
 0x9c4   :  { %v1439_v51 = vmul.f32 %v4093_v46, %v1438_v49 }
 0x9c6   :  { %v1443_v52 = vsel %vm1442_vm0, %v4093_v46, %v1439_v51 }
 0x9c7   :  { %v1444_v53 = vmul.f32 %v1443_v52, %v1394_v50 }
 0x9c9   :  { %v1445_v55 = vperm.slane %v1444_v53, 0 }
 0x9cb   :  { %v1446_v59 = vmul.f32 %v1445_v55, %v1411_v18  ;;  %v1447_v57 = vmul.f32 %v1445_v55, %v1412_v19  ;;  %v1449_v2 = vmul.f32 %v1445_v55, %v1414_v21  ;;  %v1448_v5 = vmul.f32 %v1445_v55, %v1413_v20 }
 0x9cd   :  { %v1453_v63 = vadd.f32 %v4060_v58, %v1446_v59  ;;  %v1454_v61 = vadd.f32 %v4060_v58, %v1447_v57  ;;  %v1456_v10 = vadd.f32 %v4060_v58, %v1449_v2  ;;  %v1455_v12 = vadd.f32 %v4060_v58, %v1448_v5 }
 0x9cf   :  { %v1466_v0 = vmul.f32 %v3947_v60, %v1453_v63  ;;  %v1467_v1 = vmul.f32 %v3948_v62, %v1454_v61  ;;  %v1468_v14 = vmul.f32 %v3951_v9, %v1455_v12  ;;  %v1469_v15 = vmul.f32 %v3952_v13, %v1456_v10  ;;  %v1544_v9 = vld [vmem:[#allocation14 + $0x5] sm:$0x1]  ;;  %v4019_v13 = vld [vmem:[%s5005_s4 + $0x58] sm:$0xff]  }
 0x9d1   :  { %v1470_v3 = vmul.f32 1.1111112, %v1466_v0  ;;  %v1471_v4 = vmul.f32 1.1111112, %v1467_v1  ;;  %v1472_v16 = vmul.f32 1.1111112, %v1468_v14 }
 0x9d2   :  { %v1473_v17 = vmul.f32 1.1111112, %v1469_v15  ;;  %v4018_v14 = vld [vmem:[%s5005_s4 + $0x50] sm:$0xff]  }
 0x9d3   :  { %v1474_v7 = vmax.f32 %v1470_v3, 0.0  ;;  %v1475_v8 = vmax.f32 %v1471_v4, 0.0  ;;  %v1476_v18 = vmax.f32 %v1472_v16, 0.0  ;;  %v4062_v16 = vld [vmem:[#allocation15 + $0x5] ss:$0 sm:$0xff] }
 0x9d4   :  { %v1477_v19 = vmax.f32 %v1473_v17, 0.0  ;;  %v3960_v17 = vunpack.c.h.bf16 %v4019_v13 }
 0x9d5   :  { %v1487_v11 = vpack.c.bf16 %v1475_v8, %v1474_v7 }
 0x9d6   :  { %v1488_v20 = vpack.c.bf16 %v1477_v19, %v1476_v18  ;;  %v3959_v18 = vunpack.c.l.bf16 %v4019_v13  ;;  %v3955_v19 = vunpack.c.l.bf16 %v4018_v14 }
 0x9d7   :  { %3462 = vmatmul.msk.bf16.vlgmr.msrb.gmra.mxu2 %vm272_vm2, %v1487_v11 }
 0x9e7   :  { %3463 = vmatmul.msk.bf16.gmra.mxu2 %vm272_vm2, %v1488_v20  ;;  %v3956_v20 = vunpack.c.h.bf16 %v4018_v14 }
 0xa5a   :  { %v1533_v21 = vpop.f32.mrf.mxu2 }
 0xa5b   :  { %v1534_v26 = vadd.f32 %v4061_v23, %v1533_v21 }
 0xa5d   :  { %v1547_v29 = vsel %vm272_vm2, %v1534_v26, 0.0 }
 0xa62   :  { %v1535_v22 = vpop.f32.mrf.mxu2 }
 0xa63   :  { %v1536_v25 = vadd.f32 %v4061_v23, %v1535_v22 }
 0xa65   :  { %v1548_v28 = vsel %vm272_vm2, %v1536_v25, 0.0 }
 0xa66   :  { %v1549_v32 = vadd.f32 %v1548_v28, %v1547_v29  ;;  %v3852_v29 = vld [vmem:[#allocation12 + $0xd8] sm:$0xff] }
 0xa67   :  { %1728 = vmatpush.bf16.msra.mxu0 %v3852_v29 }
 0xa6a   :  { %v1538_v24 = vpop.f32.mrf.mxu2 }
 0xa6b   :  { %v1539_v27 = vadd.f32 %v4061_v23, %v1538_v24 }
 0xa6d   :  { %v1550_v31 = vsel %vm272_vm2, %v1539_v27, 0.0 }
 0xa6e   :  { %v1551_v36 = vadd.f32 %v1550_v31, %v1549_v32 }
 0xa72   :  { %v1540_v33 = vpop.f32.mrf.mxu2 }
 0xa73   :  { %v1541_v34 = vadd.f32 %v4061_v23, %v1540_v33 }
 0xa75   :  { %v1552_v37 = vsel %vm272_vm2, %v1541_v34, 0.0 }
 0xa76   :  { %v1553_v35 = vadd.f32 %v1552_v37, %v1551_v36 }
 0xa78   :  { %v1554_v38 = vrot.slane %v1553_v35, 4 }
 0xa7a   :  { %v1555_v39 = vadd.f32 %v1554_v38, %v1553_v35 }
 0xa7c   :  { %v1556_v40 = vrot.slane %v1555_v39, 2 }
 0xa7e   :  { %v1557_v41 = vadd.f32 %v1556_v40, %v1555_v39 }
 0xa80   :  { %v1558_v42 = vrot.slane %v1557_v41, 1 }
 0xa82   :  { %v1559_v43 = vadd.f32 %v1558_v42, %v1557_v41 }
 0xa84   :  { %v1560_v44 = vmul.f32 %v1559_v43, %v4507_v30 }
 0xa86   :  { %v1561_v45 = vsub.f32 %v1534_v26, %v1560_v44  ;;  %v1562_v46 = vsub.f32 %v1536_v25, %v1560_v44  ;;  %v1563_v47 = vsub.f32 %v1539_v27, %v1560_v44  ;;  %v1564_v48 = vsub.f32 %v1541_v34, %v1560_v44 }
 0xa88   :  { %v1565_v56 = vmul.f32 %v1561_v45, %v1561_v45  ;;  %v1566_v49 = vmul.f32 %v1562_v46, %v1562_v46  ;;  %v1567_v50 = vmul.f32 %v1563_v47, %v1563_v47  ;;  %v1568_v51 = vmul.f32 %v1564_v48, %v1564_v48 }
 0xa8a   :  { %v1569_v52 = vsel %vm272_vm2, %v1565_v56, 0.0  ;;  %v1570_v53 = vsel %vm272_vm2, %v1566_v49, 0.0  ;;  %v1572_v55 = vsel %vm272_vm2, %v1567_v50, 0.0  ;;  %v1574_v59 = vsel %vm272_vm2, %v1568_v51, 0.0 }
 0xa8b   :  { %v1571_v54 = vadd.f32 %v1570_v53, %v1569_v52 }
 0xa8d   :  { %v1573_v58 = vadd.f32 %v1572_v55, %v1571_v54 }
 0xa8f   :  { %v1575_v57 = vadd.f32 %v1574_v59, %v1573_v58  ;;  %v4657_v59 = vld [vmem:[#allocation4] sm:$0xff] }
 0xa91   :  { %v1576_v60 = vrot.slane %v1575_v57, 4 }
 0xa93   :  { %v1577_v62 = vadd.f32 %v1576_v60, %v1575_v57 }
 0xa95   :  { %v1578_v63 = vrot.slane %v1577_v62, 2 }
 0xa97   :  { %v1579_v61 = vadd.f32 %v1578_v63, %v1577_v62 }
 0xa99   :  { %v1580_v0 = vrot.slane %v1579_v61, 1 }
 0xa9b   :  { %v1581_v1 = vadd.f32 %v1580_v0, %v1579_v61 }
 0xa9d   :  { %v1582_v2 = vmul.f32 %v1581_v1, %v4507_v30 }
 0xa9f   :  { %v1583_v3 = vadd.f32 1e-05, %v1582_v2 }
 0xaa1   :  { %4094 = vrsqrt.f32 %v1583_v3  ;;  %vm1590_vm4 = vweird.f32 %v1583_v3 }
 0xaa7   :  { %v4095_v4 = vpop.eup %4094 }
 0xaa8   :  { %v1585_v5 = vmul.f32 %v4095_v4, %v1583_v3  ;;  %vm1591_vm1 = vweird.f32 %v4095_v4 }
 0xaa9   :  { %vm1592_vm5 = vmor %vm1590_vm4, %vm1591_vm1 }
 0xaaa   :  { %v1586_v6 = vmul.f32 %v4095_v4, %v1585_v5  ;;  %v4666_v5 = vld [vmem:[#allocation4 + $0x8] sm:$0xff] }
 0xaac   :  { %v1587_v7 = vmul.f32 0.5, %v1586_v6  ;;  %v3851_v6 = vld [vmem:[#allocation12 + $0xd0] sm:$0xff] }
 0xaad   :  { %1729 = vmatpush.bf16.msra.mxu0 %v3851_v6 }
 0xaae   :  { %v1588_v8 = vsub.f32 1.5, %v1587_v7  ;;  %v3850_v7 = vld [vmem:[#allocation12 + $0xc8] sm:$0xff] }
 0xab0   :  { %v1589_v10 = vmul.f32 %v4095_v4, %v1588_v8  ;;  %v3849_v8 = vld [vmem:[#allocation12 + $0xc0] sm:$0xff] }
 0xab1   :  { %1730 = vmatpush.bf16.msra.mxu0 %v3850_v7 }
 0xab2   :  { %v1593_v11 = vsel %vm1592_vm5, %v4095_v4, %v1589_v10 }
 0xab3   :  { %v1594_v12 = vmul.f32 %v1593_v11, %v1544_v9 }
 0xab5   :  { %v1595_v15 = vperm.slane %v1594_v12, 0  ;;  %1731 = vmatpush.bf16.msra.mxu0 %v3849_v8 }
 0xab7   :  { %v1599_v21 = vmul.f32 %v1595_v15, %v1564_v48  ;;  %v1598_v22 = vmul.f32 %v1595_v15, %v1563_v47  ;;  %v1596_v23 = vmul.f32 %v1595_v15, %v1561_v45  ;;  %v1597_v24 = vmul.f32 %v1595_v15, %v1562_v46 }
 0xab9   :  { %v1606_v25 = vadd.f32 %v4062_v16, %v1599_v21  ;;  %v1605_v26 = vadd.f32 %v4062_v16, %v1598_v22  ;;  %v1603_v27 = vadd.f32 %v4062_v16, %v1596_v23  ;;  %v1604_v28 = vadd.f32 %v4062_v16, %v1597_v24 }
 0xabb   :  { %v1619_v31 = vmul.f32 %v3960_v17, %v1606_v25  ;;  %v1618_v32 = vmul.f32 %v3959_v18, %v1605_v26  ;;  %v1616_v33 = vmul.f32 %v3955_v19, %v1603_v27  ;;  %v1617_v34 = vmul.f32 %v3956_v20, %v1604_v28  ;;  %v4063_v17 = vld [vmem:[%s4988_s9 + $0x6] ss:$0 sm:$0xff] }
 0xabd   :  { %v1623_v36 = vmul.f32 1.1111112, %v1619_v31  ;;  %v1622_v37 = vmul.f32 1.1111112, %v1618_v32  ;;  %v1620_v35 = vmul.f32 1.1111112, %v1616_v33 }
 0xabe   :  { %v1621_v38 = vmul.f32 1.1111112, %v1617_v34 }
 0xabf   :  { %v1626_v39 = vmax.f32 %v1622_v37, 0.0  ;;  %v1627_v40 = vmax.f32 %v1623_v36, 0.0  ;;  %v1624_v41 = vmax.f32 %v1620_v35, 0.0 }
 0xac0   :  { %v1625_v42 = vmax.f32 %v1621_v38, 0.0 }
 0xac1   :  { %v1637_v43 = vsel %vm272_vm2, %v1626_v39, 0.0  ;;  %v1638_v44 = vsel %vm272_vm2, %v1627_v40, 0.0  ;;  %v1658_v45 = vpack.c.bf16 %v1627_v40, %v1626_v39  ;;  %v1628_v46 = vsel %vm272_vm2, %v1624_v41, 0.0 }
 0xac2   :  { %v1639_v47 = vadd.f32 %v1638_v44, %v1637_v43  ;;  %v1629_v48 = vsel %vm272_vm2, %v1625_v42, 0.0  ;;  %v1657_v51 = vpack.c.bf16 %v1625_v42, %v1624_v41 }
 0xac3   :  { %1665 = vmatpush.bf16.msrb.mxu3 %v1658_v45  ;;  %v1630_v56 = vadd.f32 %v1629_v48, %v1628_v46 }
 0xac4   :  { %v1640_v49 = vrot.slane %v1639_v47, 4 }
 0xac5   :  { %v1631_v50 = vrot.slane %v1630_v56, 4 }
 0xac6   :  { %v1641_v52 = vadd.f32 %v1640_v49, %v1639_v47 }
 0xac7   :  { %v1632_v53 = vadd.f32 %v1631_v50, %v1630_v56  ;;  %1666 = vmatpush.bf16.msrb.mxu3 %v1657_v51 }
 0xac8   :  { %v1642_v54 = vrot.slane %v1641_v52, 2 }
 0xac9   :  { %v1633_v55 = vrot.slane %v1632_v53, 2 }
 0xaca   :  { %v1643_v58 = vadd.f32 %v1642_v54, %v1641_v52  ;;  %3468 = vmatmul.msk.bf16.vlgmr.msrb.gmra.mxu3 %vm590_vm3, %v4657_v59 }
 0xacb   :  { %v1634_v57 = vadd.f32 %v1633_v55, %v1632_v53  ;;  %v3856_v55 = vld [vmem:[#allocation12 + $0xf8] sm:$0xff] }
 0xacc   :  { %v1644_v60 = vrot.slane %v1643_v58, 1  ;;  %1878 = vmatpush.bf16.msra.mxu1 %v3856_v55 }
 0xacd   :  { %v1635_v62 = vrot.slane %v1634_v57, 1 }
 0xace   :  { %v1645_v63 = vadd.f32 %v1644_v60, %v1643_v58  ;;  %v3855_v60 = vld [vmem:[#allocation12 + $0xf0] sm:$0xff] }
 0xacf   :  { %v1636_v61 = vadd.f32 %v1635_v62, %v1634_v57 }
 0xad0   :  { %v1650_v0 = vrot.slane %v1645_v63, 7  ;;  %1879 = vmatpush.bf16.msra.mxu1 %v3855_v60  ;;  %v3854_v63 = vld [vmem:[#allocation12 + $0xe8] sm:$0xff] }
 0xad2   :  { %v1651_v1 = vsel %vm943_vm11, %v1650_v0, %v1636_v61 }
 0xad3   :  { %v1652_v2 = vsel %vm945_vm12, %v1650_v0, %v1651_v1  ;;  %v3853_v1 = vld [vmem:[#allocation12 + $0xe0] sm:$0xff] }
 0xad4   :  { %v1653_v3 = vsel %vm947_vm13, %v1650_v0, %v1652_v2  ;;  %1880 = vmatpush.bf16.msra.mxu1 %v3854_v63 }
 0xad5   :  { %v1654_v4 = vsel %vm949_vm14, %v1650_v0, %v1653_v3 }
 0xad6   :  { %1656 = vst.msk [vmem:[#allocation2 + $0x2] sm:$0x3] %vm952_vm15, %v1654_v4 }
 0xad8   :  { %1881 = vmatpush.bf16.msra.mxu1 %v3853_v1 }
 0xada   :  { %3469 = vmatmul.msk.bf16.gmra.mxu3 %vm590_vm3, %v4666_v5 }
 0xb4d   :  { %v1668_v9 = vpop.f32.mrf.mxu3 }
 0xb55   :  { %v1670_v10 = vpop.f32.mrf.mxu3 }
 0xb56   :  { %v1687_v11 = vpack.c.bf16 %v1670_v10, %v1668_v9  ;;  %v1744_v9 = vld [vmem:[#allocation14 + $0x6] sm:$0x1] }
 0xb58   :  { %3487 = vmatmul.msk.bf16.vlgmr.msra.gmra.mxu0 %vm272_vm2, %v1687_v11 }
 0xb5d   :  { %v1673_v12 = vpop.f32.mrf.mxu3 }
 0xb65   :  { %v1675_v13 = vpop.f32.mrf.mxu3 }
 0xb66   :  { %v1688_v14 = vpack.c.bf16 %v1675_v13, %v1673_v12  ;;  %v4020_v13 = vld [vmem:[%s5005_s4 + $0x60] sm:$0xff]  }
 0xb68   :  { %3488 = vmatmul.msk.bf16.gmra.mxu0 %vm272_vm2, %v1688_v14 }
 0xbd5   :  { %v1733_v15 = vpop.f32.mrf.mxu0 }
 0xbd6   :  { %v1734_v20 = vadd.f32 %v4063_v17, %v1733_v15  ;;  %v4064_v15 = vld [vmem:[#allocation15 + $0x6] ss:$0 sm:$0xff] }
 0xbd8   :  { %v1747_v23 = vsel %vm272_vm2, %v1734_v20, 0.0 }
 0xbdd   :  { %v1735_v16 = vpop.f32.mrf.mxu0 }
 0xbde   :  { %v1736_v19 = vadd.f32 %v4063_v17, %v1735_v16 }
 0xbe0   :  { %v1748_v22 = vsel %vm272_vm2, %v1736_v19, 0.0 }
 0xbe1   :  { %v1749_v25 = vadd.f32 %v1748_v22, %v1747_v23 }
 0xbe5   :  { %v1738_v18 = vpop.f32.mrf.mxu0 }
 0xbe6   :  { %v1739_v21 = vadd.f32 %v4063_v17, %v1738_v18  ;;  %v3963_v18 = vunpack.c.l.bf16 %v4020_v13 }
 0xbe8   :  { %v1750_v24 = vsel %vm272_vm2, %v1739_v21, 0.0 }
 0xbe9   :  { %v1751_v28 = vadd.f32 %v1750_v24, %v1749_v25 }
 0xbed   :  { %v1740_v26 = vpop.f32.mrf.mxu0 }
 0xbee   :  { %v1741_v27 = vadd.f32 %v4063_v17, %v1740_v26 }
 0xbf0   :  { %v1752_v29 = vsel %vm272_vm2, %v1741_v27, 0.0 }
 0xbf1   :  { %v1753_v31 = vadd.f32 %v1752_v29, %v1751_v28  ;;  %v4021_v28 = vld [vmem:[%s5005_s4 + $0x68] sm:$0xff]  }
 0xbf3   :  { %v1754_v32 = vrot.slane %v1753_v31, 4 }
 0xbf5   :  { %v1755_v33 = vadd.f32 %v1754_v32, %v1753_v31  ;;  %v3967_v32 = vunpack.c.l.bf16 %v4021_v28 }
 0xbf7   :  { %v1756_v34 = vrot.slane %v1755_v33, 2 }
 0xbf9   :  { %v1757_v36 = vadd.f32 %v1756_v34, %v1755_v33 }
 0xbfb   :  { %v1758_v37 = vrot.slane %v1757_v36, 1 }
 0xbfd   :  { %v1759_v35 = vadd.f32 %v1758_v37, %v1757_v36  ;;  %v3968_v37 = vunpack.c.h.bf16 %v4021_v28 }
 0xbff   :  { %v1760_v38 = vmul.f32 %v1759_v35, %v4507_v30 }
 0xc01   :  { %v1761_v39 = vsub.f32 %v1734_v20, %v1760_v38  ;;  %v1762_v40 = vsub.f32 %v1736_v19, %v1760_v38  ;;  %v1763_v41 = vsub.f32 %v1739_v21, %v1760_v38  ;;  %v1764_v42 = vsub.f32 %v1741_v27, %v1760_v38 }
 0xc02   :  { %v3964_v19 = vunpack.c.h.bf16 %v4020_v13 }
 0xc03   :  { %v1765_v43 = vmul.f32 %v1761_v39, %v1761_v39  ;;  %v1766_v44 = vmul.f32 %v1762_v40, %v1762_v40  ;;  %v1767_v45 = vmul.f32 %v1763_v41, %v1763_v41  ;;  %v1768_v46 = vmul.f32 %v1764_v42, %v1764_v42 }
 0xc05   :  { %v1769_v47 = vsel %vm272_vm2, %v1765_v43, 0.0  ;;  %v1770_v48 = vsel %vm272_vm2, %v1766_v44, 0.0  ;;  %v1772_v49 = vsel %vm272_vm2, %v1767_v45, 0.0  ;;  %v1774_v51 = vsel %vm272_vm2, %v1768_v46, 0.0  ;;  %v4065_v46 = vld [vmem:[%s4988_s9 + $0x7] ss:$0 sm:$0xff] }
 0xc06   :  { %v1771_v56 = vadd.f32 %v1770_v48, %v1769_v47 }
 0xc08   :  { %v1773_v50 = vadd.f32 %v1772_v49, %v1771_v56 }
 0xc0a   :  { %v1775_v52 = vadd.f32 %v1774_v51, %v1773_v50 }
 0xc0c   :  { %v1776_v53 = vrot.slane %v1775_v52, 4 }
 0xc0e   :  { %v1777_v54 = vadd.f32 %v1776_v53, %v1775_v52 }
 0xc10   :  { %v1778_v58 = vrot.slane %v1777_v54, 2 }
 0xc12   :  { %v1779_v57 = vadd.f32 %v1778_v58, %v1777_v54 }
 0xc14   :  { %v1780_v62 = vrot.slane %v1779_v57, 1 }
 0xc16   :  { %v1781_v61 = vadd.f32 %v1780_v62, %v1779_v57 }
 0xc18   :  { %v1782_v0 = vmul.f32 %v1781_v61, %v4507_v30 }
 0xc1a   :  { %v1783_v2 = vadd.f32 1e-05, %v1782_v0 }
 0xc1c   :  { %4096 = vrsqrt.f32 %v1783_v2  ;;  %vm1790_vm7 = vweird.f32 %v1783_v2 }
 0xc22   :  { %v4097_v3 = vpop.eup %4096 }
 0xc23   :  { %v1785_v4 = vmul.f32 %v4097_v3, %v1783_v2  ;;  %vm1791_vm6 = vweird.f32 %v4097_v3 }
 0xc24   :  { %vm1792_vm9 = vmor %vm1790_vm7, %vm1791_vm6 }
 0xc25   :  { %v1786_v6 = vmul.f32 %v4097_v3, %v1785_v4 }
 0xc27   :  { %v1787_v7 = vmul.f32 0.5, %v1786_v6 }
 0xc29   :  { %v1788_v8 = vsub.f32 1.5, %v1787_v7 }
 0xc2b   :  { %v1789_v10 = vmul.f32 %v4097_v3, %v1788_v8 }
 0xc2d   :  { %v1793_v11 = vsel %vm1792_vm9, %v4097_v3, %v1789_v10 }
 0xc2e   :  { %v1794_v12 = vmul.f32 %v1793_v11, %v1744_v9 }
 0xc30   :  { %v1795_v14 = vperm.slane %v1794_v12, 0 }
 0xc32   :  { %v1796_v16 = vmul.f32 %v1795_v14, %v1761_v39  ;;  %v1797_v17 = vmul.f32 %v1795_v14, %v1762_v40  ;;  %v1799_v24 = vmul.f32 %v1795_v14, %v1764_v42  ;;  %v1798_v27 = vmul.f32 %v1795_v14, %v1763_v41 }
 0xc34   :  { %v1803_v20 = vadd.f32 %v4064_v15, %v1796_v16  ;;  %v1804_v21 = vadd.f32 %v4064_v15, %v1797_v17  ;;  %v1806_v33 = vadd.f32 %v4064_v15, %v1799_v24  ;;  %v1805_v36 = vadd.f32 %v4064_v15, %v1798_v27 }
 0xc36   :  { %v1816_v22 = vmul.f32 %v3963_v18, %v1803_v20  ;;  %v1817_v23 = vmul.f32 %v3964_v19, %v1804_v21  ;;  %v1818_v35 = vmul.f32 %v3967_v32, %v1805_v36  ;;  %v1819_v38 = vmul.f32 %v3968_v37, %v1806_v33 }
 0xc38   :  { %v1820_v25 = vmul.f32 1.1111112, %v1816_v22  ;;  %v1821_v26 = vmul.f32 1.1111112, %v1817_v23  ;;  %v1822_v39 = vmul.f32 1.1111112, %v1818_v35 }
 0xc39   :  { %v1823_v40 = vmul.f32 1.1111112, %v1819_v38  ;;  %v4023_v38 = vld [vmem:[%s5005_s4 + $0x78] sm:$0xff]  }
 0xc3a   :  { %v1824_v29 = vmax.f32 %v1820_v25, 0.0  ;;  %v1825_v31 = vmax.f32 %v1821_v26, 0.0  ;;  %v1826_v42 = vmax.f32 %v1822_v39, 0.0  ;;  %v4022_v39 = vld [vmem:[%s5005_s4 + $0x70] sm:$0xff]  }
 0xc3b   :  { %v1827_v43 = vmax.f32 %v1823_v40, 0.0 }
 0xc3c   :  { %v1837_v34 = vpack.c.bf16 %v1825_v31, %v1824_v29 }
 0xc3d   :  { %v1838_v41 = vpack.c.bf16 %v1827_v43, %v1826_v42  ;;  %v4066_v42 = vld [vmem:[#allocation15 + $0x7] ss:$0 sm:$0xff]  ;;  %v3976_v43 = vunpack.c.h.bf16 %v4023_v38 }
 0xc3e   :  { %3510 = vmatmul.msk.bf16.vlgmr.msra.gmra.mxu1 %vm272_vm2, %v1837_v34  ;;  %v1894_v34 = vld [vmem:[#allocation14 + $0x7] sm:$0x1] }
 0xc4e   :  { %3511 = vmatmul.msk.bf16.gmra.mxu1 %vm272_vm2, %v1838_v41  ;;  %v3975_v41 = vunpack.c.l.bf16 %v4023_v38 }
 0xcbb   :  { %v1883_v44 = vpop.f32.mrf.mxu1 }
 0xcbc   :  { %v1884_v56 = vadd.f32 %v4065_v46, %v1883_v44  ;;  %v3971_v44 = vunpack.c.l.bf16 %v4022_v39 }
 0xcbe   :  { %v1897_v51 = vsel %vm272_vm2, %v1884_v56, 0.0 }
 0xcc3   :  { %v1885_v45 = vpop.f32.mrf.mxu1 }
 0xcc4   :  { %v1886_v48 = vadd.f32 %v4065_v46, %v1885_v45  ;;  %v3972_v45 = vunpack.c.h.bf16 %v4022_v39 }
 0xcc6   :  { %v1898_v50 = vsel %vm272_vm2, %v1886_v48, 0.0 }
 0xcc7   :  { %v1899_v53 = vadd.f32 %v1898_v50, %v1897_v51 }
 0xccb   :  { %v1888_v47 = vpop.f32.mrf.mxu1 }
 0xccc   :  { %v1889_v49 = vadd.f32 %v4065_v46, %v1888_v47 }
 0xcce   :  { %v1900_v52 = vsel %vm272_vm2, %v1889_v49, 0.0 }
 0xccf   :  { %v1901_v58 = vadd.f32 %v1900_v52, %v1899_v53 }
 0xcd3   :  { %v1890_v54 = vpop.f32.mrf.mxu1 }
 0xcd4   :  { %v1891_v55 = vadd.f32 %v4065_v46, %v1890_v54 }
 0xcd6   :  { %v1902_v57 = vsel %vm272_vm2, %v1891_v55, 0.0 }
 0xcd7   :  { %v1903_v60 = vadd.f32 %v1902_v57, %v1901_v58 }
 0xcd9   :  { %v1904_v62 = vrot.slane %v1903_v60, 4 }
 0xcdb   :  { %v1905_v63 = vadd.f32 %v1904_v62, %v1903_v60 }
 0xcdd   :  { %v1906_v61 = vrot.slane %v1905_v63, 2 }
 0xcdf   :  { %v1907_v0 = vadd.f32 %v1906_v61, %v1905_v63 }
 0xce1   :  { %v1908_v1 = vrot.slane %v1907_v0, 1 }
 0xce3   :  { %v1909_v2 = vadd.f32 %v1908_v1, %v1907_v0 }
 0xce5   :  { %v1910_v3 = vmul.f32 %v1909_v2, %v4507_v30 }
 0xce7   :  { %v1911_v4 = vsub.f32 %v1884_v56, %v1910_v3  ;;  %v1912_v6 = vsub.f32 %v1886_v48, %v1910_v3  ;;  %v1913_v7 = vsub.f32 %v1889_v49, %v1910_v3  ;;  %v1914_v8 = vsub.f32 %v1891_v55, %v1910_v3 }
 0xce9   :  { %v1915_v9 = vmul.f32 %v1911_v4, %v1911_v4  ;;  %v1916_v10 = vmul.f32 %v1912_v6, %v1912_v6  ;;  %v1917_v11 = vmul.f32 %v1913_v7, %v1913_v7  ;;  %v1918_v12 = vmul.f32 %v1914_v8, %v1914_v8 }
 0xceb   :  { %v1919_v13 = vsel %vm272_vm2, %v1915_v9, 0.0  ;;  %v1920_v14 = vsel %vm272_vm2, %v1916_v10, 0.0  ;;  %v1922_v16 = vsel %vm272_vm2, %v1917_v11, 0.0  ;;  %v1924_v18 = vsel %vm272_vm2, %v1918_v12, 0.0 }
 0xcec   :  { %v1921_v15 = vadd.f32 %v1920_v14, %v1919_v13 }
 0xcee   :  { %v1923_v17 = vadd.f32 %v1922_v16, %v1921_v15 }
 0xcf0   :  { %v1925_v19 = vadd.f32 %v1924_v18, %v1923_v17 }
 0xcf2   :  { %v1926_v20 = vrot.slane %v1925_v19, 4 }
 0xcf4   :  { %v1927_v21 = vadd.f32 %v1926_v20, %v1925_v19 }
 0xcf6   :  { %v1928_v22 = vrot.slane %v1927_v21, 2 }
 0xcf8   :  { %v1929_v23 = vadd.f32 %v1928_v22, %v1927_v21 }
 0xcfa   :  { %v1930_v24 = vrot.slane %v1929_v23, 1 }
 0xcfc   :  { %v1931_v25 = vadd.f32 %v1930_v24, %v1929_v23 }
 0xcfe   :  { %v1932_v26 = vmul.f32 %v1931_v25, %v4507_v30 }
 0xd00   :  { %v1933_v27 = vadd.f32 1e-05, %v1932_v26 }
 0xd02   :  { %4098 = vrsqrt.f32 %v1933_v27  ;;  %vm1940_vm0 = vweird.f32 %v1933_v27 }
 0xd08   :  { %v4099_v28 = vpop.eup %4098 }
 0xd09   :  { %v1935_v29 = vmul.f32 %v4099_v28, %v1933_v27  ;;  %vm1941_vm10 = vweird.f32 %v4099_v28 }
 0xd0a   :  { %vm1942_vm1 = vmor %vm1940_vm0, %vm1941_vm10 }
 0xd0b   :  { %v1936_v31 = vmul.f32 %v4099_v28, %v1935_v29  ;;  %v3860_v29 = vld [vmem:[#allocation12 + $0x118] sm:$0xff] }
 0xd0c   :  { %2080 = vmatpush.bf16.msra.mxu3 %v3860_v29 }
 0xd0d   :  { %v1937_v32 = vmul.f32 0.5, %v1936_v31  ;;  %v3859_v31 = vld [vmem:[#allocation12 + $0x110] sm:$0xff] }
 0xd0f   :  { %v1938_v33 = vsub.f32 1.5, %v1937_v32  ;;  %v3858_v32 = vld [vmem:[#allocation12 + $0x108] sm:$0xff] }
 0xd10   :  { %2081 = vmatpush.bf16.msra.mxu3 %v3859_v31 }
 0xd11   :  { %v1939_v36 = vmul.f32 %v4099_v28, %v1938_v33  ;;  %v3857_v33 = vld [vmem:[#allocation12 + $0x100] sm:$0xff] }
 0xd13   :  { %v1943_v37 = vsel %vm1942_vm1, %v4099_v28, %v1939_v36 }
 0xd14   :  { %v1944_v35 = vmul.f32 %v1943_v37, %v1894_v34  ;;  %2082 = vmatpush.bf16.msra.mxu3 %v3858_v32 }
 0xd16   :  { %v1945_v40 = vperm.slane %v1944_v35, 0 }
 0xd18   :  { %v1949_v46 = vmul.f32 %v1945_v40, %v1914_v8  ;;  %v1948_v47 = vmul.f32 %v1945_v40, %v1913_v7  ;;  %v1946_v48 = vmul.f32 %v1945_v40, %v1911_v4  ;;  %v1947_v56 = vmul.f32 %v1945_v40, %v1912_v6  ;;  %2083 = vmatpush.bf16.msra.mxu3 %v3857_v33 }
 0xd1a   :  { %v1956_v49 = vadd.f32 %v4066_v42, %v1949_v46  ;;  %v1955_v50 = vadd.f32 %v4066_v42, %v1948_v47  ;;  %v1953_v51 = vadd.f32 %v4066_v42, %v1946_v48  ;;  %v1954_v52 = vadd.f32 %v4066_v42, %v1947_v56 }
 0xd1c   :  { %v1969_v53 = vmul.f32 %v3976_v43, %v1956_v49  ;;  %v1968_v54 = vmul.f32 %v3975_v41, %v1955_v50  ;;  %v1966_v55 = vmul.f32 %v3971_v44, %v1953_v51  ;;  %v1967_v58 = vmul.f32 %v3972_v45, %v1954_v52  ;;  %v4067_v41 = vld [vmem:[%s4988_s9 + $0x8] ss:$0 sm:$0xff] }
 0xd1e   :  { %v1973_v57 = vmul.f32 1.1111112, %v1969_v53  ;;  %v1972_v60 = vmul.f32 1.1111112, %v1968_v54  ;;  %v1970_v62 = vmul.f32 1.1111112, %v1966_v55 }
 0xd1f   :  { %v1971_v63 = vmul.f32 1.1111112, %v1967_v58 }
 0xd20   :  { %v1976_v61 = vmax.f32 %v1972_v60, 0.0  ;;  %v1977_v0 = vmax.f32 %v1973_v57, 0.0  ;;  %v1974_v1 = vmax.f32 %v1970_v62, 0.0 }
 0xd21   :  { %v1975_v2 = vmax.f32 %v1971_v63, 0.0 }
 0xd22   :  { %v1987_v3 = vsel %vm272_vm2, %v1976_v61, 0.0  ;;  %v1988_v4 = vsel %vm272_vm2, %v1977_v0, 0.0  ;;  %v2010_v6 = vpack.c.bf16 %v1977_v0, %v1976_v61  ;;  %v1978_v7 = vsel %vm272_vm2, %v1974_v1, 0.0 }
 0xd23   :  { %v1989_v8 = vadd.f32 %v1988_v4, %v1987_v3  ;;  %v1979_v9 = vsel %vm272_vm2, %v1975_v2, 0.0  ;;  %v2009_v13 = vpack.c.bf16 %v1975_v2, %v1974_v1 }
 0xd24   :  { %2017 = vmatpush.bf16.msra.mxu2 %v2010_v6  ;;  %v1980_v10 = vadd.f32 %v1979_v9, %v1978_v7 }
 0xd25   :  { %v1990_v11 = vrot.slane %v1989_v8, 4 }
 0xd26   :  { %v1981_v12 = vrot.slane %v1980_v10, 4 }
 0xd27   :  { %v1991_v14 = vadd.f32 %v1990_v11, %v1989_v8 }
 0xd28   :  { %v1982_v15 = vadd.f32 %v1981_v12, %v1980_v10  ;;  %2018 = vmatpush.bf16.msra.mxu2 %v2009_v13 }
 0xd29   :  { %v1992_v16 = vrot.slane %v1991_v14, 2 }
 0xd2a   :  { %v1983_v17 = vrot.slane %v1982_v15, 2 }
 0xd2b   :  { %3516 = vmatmul.msk.bf16.vlgmr.msra.gmra.mxu2 %vm590_vm3, %v4657_v59  ;;  %v1993_v18 = vadd.f32 %v1992_v16, %v1991_v14 }
 0xd2c   :  { %v1984_v19 = vadd.f32 %v1983_v17, %v1982_v15 }
 0xd2d   :  { %v1994_v20 = vrot.slane %v1993_v18, 1 }
 0xd2e   :  { %v1985_v21 = vrot.slane %v1984_v19, 1 }
 0xd2f   :  { %v1995_v22 = vadd.f32 %v1994_v20, %v1993_v18 }
 0xd30   :  { %v1986_v23 = vadd.f32 %v1985_v21, %v1984_v19  ;;  %v3864_v19 = vld [vmem:[#allocation12 + $0x138] sm:$0xff] }
 0xd31   :  { %v2000_v24 = vrot.slane %v1995_v22, 7  ;;  %2230 = vmatpush.bf16.msrb.mxu0 %v3864_v19  ;;  %v3863_v22 = vld [vmem:[#allocation12 + $0x130] sm:$0xff] }
 0xd33   :  { %v2001_v25 = vsel %vm943_vm11, %v2000_v24, %v1986_v23 }
 0xd34   :  { %v2002_v26 = vsel %vm945_vm12, %v2000_v24, %v2001_v25 }
 0xd35   :  { %v2003_v27 = vsel %vm947_vm13, %v2000_v24, %v2002_v26  ;;  %2231 = vmatpush.bf16.msrb.mxu0 %v3863_v22 }
 0xd36   :  { %v2004_v28 = vsel %vm949_vm14, %v2000_v24, %v2003_v27  ;;  %v3862_v24 = vld [vmem:[#allocation12 + $0x128] sm:$0xff]  ;;  %v3861_v27 = vld [vmem:[#allocation12 + $0x120] sm:$0xff] }
 0xd37   :  { %2005 = vrot.lane.b32.xlu0 %v2004_v28, %s4316_s27 }
 0xd39   :  { %2232 = vmatpush.bf16.msrb.mxu0 %v3862_v24 }
 0xd3b   :  { %3517 = vmatmul.msk.bf16.gmra.mxu2 %vm590_vm3, %v4666_v5 }
 0xd3d   :  { %2233 = vmatpush.bf16.msrb.mxu0 %v3861_v27 }
 0xda9   :  { %v2006_v34 = vpop.permute.xlu0 %2005 }
 0xdaa   :  { %2008 = vst.msk [vmem:[#allocation2 + $0x2] sm:$0x3] %vm1305_vm8, %v2006_v34 }
 0xdae   :  { %v2020_v36 = vpop.f32.mrf.mxu2 }
 0xdb6   :  { %v2022_v37 = vpop.f32.mrf.mxu2 }
 0xdb7   :  { %v2039_v35 = vpack.c.bf16 %v2022_v37, %v2020_v36  ;;  %v2096_v36 = vld [vmem:[#allocation14 + $0x8] sm:$0x1] }
 0xdb9   :  { %3535 = vmatmul.msk.bf16.vlgmr.msra.gmra.mxu3 %vm272_vm2, %v2039_v35 }
 0xdbe   :  { %v2025_v38 = vpop.f32.mrf.mxu2 }
 0xdc6   :  { %v2027_v39 = vpop.f32.mrf.mxu2 }
 0xdc7   :  { %v2040_v40 = vpack.c.bf16 %v2027_v39, %v2025_v38  ;;  %v4024_v39 = vld [vmem:[%s5005_s4 + $0x80] sm:$0xff]  }
 0xdc9   :  { %3536 = vmatmul.msk.bf16.gmra.mxu3 %vm272_vm2, %v2040_v40 }
 0xe3c   :  { %v2085_v42 = vpop.f32.mrf.mxu3 }
 0xe3d   :  { %v2086_v46 = vadd.f32 %v4067_v41, %v2085_v42  ;;  %v4068_v42 = vld [vmem:[#allocation15 + $0x8] ss:$0 sm:$0xff] }
 0xe3f   :  { %v2099_v56 = vsel %vm272_vm2, %v2086_v46, 0.0 }
 0xe44   :  { %v2087_v43 = vpop.f32.mrf.mxu3 }
 0xe45   :  { %v2088_v45 = vadd.f32 %v4067_v41, %v2087_v43 }
 0xe47   :  { %v2100_v48 = vsel %vm272_vm2, %v2088_v45, 0.0 }
 0xe48   :  { %v2101_v50 = vadd.f32 %v2100_v48, %v2099_v56 }
 0xe4c   :  { %v2090_v44 = vpop.f32.mrf.mxu3 }
 0xe4d   :  { %v2091_v47 = vadd.f32 %v4067_v41, %v2090_v44  ;;  %v3979_v44 = vunpack.c.l.bf16 %v4024_v39 }
 0xe4f   :  { %v2102_v49 = vsel %vm272_vm2, %v2091_v47, 0.0 }
 0xe50   :  { %v2103_v53 = vadd.f32 %v2102_v49, %v2101_v50 }
 0xe54   :  { %v2092_v51 = vpop.f32.mrf.mxu3 }
 0xe55   :  { %v2093_v52 = vadd.f32 %v4067_v41, %v2092_v51 }
 0xe57   :  { %v2104_v54 = vsel %vm272_vm2, %v2093_v52, 0.0 }
 0xe58   :  { %v2105_v55 = vadd.f32 %v2104_v54, %v2103_v53  ;;  %v4025_v53 = vld [vmem:[%s5005_s4 + $0x88] sm:$0xff]  }
 0xe5a   :  { %v2106_v58 = vrot.slane %v2105_v55, 4 }
 0xe5c   :  { %v2107_v57 = vadd.f32 %v2106_v58, %v2105_v55  ;;  %v3983_v58 = vunpack.c.l.bf16 %v4025_v53 }
 0xe5e   :  { %v2108_v60 = vrot.slane %v2107_v57, 2 }
 0xe60   :  { %v2109_v62 = vadd.f32 %v2108_v60, %v2107_v57 }
 0xe62   :  { %v2110_v63 = vrot.slane %v2109_v62, 1 }
 0xe64   :  { %v2111_v61 = vadd.f32 %v2110_v63, %v2109_v62  ;;  %v3984_v63 = vunpack.c.h.bf16 %v4025_v53 }
 0xe66   :  { %v2112_v0 = vmul.f32 %v2111_v61, %v4507_v30 }
 0xe68   :  { %v2113_v1 = vsub.f32 %v2086_v46, %v2112_v0  ;;  %v2114_v2 = vsub.f32 %v2088_v45, %v2112_v0  ;;  %v2115_v3 = vsub.f32 %v2091_v47, %v2112_v0  ;;  %v2116_v4 = vsub.f32 %v2093_v52, %v2112_v0 }
 0xe69   :  { %v3980_v45 = vunpack.c.h.bf16 %v4024_v39 }
 0xe6a   :  { %v2117_v6 = vmul.f32 %v2113_v1, %v2113_v1  ;;  %v2118_v7 = vmul.f32 %v2114_v2, %v2114_v2  ;;  %v2119_v8 = vmul.f32 %v2115_v3, %v2115_v3  ;;  %v2120_v9 = vmul.f32 %v2116_v4, %v2116_v4 }
 0xe6c   :  { %v2121_v10 = vsel %vm272_vm2, %v2117_v6, 0.0  ;;  %v2122_v11 = vsel %vm272_vm2, %v2118_v7, 0.0  ;;  %v2124_v13 = vsel %vm272_vm2, %v2119_v8, 0.0  ;;  %v2126_v15 = vsel %vm272_vm2, %v2120_v9, 0.0  ;;  %v4069_v9 = vld [vmem:[%s4988_s9 + $0x9] ss:$0 sm:$0xff] }
 0xe6d   :  { %v2123_v12 = vadd.f32 %v2122_v11, %v2121_v10 }
 0xe6f   :  { %v2125_v14 = vadd.f32 %v2124_v13, %v2123_v12 }
 0xe71   :  { %v2127_v16 = vadd.f32 %v2126_v15, %v2125_v14 }
 0xe73   :  { %v2128_v17 = vrot.slane %v2127_v16, 4 }
 0xe75   :  { %v2129_v18 = vadd.f32 %v2128_v17, %v2127_v16 }
 0xe77   :  { %v2130_v20 = vrot.slane %v2129_v18, 2 }
 0xe79   :  { %v2131_v21 = vadd.f32 %v2130_v20, %v2129_v18 }
 0xe7b   :  { %v2132_v23 = vrot.slane %v2131_v21, 1 }
 0xe7d   :  { %v2133_v25 = vadd.f32 %v2132_v23, %v2131_v21 }
 0xe7f   :  { %v2134_v26 = vmul.f32 %v2133_v25, %v4507_v30 }
 0xe81   :  { %v2135_v28 = vadd.f32 1e-05, %v2134_v26 }
 0xe83   :  { %4100 = vrsqrt.f32 %v2135_v28  ;;  %vm2142_vm5 = vweird.f32 %v2135_v28 }
 0xe89   :  { %v4101_v29 = vpop.eup %4100 }
 0xe8a   :  { %v2137_v31 = vmul.f32 %v4101_v29, %v2135_v28  ;;  %vm2143_vm4 = vweird.f32 %v4101_v29 }
 0xe8b   :  { %vm2144_vm6 = vmor %vm2142_vm5, %vm2143_vm4 }
 0xe8c   :  { %v2138_v32 = vmul.f32 %v4101_v29, %v2137_v31 }
 0xe8e   :  { %v2139_v33 = vmul.f32 0.5, %v2138_v32 }
 0xe90   :  { %v2140_v34 = vsub.f32 1.5, %v2139_v33 }
 0xe92   :  { %v2141_v37 = vmul.f32 %v4101_v29, %v2140_v34 }
 0xe94   :  { %v2145_v35 = vsel %vm2144_vm6, %v4101_v29, %v2141_v37 }
 0xe95   :  { %v2146_v38 = vmul.f32 %v2145_v35, %v2096_v36 }
 0xe97   :  { %v2147_v40 = vperm.slane %v2146_v38, 0 }
 0xe99   :  { %v2148_v43 = vmul.f32 %v2147_v40, %v2113_v1  ;;  %v2149_v41 = vmul.f32 %v2147_v40, %v2114_v2  ;;  %v2151_v49 = vmul.f32 %v2147_v40, %v2116_v4  ;;  %v2150_v52 = vmul.f32 %v2147_v40, %v2115_v3 }
 0xe9b   :  { %v2155_v46 = vadd.f32 %v4068_v42, %v2148_v43  ;;  %v2156_v47 = vadd.f32 %v4068_v42, %v2149_v41  ;;  %v2158_v57 = vadd.f32 %v4068_v42, %v2151_v49  ;;  %v2157_v62 = vadd.f32 %v4068_v42, %v2150_v52 }
 0xe9d   :  { %v2168_v48 = vmul.f32 %v3979_v44, %v2155_v46  ;;  %v2169_v56 = vmul.f32 %v3980_v45, %v2156_v47  ;;  %v2170_v61 = vmul.f32 %v3983_v58, %v2157_v62  ;;  %v2171_v0 = vmul.f32 %v3984_v63, %v2158_v57 }
 0xe9f   :  { %v2172_v50 = vmul.f32 1.1111112, %v2168_v48  ;;  %v2173_v51 = vmul.f32 1.1111112, %v2169_v56  ;;  %v2174_v1 = vmul.f32 1.1111112, %v2170_v61 }
 0xea0   :  { %v2175_v2 = vmul.f32 1.1111112, %v2171_v0  ;;  %v4027_v0 = vld [vmem:[%s5005_s4 + $0x98] sm:$0xff]  }
 0xea1   :  { %v2176_v54 = vmax.f32 %v2172_v50, 0.0  ;;  %v2177_v55 = vmax.f32 %v2173_v51, 0.0  ;;  %v2178_v4 = vmax.f32 %v2174_v1, 0.0  ;;  %v4026_v1 = vld [vmem:[%s5005_s4 + $0x90] sm:$0xff]  }
 0xea2   :  { %v2179_v6 = vmax.f32 %v2175_v2, 0.0 }
 0xea3   :  { %v2189_v60 = vpack.c.bf16 %v2177_v55, %v2176_v54 }
 0xea4   :  { %v2190_v3 = vpack.c.bf16 %v2179_v6, %v2178_v4  ;;  %v4070_v4 = vld [vmem:[#allocation15 + $0x9] ss:$0 sm:$0xff]  ;;  %v3992_v6 = vunpack.c.h.bf16 %v4027_v0 }
 0xea5   :  { %3558 = vmatmul.msk.bf16.vlgmr.msrb.gmra.mxu0 %vm272_vm2, %v2189_v60  ;;  %v2246_v60 = vld [vmem:[#allocation14 + $0x9] sm:$0x1] }
 0xeb5   :  { %3559 = vmatmul.msk.bf16.gmra.mxu0 %vm272_vm2, %v2190_v3  ;;  %v3991_v3 = vunpack.c.l.bf16 %v4027_v0 }
 0xf22   :  { %v2235_v7 = vpop.f32.mrf.mxu0 }
 0xf23   :  { %v2236_v12 = vadd.f32 %v4069_v9, %v2235_v7  ;;  %v3987_v7 = vunpack.c.l.bf16 %v4026_v1 }
 0xf25   :  { %v2249_v15 = vsel %vm272_vm2, %v2236_v12, 0.0 }
 0xf2a   :  { %v2237_v8 = vpop.f32.mrf.mxu0 }
 0xf2b   :  { %v2238_v11 = vadd.f32 %v4069_v9, %v2237_v8  ;;  %v3988_v8 = vunpack.c.h.bf16 %v4026_v1 }
 0xf2d   :  { %v2250_v14 = vsel %vm272_vm2, %v2238_v11, 0.0 }
 0xf2e   :  { %v2251_v17 = vadd.f32 %v2250_v14, %v2249_v15 }
 0xf32   :  { %v2240_v10 = vpop.f32.mrf.mxu0 }
 0xf33   :  { %v2241_v13 = vadd.f32 %v4069_v9, %v2240_v10 }
 0xf35   :  { %v2252_v16 = vsel %vm272_vm2, %v2241_v13, 0.0 }
 0xf36   :  { %v2253_v20 = vadd.f32 %v2252_v16, %v2251_v17  ;;  %v3868_v17 = vld [vmem:[#allocation12 + $0x158] sm:$0xff] }
 0xf37   :  { %2430 = vmatpush.bf16.msrb.mxu2 %v3868_v17 }
 0xf3a   :  { %v2242_v18 = vpop.f32.mrf.mxu0 }
 0xf3b   :  { %v2243_v19 = vadd.f32 %v4069_v9, %v2242_v18 }
 0xf3d   :  { %v2254_v21 = vsel %vm272_vm2, %v2243_v19, 0.0 }
 0xf3e   :  { %v2255_v22 = vadd.f32 %v2254_v21, %v2253_v20 }
 0xf40   :  { %v2256_v23 = vrot.slane %v2255_v22, 4 }
 0xf42   :  { %v2257_v24 = vadd.f32 %v2256_v23, %v2255_v22 }
 0xf44   :  { %v2258_v25 = vrot.slane %v2257_v24, 2 }
 0xf46   :  { %v2259_v26 = vadd.f32 %v2258_v25, %v2257_v24 }
 0xf48   :  { %v2260_v27 = vrot.slane %v2259_v26, 1 }
 0xf4a   :  { %v2261_v28 = vadd.f32 %v2260_v27, %v2259_v26 }
 0xf4c   :  { %v2262_v29 = vmul.f32 %v2261_v28, %v4507_v30 }
 0xf4e   :  { %v2263_v31 = vsub.f32 %v2236_v12, %v2262_v29  ;;  %v2264_v32 = vsub.f32 %v2238_v11, %v2262_v29  ;;  %v2265_v33 = vsub.f32 %v2241_v13, %v2262_v29  ;;  %v2266_v34 = vsub.f32 %v2243_v19, %v2262_v29 }
 0xf50   :  { %v2267_v36 = vmul.f32 %v2263_v31, %v2263_v31  ;;  %v2268_v37 = vmul.f32 %v2264_v32, %v2264_v32  ;;  %v2269_v35 = vmul.f32 %v2265_v33, %v2265_v33  ;;  %v2270_v38 = vmul.f32 %v2266_v34, %v2266_v34 }
 0xf52   :  { %v2271_v39 = vsel %vm272_vm2, %v2267_v36, 0.0  ;;  %v2272_v40 = vsel %vm272_vm2, %v2268_v37, 0.0  ;;  %v2274_v43 = vsel %vm272_vm2, %v2269_v35, 0.0  ;;  %v2276_v44 = vsel %vm272_vm2, %v2270_v38, 0.0 }
 0xf53   :  { %v2273_v42 = vadd.f32 %v2272_v40, %v2271_v39 }
 0xf55   :  { %v2275_v41 = vadd.f32 %v2274_v43, %v2273_v42 }
 0xf57   :  { %v2277_v45 = vadd.f32 %v2276_v44, %v2275_v41 }
 0xf59   :  { %v2278_v46 = vrot.slane %v2277_v45, 4 }
 0xf5b   :  { %v2279_v47 = vadd.f32 %v2278_v46, %v2277_v45 }
 0xf5d   :  { %v2280_v48 = vrot.slane %v2279_v47, 2 }
 0xf5f   :  { %v2281_v56 = vadd.f32 %v2280_v48, %v2279_v47 }
 0xf61   :  { %v2282_v49 = vrot.slane %v2281_v56, 1 }
 0xf63   :  { %v2283_v50 = vadd.f32 %v2282_v49, %v2281_v56 }
 0xf65   :  { %v2284_v51 = vmul.f32 %v2283_v50, %v4507_v30 }
 0xf67   :  { %v2285_v52 = vadd.f32 1e-05, %v2284_v51 }
 0xf69   :  { %4102 = vrsqrt.f32 %v2285_v52  ;;  %vm2292_vm9 = vweird.f32 %v2285_v52 }
 0xf6f   :  { %v4103_v53 = vpop.eup %4102 }
 0xf70   :  { %v2287_v54 = vmul.f32 %v4103_v53, %v2285_v52  ;;  %vm2293_vm7 = vweird.f32 %v4103_v53 }
 0xf71   :  { %vm2294_vm10 = vmor %vm2292_vm9, %vm2293_vm7 }
 0xf72   :  { %v2288_v55 = vmul.f32 %v4103_v53, %v2287_v54 }
 0xf74   :  { %v2289_v58 = vmul.f32 0.5, %v2288_v55  ;;  %v3866_v55 = vld [vmem:[#allocation12 + $0x148] sm:$0xff] }
 0xf76   :  { %v2290_v57 = vsub.f32 1.5, %v2289_v58  ;;  %v3865_v58 = vld [vmem:[#allocation12 + $0x140] sm:$0xff] }
 0xf78   :  { %v2291_v62 = vmul.f32 %v4103_v53, %v2290_v57 }
 0xf7a   :  { %v2295_v63 = vsel %vm2294_vm10, %v4103_v53, %v2291_v62 }
 0xf7b   :  { %v2296_v61 = vmul.f32 %v2295_v63, %v2246_v60 }
 0xf7d   :  { %v2297_v2 = vperm.slane %v2296_v61, 0 }
 0xf7f   :  { %v2301_v9 = vmul.f32 %v2297_v2, %v2266_v34  ;;  %v2300_v10 = vmul.f32 %v2297_v2, %v2265_v33  ;;  %v2298_v11 = vmul.f32 %v2297_v2, %v2263_v31  ;;  %v2299_v12 = vmul.f32 %v2297_v2, %v2264_v32 }
 0xf81   :  { %v2308_v13 = vadd.f32 %v4070_v4, %v2301_v9  ;;  %v2307_v14 = vadd.f32 %v4070_v4, %v2300_v10  ;;  %v2305_v15 = vadd.f32 %v4070_v4, %v2298_v11  ;;  %v2306_v16 = vadd.f32 %v4070_v4, %v2299_v12 }
 0xf83   :  { %v2321_v18 = vmul.f32 %v3992_v6, %v2308_v13  ;;  %v2320_v19 = vmul.f32 %v3991_v3, %v2307_v14  ;;  %v2318_v20 = vmul.f32 %v3987_v7, %v2305_v15  ;;  %v2319_v21 = vmul.f32 %v3988_v8, %v2306_v16 }
 0xf85   :  { %v2325_v22 = vmul.f32 1.1111112, %v2321_v18  ;;  %v2324_v23 = vmul.f32 1.1111112, %v2320_v19  ;;  %v2322_v24 = vmul.f32 1.1111112, %v2318_v20 }
 0xf86   :  { %v2323_v25 = vmul.f32 1.1111112, %v2319_v21 }
 0xf87   :  { %v2328_v26 = vmax.f32 %v2324_v23, 0.0  ;;  %v2329_v27 = vmax.f32 %v2325_v22, 0.0  ;;  %v2326_v28 = vmax.f32 %v2322_v24, 0.0 }
 0xf88   :  { %v2327_v29 = vmax.f32 %v2323_v25, 0.0 }
 0xf89   :  { %v2339_v31 = vsel %vm272_vm2, %v2328_v26, 0.0  ;;  %v2340_v32 = vsel %vm272_vm2, %v2329_v27, 0.0  ;;  %v2360_v33 = vpack.c.bf16 %v2329_v27, %v2328_v26  ;;  %v2330_v34 = vsel %vm272_vm2, %v2326_v28, 0.0 }
 0xf8a   :  { %v2341_v36 = vadd.f32 %v2340_v32, %v2339_v31  ;;  %v2331_v37 = vsel %vm272_vm2, %v2327_v29, 0.0  ;;  %v2359_v40 = vpack.c.bf16 %v2327_v29, %v2326_v28 }
 0xf8b   :  { %2367 = vmatpush.bf16.msrb.mxu1 %v2360_v33  ;;  %v2332_v35 = vadd.f32 %v2331_v37, %v2330_v34 }
 0xf8c   :  { %v2342_v38 = vrot.slane %v2341_v36, 4 }
 0xf8d   :  { %v2333_v39 = vrot.slane %v2332_v35, 4 }
 0xf8e   :  { %v2343_v42 = vadd.f32 %v2342_v38, %v2341_v36 }
 0xf8f   :  { %v2334_v43 = vadd.f32 %v2333_v39, %v2332_v35  ;;  %2368 = vmatpush.bf16.msrb.mxu1 %v2359_v40 }
 0xf90   :  { %v2344_v41 = vrot.slane %v2343_v42, 2 }
 0xf91   :  { %v2335_v44 = vrot.slane %v2334_v43, 2 }
 0xf92   :  { %v2345_v45 = vadd.f32 %v2344_v41, %v2343_v42  ;;  %3564 = vmatmul.msk.bf16.vlgmr.msrb.gmra.mxu1 %vm590_vm3, %v4657_v59  ;;  %v3867_v59 = vld [vmem:[#allocation12 + $0x150] sm:$0xff] }
 0xf93   :  { %v2336_v46 = vadd.f32 %v2335_v44, %v2334_v43  ;;  %2431 = vmatpush.bf16.msrb.mxu2 %v3867_v59  ;;  %v3872_v43 = vld [vmem:[#allocation12 + $0x178] sm:$0xff] }
 0xf94   :  { %v2346_v47 = vrot.slane %v2345_v45, 1  ;;  %2580 = vmatpush.bf16.msrb.mxu3 %v3872_v43 }
 0xf95   :  { %v2337_v48 = vrot.slane %v2336_v46, 1 }
 0xf96   :  { %v2347_v56 = vadd.f32 %v2346_v47, %v2345_v45  ;;  %v3871_v45 = vld [vmem:[#allocation12 + $0x170] sm:$0xff]  ;;  %v3870_v47 = vld [vmem:[#allocation12 + $0x168] sm:$0xff] }
 0xf97   :  { %v2338_v49 = vadd.f32 %v2337_v48, %v2336_v46  ;;  %2432 = vmatpush.bf16.msrb.mxu2 %v3866_v55  ;;  %v2446_v55 = vld [vmem:[#allocation14 + $0xa] sm:$0x1] }
 0xf98   :  { %v2352_v50 = vrot.slane %v2347_v56, 7  ;;  %2581 = vmatpush.bf16.msrb.mxu3 %v3871_v45 }
 0xf9a   :  { %v2353_v51 = vsel %vm943_vm11, %v2352_v50, %v2338_v49  ;;  %v3869_v49 = vld [vmem:[#allocation12 + $0x160] sm:$0xff] }
 0xf9b   :  { %v2354_v52 = vsel %vm945_vm12, %v2352_v50, %v2353_v51  ;;  %2433 = vmatpush.bf16.msrb.mxu2 %v3865_v58 }
 0xf9c   :  { %v2355_v53 = vsel %vm947_vm13, %v2352_v50, %v2354_v52  ;;  %2582 = vmatpush.bf16.msrb.mxu3 %v3870_v47 }
 0xf9d   :  { %v2356_v54 = vsel %vm949_vm14, %v2352_v50, %v2355_v53 }
 0xf9e   :  { %2358 = vst.msk [vmem:[#allocation2 + $0x4] sm:$0x3] %vm952_vm15, %v2356_v54 }
 0xfa0   :  { %2583 = vmatpush.bf16.msrb.mxu3 %v3869_v49 }
 0xfa2   :  { %3565 = vmatmul.msk.bf16.gmra.mxu1 %vm590_vm3, %v4666_v5  ;;  %v4071_v5 = vld [vmem:[%s4988_s9 + $0xa] ss:$0 sm:$0xff] }
0x100f   :  { %v2370_v57 = vpop.f32.mrf.mxu1 }
0x1017   :  { %v2372_v60 = vpop.f32.mrf.mxu1 }
0x1018   :  { %v2389_v62 = vpack.c.bf16 %v2372_v60, %v2370_v57 }
0x101a   :  { %3583 = vmatmul.msk.bf16.vlgmr.msrb.gmra.mxu2 %vm272_vm2, %v2389_v62  ;;  %v4028_v62 = vld [vmem:[%s5005_s4 + $0xa0] sm:$0xff]  }
0x101f   :  { %v2375_v63 = vpop.f32.mrf.mxu1 }
0x1027   :  { %v2377_v61 = vpop.f32.mrf.mxu1 }
0x1028   :  { %v2390_v0 = vpack.c.bf16 %v2377_v61, %v2375_v63  ;;  %v4072_v61 = vld [vmem:[#allocation15 + $0xa] ss:$0 sm:$0xff] }
0x102a   :  { %3584 = vmatmul.msk.bf16.gmra.mxu2 %vm272_vm2, %v2390_v0 }
0x109d   :  { %v2435_v1 = vpop.f32.mrf.mxu2 }
0x109e   :  { %v2436_v3 = vadd.f32 %v4071_v5, %v2435_v1 }
0x10a0   :  { %v2449_v9 = vsel %vm272_vm2, %v2436_v3, 0.0 }
0x10a5   :  { %v2437_v2 = vpop.f32.mrf.mxu2 }
0x10a6   :  { %v2438_v6 = vadd.f32 %v4071_v5, %v2437_v2  ;;  %v3995_v2 = vunpack.c.l.bf16 %v4028_v62 }
0x10a8   :  { %v2450_v8 = vsel %vm272_vm2, %v2438_v6, 0.0 }
0x10a9   :  { %v2451_v11 = vadd.f32 %v2450_v8, %v2449_v9 }
0x10ad   :  { %v2440_v4 = vpop.f32.mrf.mxu2 }
0x10ae   :  { %v2441_v7 = vadd.f32 %v4071_v5, %v2440_v4 }
0x10b0   :  { %v2452_v10 = vsel %vm272_vm2, %v2441_v7, 0.0 }
0x10b1   :  { %v2453_v14 = vadd.f32 %v2452_v10, %v2451_v11 }
0x10b5   :  { %v2442_v12 = vpop.f32.mrf.mxu2 }
0x10b6   :  { %v2443_v13 = vadd.f32 %v4071_v5, %v2442_v12  ;;  %v3996_v5 = vunpack.c.h.bf16 %v4028_v62  ;;  %v4029_v12 = vld [vmem:[%s5005_s4 + $0xa8] sm:$0xff]  }
0x10b8   :  { %v2454_v15 = vsel %vm272_vm2, %v2443_v13, 0.0 }
0x10b9   :  { %v2455_v16 = vadd.f32 %v2454_v15, %v2453_v14  ;;  %v3999_v15 = vunpack.c.l.bf16 %v4029_v12 }
0x10bb   :  { %v2456_v17 = vrot.slane %v2455_v16, 4 }
0x10bd   :  { %v2457_v18 = vadd.f32 %v2456_v17, %v2455_v16 }
0x10bf   :  { %v2458_v19 = vrot.slane %v2457_v18, 2 }
0x10c1   :  { %v2459_v20 = vadd.f32 %v2458_v19, %v2457_v18  ;;  %v4000_v19 = vunpack.c.h.bf16 %v4029_v12 }
0x10c3   :  { %v2460_v21 = vrot.slane %v2459_v20, 1 }
0x10c5   :  { %v2461_v22 = vadd.f32 %v2460_v21, %v2459_v20 }
0x10c7   :  { %v2462_v23 = vmul.f32 %v2461_v22, %v4507_v30 }
0x10c9   :  { %v2463_v24 = vsub.f32 %v2436_v3, %v2462_v23  ;;  %v2464_v25 = vsub.f32 %v2438_v6, %v2462_v23  ;;  %v2465_v26 = vsub.f32 %v2441_v7, %v2462_v23  ;;  %v2466_v27 = vsub.f32 %v2443_v13, %v2462_v23 }
0x10cb   :  { %v2467_v28 = vmul.f32 %v2463_v24, %v2463_v24  ;;  %v2468_v29 = vmul.f32 %v2464_v25, %v2464_v25  ;;  %v2469_v31 = vmul.f32 %v2465_v26, %v2465_v26  ;;  %v2470_v32 = vmul.f32 %v2466_v27, %v2466_v27 }
0x10cd   :  { %v2471_v33 = vsel %vm272_vm2, %v2467_v28, 0.0  ;;  %v2472_v34 = vsel %vm272_vm2, %v2468_v29, 0.0  ;;  %v2474_v37 = vsel %vm272_vm2, %v2469_v31, 0.0  ;;  %v2476_v38 = vsel %vm272_vm2, %v2470_v32, 0.0  ;;  %v4073_v29 = vld [vmem:[%s4988_s9 + $0xb] ss:$0 sm:$0xff] }
0x10ce   :  { %v2473_v36 = vadd.f32 %v2472_v34, %v2471_v33 }
0x10d0   :  { %v2475_v35 = vadd.f32 %v2474_v37, %v2473_v36 }
0x10d2   :  { %v2477_v39 = vadd.f32 %v2476_v38, %v2475_v35 }
0x10d4   :  { %v2478_v40 = vrot.slane %v2477_v39, 4 }
0x10d6   :  { %v2479_v42 = vadd.f32 %v2478_v40, %v2477_v39 }
0x10d8   :  { %v2480_v41 = vrot.slane %v2479_v42, 2 }
0x10da   :  { %v2481_v44 = vadd.f32 %v2480_v41, %v2479_v42 }
0x10dc   :  { %v2482_v46 = vrot.slane %v2481_v44, 1 }
0x10de   :  { %v2483_v48 = vadd.f32 %v2482_v46, %v2481_v44 }
0x10e0   :  { %v2484_v56 = vmul.f32 %v2483_v48, %v4507_v30 }
0x10e2   :  { %v2485_v50 = vadd.f32 1e-05, %v2484_v56 }
0x10e4   :  { %4104 = vrsqrt.f32 %v2485_v50  ;;  %vm2492_vm0 = vweird.f32 %v2485_v50 }
0x10ea   :  { %v4105_v51 = vpop.eup %4104 }
0x10eb   :  { %v2487_v52 = vmul.f32 %v4105_v51, %v2485_v50  ;;  %vm2493_vm3 = vweird.f32 %v4105_v51 }
0x10ec   :  { %vm2494_vm1 = vmor %vm2492_vm0, %vm2493_vm3 }
0x10ed   :  { %v2488_v53 = vmul.f32 %v4105_v51, %v2487_v52 }
0x10ef   :  { %v2489_v54 = vmul.f32 0.5, %v2488_v53 }
0x10f1   :  { %v2490_v59 = vsub.f32 1.5, %v2489_v54 }
0x10f3   :  { %v2491_v58 = vmul.f32 %v4105_v51, %v2490_v59 }
0x10f5   :  { %v2495_v57 = vsel %vm2494_vm1, %v4105_v51, %v2491_v58 }
0x10f6   :  { %v2496_v60 = vmul.f32 %v2495_v57, %v2446_v55 }
0x10f8   :  { %v2497_v63 = vperm.slane %v2496_v60, 0 }
0x10fa   :  { %v2498_v0 = vmul.f32 %v2497_v63, %v2463_v24  ;;  %v2499_v1 = vmul.f32 %v2497_v63, %v2464_v25  ;;  %v2501_v8 = vmul.f32 %v2497_v63, %v2466_v27  ;;  %v2500_v11 = vmul.f32 %v2497_v63, %v2465_v26 }
0x10fc   :  { %v2505_v4 = vadd.f32 %v4072_v61, %v2498_v0  ;;  %v2506_v6 = vadd.f32 %v4072_v61, %v2499_v1  ;;  %v2508_v16 = vadd.f32 %v4072_v61, %v2501_v8  ;;  %v2507_v18 = vadd.f32 %v4072_v61, %v2500_v11 }
0x10fe   :  { %v2518_v3 = vmul.f32 %v3995_v2, %v2505_v4  ;;  %v2519_v7 = vmul.f32 %v3996_v5, %v2506_v6  ;;  %v2520_v20 = vmul.f32 %v3999_v15, %v2507_v18  ;;  %v2521_v21 = vmul.f32 %v4000_v19, %v2508_v16  ;;  %v2596_v15 = vld [vmem:[#allocation14 + $0xb] sm:$0x1] }
0x10ff   :  { %v4031_v19 = vld [vmem:[%s5005_s4 + $0xb8] sm:$0xff]  }
0x1100   :  { %v2522_v9 = vmul.f32 1.1111112, %v2518_v3  ;;  %v2523_v10 = vmul.f32 1.1111112, %v2519_v7  ;;  %v2524_v22 = vmul.f32 1.1111112, %v2520_v20 }
0x1101   :  { %v2525_v23 = vmul.f32 1.1111112, %v2521_v21  ;;  %v4074_v21 = vld [vmem:[#allocation15 + $0xb] ss:$0 sm:$0xff] }
0x1102   :  { %v2526_v13 = vmax.f32 %v2522_v9, 0.0  ;;  %v2527_v14 = vmax.f32 %v2523_v10, 0.0  ;;  %v2528_v24 = vmax.f32 %v2524_v22, 0.0  ;;  %v4007_v22 = vunpack.c.l.bf16 %v4031_v19 }
0x1103   :  { %v2529_v25 = vmax.f32 %v2525_v23, 0.0  ;;  %v4008_v23 = vunpack.c.h.bf16 %v4031_v19  ;;  %v3884_v19 = vld [vmem:[%s4991_s12 + $0x58] sm:$0xff] }
0x1104   :  { %v2539_v17 = vpack.c.bf16 %v2527_v14, %v2526_v13 }
0x1105   :  { %v2540_v26 = vpack.c.bf16 %v2529_v25, %v2528_v24 }
0x1106   :  { %3606 = vmatmul.msk.bf16.vlgmr.msrb.gmra.mxu3 %vm272_vm2, %v2539_v17 }
0x1116   :  { %3607 = vmatmul.msk.bf16.gmra.mxu3 %vm272_vm2, %v2540_v26  ;;  %v3880_v26 = vld [vmem:[%s4991_s12 + $0x38] sm:$0xff] }
0x1117   :  { %2919 = vmatpush.bf16.msra.mxu0 %v3880_v26  ;;  %v3873_v26 = vld [vmem:[%s4991_s12] sm:$0xff] }
0x1189   :  { %v2585_v27 = vpop.f32.mrf.mxu3 }
0x118a   :  { %v2586_v33 = vadd.f32 %v4073_v29, %v2585_v27  ;;  %v3888_v27 = vld [vmem:[%s4991_s12 + $0x78] sm:$0xff] }
0x118b   :  { %2932 = vmatpush.bf16.msra.mxu1 %v3888_v27  ;;  %v3881_v27 = vld [vmem:[%s4991_s12 + $0x40] sm:$0xff] }
0x118c   :  { %v2599_v37 = vsel %vm272_vm2, %v2586_v33, 0.0 }
0x1191   :  { %v2587_v28 = vpop.f32.mrf.mxu3 }
0x1192   :  { %v2588_v32 = vadd.f32 %v4073_v29, %v2587_v28  ;;  %v3896_v28 = vld [vmem:[%s4991_s12 + $0xb8] sm:$0xff] }
0x1193   :  { %2945 = vmatpush.bf16.msra.mxu2 %v3896_v28  ;;  %v3889_v28 = vld [vmem:[%s4991_s12 + $0x80] sm:$0xff] }
0x1194   :  { %v2600_v36 = vsel %vm272_vm2, %v2588_v32, 0.0 }
0x1195   :  { %v2601_v38 = vadd.f32 %v2600_v36, %v2599_v37  ;;  %v3887_v36 = vld [vmem:[%s4991_s12 + $0x70] sm:$0xff] }
0x1196   :  { %2933 = vmatpush.bf16.msra.mxu1 %v3887_v36 }
0x1199   :  { %v2590_v31 = vpop.f32.mrf.mxu3 }
0x119a   :  { %v2591_v34 = vadd.f32 %v4073_v29, %v2590_v31 }
0x119c   :  { %v2602_v35 = vsel %vm272_vm2, %v2591_v34, 0.0 }
0x119d   :  { %v2603_v42 = vadd.f32 %v2602_v35, %v2601_v38 }
0x11a1   :  { %v2592_v39 = vpop.f32.mrf.mxu3 }
0x11a2   :  { %v2593_v40 = vadd.f32 %v4073_v29, %v2592_v39 }
0x11a4   :  { %v2604_v43 = vsel %vm272_vm2, %v2593_v40, 0.0 }
0x11a5   :  { %v2605_v41 = vadd.f32 %v2604_v43, %v2603_v42 }
0x11a7   :  { %v2606_v44 = vrot.slane %v2605_v41, 4 }
0x11a9   :  { %v2607_v45 = vadd.f32 %v2606_v44, %v2605_v41 }
0x11ab   :  { %v2608_v46 = vrot.slane %v2607_v45, 2 }
0x11ad   :  { %v2609_v47 = vadd.f32 %v2608_v46, %v2607_v45  ;;  %v3878_v45 = vld [vmem:[%s4991_s12 + $0x28] sm:$0xff] }
0x11ae   :  { %v3886_v46 = vld [vmem:[%s4991_s12 + $0x68] sm:$0xff] }
0x11af   :  { %v2610_v48 = vrot.slane %v2609_v47, 1  ;;  %2934 = vmatpush.bf16.msra.mxu1 %v3886_v46 }
0x11b1   :  { %v2611_v56 = vadd.f32 %v2610_v48, %v2609_v47  ;;  %v3894_v47 = vld [vmem:[%s4991_s12 + $0xa8] sm:$0xff] }
0x11b3   :  { %v2612_v49 = vmul.f32 %v2611_v56, %v4507_v30 }
0x11b5   :  { %v2613_v50 = vsub.f32 %v2586_v33, %v2612_v49  ;;  %v2614_v51 = vsub.f32 %v2588_v32, %v2612_v49  ;;  %v2615_v52 = vsub.f32 %v2591_v34, %v2612_v49  ;;  %v2616_v53 = vsub.f32 %v2593_v40, %v2612_v49  ;;  %v3879_v34 = vld [vmem:[%s4991_s12 + $0x30] sm:$0xff] }
0x11b6   :  { %v3895_v40 = vld [vmem:[%s4991_s12 + $0xb0] sm:$0xff]  ;;  %2920 = vmatpush.bf16.msra.mxu0 %v3879_v34 }
0x11b7   :  { %v2617_v54 = vmul.f32 %v2613_v50, %v2613_v50  ;;  %v2618_v59 = vmul.f32 %v2614_v51, %v2614_v51  ;;  %v2619_v55 = vmul.f32 %v2615_v52, %v2615_v52  ;;  %v2620_v58 = vmul.f32 %v2616_v53, %v2616_v53  ;;  %2946 = vmatpush.bf16.msra.mxu2 %v3895_v40  ;;  %v3898_v40 = vld [vmem:[%s4993_s14 + $0x8] sm:$0xff] }
0x11b9   :  { %v2621_v57 = vsel %vm272_vm2, %v2617_v54, 0.0  ;;  %v2622_v60 = vsel %vm272_vm2, %v2618_v59, 0.0  ;;  %v2624_v63 = vsel %vm272_vm2, %v2619_v55, 0.0  ;;  %v2626_v0 = vsel %vm272_vm2, %v2620_v58, 0.0  ;;  %v3877_v59 = vld [vmem:[%s4991_s12 + $0x20] sm:$0xff] }
0x11ba   :  { %v2623_v62 = vadd.f32 %v2622_v60, %v2621_v57  ;;  %2921 = vmatpush.bf16.msra.mxu0 %v3878_v45  ;;  %v3885_v55 = vld [vmem:[%s4991_s12 + $0x60] sm:$0xff] }
0x11bb   :  { %2947 = vmatpush.bf16.msra.mxu2 %v3894_v47  ;;  %2935 = vmatpush.bf16.msra.mxu1 %v3885_v55  ;;  %v2958_v47 = vld [vmem:[#allocation6] sm:$0x1] }
0x11bc   :  { %v2625_v61 = vadd.f32 %v2624_v63, %v2623_v62  ;;  %v3893_v62 = vld [vmem:[%s4991_s12 + $0xa0] sm:$0xff] }
0x11be   :  { %v2627_v1 = vadd.f32 %v2626_v0, %v2625_v61  ;;  %2922 = vmatpush.bf16.msra.mxu0 %v3877_v59 }
0x11bf   :  { %2948 = vmatpush.bf16.msra.mxu2 %v3893_v62  ;;  %2936 = vmatpush.bf16.msra.mxu1 %v3884_v19  ;;  %v3901_v62 = vld [vmem:[%s4993_s14 + $0x20] sm:$0xff] }
0x11c0   :  { %v2628_v2 = vrot.slane %v2627_v1, 4 }
0x11c2   :  { %v2629_v5 = vadd.f32 %v2628_v2, %v2627_v1 }
0x11c4   :  { %v2630_v4 = vrot.slane %v2629_v5, 2 }
0x11c6   :  { %v2631_v6 = vadd.f32 %v2630_v4, %v2629_v5 }
0x11c8   :  { %v2632_v3 = vrot.slane %v2631_v6, 1 }
0x11ca   :  { %v2633_v7 = vadd.f32 %v2632_v3, %v2631_v6 }
0x11cc   :  { %v2634_v8 = vmul.f32 %v2633_v7, %v4507_v30  ;;  %v4030_v30 = vld [vmem:[%s5005_s4 + $0xb0] sm:$0xff]  }
0x11cd   :  { %v4003_v24 = vunpack.c.l.bf16 %v4030_v30  ;;  %v4004_v25 = vunpack.c.h.bf16 %v4030_v30  ;;  %v3892_v30 = vld [vmem:[%s4991_s12 + $0x98] sm:$0xff] }
0x11ce   :  { %v2635_v9 = vadd.f32 1e-05, %v2634_v8  ;;  %2949 = vmatpush.bf16.msra.mxu2 %v3892_v30 }
0x11d0   :  { %4106 = vrsqrt.f32 %v2635_v9  ;;  %vm2642_vm5 = vweird.f32 %v2635_v9 }
0x11d6   :  { %v4107_v10 = vpop.eup %4106 }
0x11d7   :  { %v2637_v11 = vmul.f32 %v4107_v10, %v2635_v9  ;;  %vm2643_vm4 = vweird.f32 %v4107_v10 }
0x11d8   :  { %vm2644_vm6 = vmor %vm2642_vm5, %vm2643_vm4 }
0x11d9   :  { %v2638_v12 = vmul.f32 %v4107_v10, %v2637_v11 }
0x11db   :  { %v2639_v13 = vmul.f32 0.5, %v2638_v12 }
0x11dd   :  { %v2640_v14 = vsub.f32 1.5, %v2639_v13 }
0x11df   :  { %v2641_v16 = vmul.f32 %v4107_v10, %v2640_v14 }
0x11e1   :  { %v2645_v17 = vsel %vm2644_vm6, %v4107_v10, %v2641_v16 }
0x11e2   :  { %v2646_v18 = vmul.f32 %v2645_v17, %v2596_v15 }
0x11e4   :  { %v2647_v20 = vperm.slane %v2646_v18, 0  ;;  %v3876_v18 = vld [vmem:[%s4991_s12 + $0x18] sm:$0xff] }
0x11e5   :  { %2923 = vmatpush.bf16.msra.mxu0 %v3876_v18 }
0x11e6   :  { %v2648_v29 = vmul.f32 %v2647_v20, %v2613_v50  ;;  %v2649_v31 = vmul.f32 %v2647_v20, %v2614_v51  ;;  %v2650_v32 = vmul.f32 %v2647_v20, %v2615_v52  ;;  %v2651_v33 = vmul.f32 %v2647_v20, %v2616_v53  ;;  %v3875_v20 = vld [vmem:[%s4991_s12 + $0x10] sm:$0xff] }
0x11e8   :  { %v2655_v37 = vadd.f32 %v4074_v21, %v2648_v29  ;;  %v2656_v35 = vadd.f32 %v4074_v21, %v2649_v31  ;;  %v2657_v38 = vadd.f32 %v4074_v21, %v2650_v32  ;;  %v2658_v39 = vadd.f32 %v4074_v21, %v2651_v33  ;;  %v3883_v21 = vld [vmem:[%s4991_s12 + $0x50] sm:$0xff] }
0x11e9   :  { %2924 = vmatpush.bf16.msra.mxu0 %v3875_v20  ;;  %2937 = vmatpush.bf16.msra.mxu1 %v3883_v21 }
0x11ea   :  { %v2670_v42 = vmul.f32 %v4007_v22, %v2657_v38  ;;  %v2671_v43 = vmul.f32 %v4008_v23, %v2658_v39  ;;  %v2668_v41 = vmul.f32 %v4003_v24, %v2655_v37  ;;  %v2669_v44 = vmul.f32 %v4004_v25, %v2656_v35  ;;  %v3891_v22 = vld [vmem:[%s4991_s12 + $0x90] sm:$0xff]  ;;  %v3874_v23 = vld [vmem:[%s4991_s12 + $0x8] sm:$0xff]  ;;  %v3900_v38 = vld [vmem:[%s4993_s14 + $0x18] sm:$0xff] }
0x11eb   :  { %v3882_v24 = vld [vmem:[%s4991_s12 + $0x48] sm:$0xff]  ;;  %2950 = vmatpush.bf16.msra.mxu2 %v3891_v22  ;;  %3007 = vmatpush.bf16.msra.mxu3 %v3900_v38  ;;  %v3899_v39 = vld [vmem:[%s4993_s14 + $0x10] sm:$0xff] }
0x11ec   :  { %v2674_v48 = vmul.f32 1.1111112, %v2670_v42  ;;  %v2675_v56 = vmul.f32 1.1111112, %v2671_v43  ;;  %v2672_v49 = vmul.f32 1.1111112, %v2668_v41 }
0x11ed   :  { %v2673_v50 = vmul.f32 1.1111112, %v2669_v44  ;;  %v3890_v25 = vld [vmem:[%s4991_s12 + $0x88] sm:$0xff]  ;;  %2925 = vmatpush.bf16.msra.mxu0 %v3874_v23  ;;  %2938 = vmatpush.bf16.msra.mxu1 %v3882_v24  ;;  %v3897_v42 = vld [vmem:[%s4993_s14] sm:$0xff]  ;;  %v3904_v43 = vld [vmem:[%s4993_s14 + $0x38] sm:$0xff] }
0x11ee   :  { %v2678_v51 = vmax.f32 %v2674_v48, 0.0  ;;  %v2679_v52 = vmax.f32 %v2675_v56, 0.0  ;;  %v2676_v53 = vmax.f32 %v2672_v49, 0.0  ;;  %v4075_v41 = vld [vmem:[%s4992_s13] ss:$0 sm:$0xff]  ;;  %v2959_v56 = vunpack.c.l.bf16 %v2958_v47  ;;  %v3911_v22 = vld [vmem:[%s4993_s14 + $0x70] sm:$0xff] }
0x11ef   :  { %v2677_v54 = vmax.f32 %v2673_v50, 0.0  ;;  %2951 = vmatpush.bf16.msra.mxu2 %v3890_v25  ;;  %3008 = vmatpush.bf16.msra.mxu3 %v3899_v39  ;;  %v3910_v23 = vld [vmem:[%s4993_s14 + $0x68] sm:$0xff]  ;;  %v3909_v24 = vld [vmem:[%s4993_s14 + $0x60] sm:$0xff] }
0x11f0   :  { %v2689_v58 = vsel %vm272_vm2, %v2678_v51, 0.0  ;;  %v2690_v57 = vsel %vm272_vm2, %v2679_v52, 0.0  ;;  %v2680_v60 = vsel %vm272_vm2, %v2676_v53, 0.0  ;;  %v3139_v25 = vld [vmem:[#allocation6 + $0x3] sm:$0x1] }
0x11f1   :  { %v2691_v63 = vadd.f32 %v2690_v57, %v2689_v58  ;;  %v2681_v61 = vsel %vm272_vm2, %v2677_v54, 0.0  ;;  %2926 = vmatpush.bf16.msra.mxu0 %v3873_v26  ;;  %2939 = vmatpush.bf16.msra.mxu1 %v3881_v27  ;;  %v3903_v57 = vld [vmem:[%s4993_s14 + $0x30] sm:$0xff]  ;;  %v4078_v26 = vld [vmem:[%s4994_s15 + $0x2] ss:$0 sm:$0xff]  ;;  %v3140_v27 = vunpack.c.l.bf16 %v3139_v25 }
0x11f2   :  { %v2682_v0 = vadd.f32 %v2681_v61, %v2680_v60  ;;  %v3902_v60 = vld [vmem:[%s4993_s14 + $0x28] sm:$0xff]  ;;  %v3017_v61 = vld [vmem:[#allocation6 + $0x1] sm:$0x1] }
0x11f3   :  { %v2692_v1 = vrot.slane %v2691_v63, 4  ;;  %2952 = vmatpush.bf16.msra.mxu2 %v3889_v28  ;;  %3009 = vmatpush.bf16.msra.mxu3 %v3898_v40 }
0x11f4   :  { %v2683_v2 = vrot.slane %v2682_v0, 4 }
0x11f5   :  { %v2693_v5 = vadd.f32 %v2692_v1, %v2691_v63  ;;  %3068 = vmatpush.bf16.msrb.mxu0 %v3904_v43  ;;  %v3908_v63 = vld [vmem:[%s4993_s14 + $0x58] sm:$0xff]  ;;  %v3018_v1 = vunpack.c.l.bf16 %v3017_v61 }
0x11f6   :  { %v2684_v4 = vadd.f32 %v2683_v2, %v2682_v0  ;;  %3129 = vmatpush.bf16.msrb.mxu1 %v3908_v63  ;;  %v4076_v0 = vld [vmem:[%s4994_s15] ss:$0 sm:$0xff] }
0x11f7   :  { %v2694_v6 = vrot.slane %v2693_v5, 2  ;;  %3010 = vmatpush.bf16.msra.mxu3 %v3897_v42 }
0x11f8   :  { %v2685_v3 = vrot.slane %v2684_v4, 2 }
0x11f9   :  { %v2695_v7 = vadd.f32 %v2694_v6, %v2693_v5  ;;  %3069 = vmatpush.bf16.msrb.mxu0 %v3903_v57 }
0x11fa   :  { %v2686_v8 = vadd.f32 %v2685_v3, %v2684_v4 }
0x11fb   :  { %v2696_v9 = vrot.slane %v2695_v7, 1 }
0x11fc   :  { %v2687_v10 = vrot.slane %v2686_v8, 1 }
0x11fd   :  { %v2697_v11 = vadd.f32 %v2696_v9, %v2695_v7  ;;  %3070 = vmatpush.bf16.msrb.mxu0 %v3902_v60  ;;  %v3907_v9 = vld [vmem:[%s4993_s14 + $0x50] sm:$0xff] }
0x11fe   :  { %v2688_v12 = vadd.f32 %v2687_v10, %v2686_v8  ;;  %3130 = vmatpush.bf16.msrb.mxu1 %v3907_v9  ;;  %v3906_v10 = vld [vmem:[%s4993_s14 + $0x48] sm:$0xff] }
0x11ff   :  { %v2702_v13 = vrot.slane %v2697_v11, 7  ;;  %v3905_v11 = vld [vmem:[%s4993_s14 + $0x40] sm:$0xff] }
0x1201   :  { %v2703_v14 = vsel %vm943_vm11, %v2702_v13, %v2688_v12  ;;  %3071 = vmatpush.bf16.msrb.mxu0 %v3901_v62  ;;  %v3912_v12 = vld [vmem:[%s4993_s14 + $0x78] sm:$0xff] }
0x1202   :  { %v2704_v15 = vsel %vm945_vm12, %v2702_v13, %v2703_v14  ;;  %3131 = vmatpush.bf16.msrb.mxu1 %v3906_v10  ;;  %3190 = vmatpush.bf16.msrb.mxu2 %v3912_v12  ;;  %v4077_v14 = vld [vmem:[%s4994_s15 + $0x1] ss:$0 sm:$0xff] }
0x1203   :  { %v2705_v16 = vsel %vm947_vm13, %v2702_v13, %v2704_v15 }
0x1204   :  { %v2706_v17 = vsel %vm949_vm14, %v2702_v13, %v2705_v16  ;;  %v3078_v13 = vld [vmem:[#allocation6 + $0x2] sm:$0x1] }
0x1205   :  { %2707 = vrot.lane.b32.xlu1 %v2706_v17, %s4316_s27  ;;  %v3079_v15 = vunpack.c.l.bf16 %v3078_v13 }
0x1206   :  { %3132 = vmatpush.bf16.msrb.mxu1 %v3905_v11  ;;  %3191 = vmatpush.bf16.msrb.mxu2 %v3911_v22 }
0x120a   :  { %3192 = vmatpush.bf16.msrb.mxu2 %v3910_v23 }
0x120e   :  { %3193 = vmatpush.bf16.msrb.mxu2 %v3909_v24 }
0x1277   :  { %v2708_v29 = vpop.permute.xlu1 %2707 }
0x1278   :  { %2710 = vst.msk [vmem:[#allocation2 + $0x4] sm:$0x3] %vm1305_vm8, %v2708_v29 }
0x127f   :  { %v2711_v31 = vld [vmem:[#allocation2] sm:$0x3f] }
0x1280   :  { %2761 = vst [vmem:[#allocation1] ss:$4 sm:$0xff] %v2711_v31 }
0x1287   :  { %v2762_v32 = vld.sshfl [vmem:[#allocation1] sm:$0xff pattern:$0x73625140]  ;;  %v2763_v33 = vld.sshfl [vmem:[#allocation1 + $0x8] sm:$0xff pattern:$0x73625140] }
0x1288   :  { %v2768_v34 = vpack.c.bf16 %v2762_v32, %v2762_v32  ;;  %v2769_v36 = vpack.c.bf16 %v2763_v33, %v2763_v33  ;;  %v2764_v37 = vld.sshfl [vmem:[#allocation1 + $0x10] sm:$0xff pattern:$0x73625140] }
0x1289   :  { %v2770_v35 = vpack.c.bf16 %v2764_v37, %v2764_v37  ;;  %v3200_v37 = vld [vmem:[#allocation6 + $0x4] sm:$0x1] }
0x128a   :  { %2927 = vmatmul.bf16.vlgmr.msra.gmra.mxu0 %v2768_v34  ;;  %2940 = vmatmul.bf16.vlgmr.msra.gmra.mxu1 %v2769_v36  ;;  %v3201_v38 = vunpack.c.l.bf16 %v3200_v37 }
0x128b   :  { %2953 = vmatmul.bf16.vlgmr.msra.gmra.mxu2 %v2770_v35  ;;  %v4079_v35 = vld [vmem:[%s4994_s15 + $0x3] ss:$0 sm:$0xff] }
0x1307   :  { %v2928_v44 = vpop.f32.mrf.mxu0  ;;  %v2941_v45 = vpop.f32.mrf.mxu1 }
0x1308   :  { %v2929_v46 = vadd.f32 %v4075_v41, %v2928_v44  ;;  %v4080_v41 = vld [vmem:[%s4995_s16] ss:$0 sm:$0xff] }
0x130a   :  { %v2942_v48 = vadd.f32 %v2941_v45, %v2929_v46 }
0x130e   :  { %v2954_v49 = vpop.f32.mrf.mxu2 }
0x130f   :  { %v2955_v50 = vadd.f32 %v2954_v49, %v2942_v48  ;;  %v2930_v51 = vpop.f32.mrf.mxu0  ;;  %v2943_v52 = vpop.f32.mrf.mxu1  ;;  %v4081_v48 = vld [vmem:[#allocation3] ss:$0 sm:$0xff] }
0x1311   :  { %v2960_v53 = vmul.f32 %v2959_v56, %v2955_v50 }
0x1313   :  { %v2961_v54 = vmul.f32 1.1111112, %v2960_v53 }
0x1315   :  { %v2962_v59 = vmax.f32 %v2961_v54, 0.0 }
0x1316   :  { %v2956_v55 = vpop.f32.mrf.mxu2 }
0x1317   :  { %v2971_v58 = vpack.c.bf16 %v2962_v59, %v2962_v59 }
0x1319   :  { %3724 = vmatmul.msk.bf16.vlgmr.msra.gmra.mxu3 %vm272_vm2, %v2971_v58 }
0x139c   :  { %v3012_v2 = vpop.f32.mrf.mxu3 }
0x139d   :  { %v3013_v5 = vadd.f32 %v4076_v0, %v3012_v2 }
0x139f   :  { %v3019_v4 = vmul.f32 %v3018_v1, %v3013_v5 }
0x13a1   :  { %v3020_v6 = vmul.f32 1.1111112, %v3019_v4 }
0x13a3   :  { %v3021_v3 = vmax.f32 %v3020_v6, 0.0 }
0x13a4   :  { %v3014_v7 = vpop.f32.mrf.mxu3 }
0x13a5   :  { %v3031_v8 = vpack.c.bf16 %v3021_v3, %v3021_v3 }
0x13a7   :  { %3750 = vmatmul.msk.bf16.vlgmr.msrb.gmra.mxu0 %vm272_vm2, %v3031_v8 }
0x1424   :  { %v3073_v16 = vpop.f32.mrf.mxu0 }
0x1425   :  { %v3074_v17 = vadd.f32 %v4077_v14, %v3073_v16 }
0x1427   :  { %v3080_v18 = vmul.f32 %v3079_v15, %v3074_v17 }
0x1429   :  { %v3081_v19 = vmul.f32 1.1111112, %v3080_v18 }
0x142b   :  { %v3082_v30 = vmax.f32 %v3081_v19, 0.0 }
0x142c   :  { %v3075_v20 = vpop.f32.mrf.mxu0 }
0x142d   :  { %v3092_v21 = vpack.c.bf16 %v3082_v30, %v3082_v30 }
0x142f   :  { %3776 = vmatmul.msk.bf16.vlgmr.msrb.gmra.mxu1 %vm272_vm2, %v3092_v21 }
0x14ac   :  { %v3134_v28 = vpop.f32.mrf.mxu1 }
0x14ad   :  { %v3135_v29 = vadd.f32 %v4078_v26, %v3134_v28 }
0x14af   :  { %v3141_v31 = vmul.f32 %v3140_v27, %v3135_v29 }
0x14b1   :  { %v3142_v32 = vmul.f32 1.1111112, %v3141_v31 }
0x14b3   :  { %v3143_v33 = vmax.f32 %v3142_v32, 0.0 }
0x14b4   :  { %v3136_v34 = vpop.f32.mrf.mxu1 }
0x14b5   :  { %v3153_v36 = vpack.c.bf16 %v3143_v33, %v3143_v33 }
0x14b7   :  { %3802 = vmatmul.msk.bf16.vlgmr.msrb.gmra.mxu2 %vm272_vm2, %v3153_v36  ;;  %vm3218_vm2 = vcmask 1024  }
0x153a   :  { %v3195_v39 = vpop.f32.mrf.mxu2 }
0x153b   :  { %v3196_v40 = vadd.f32 %v4079_v35, %v3195_v39 }
0x153d   :  { %v3202_v42 = vmul.f32 %v3201_v38, %v3196_v40 }
0x153f   :  { %v3203_v43 = vmul.f32 1.1111112, %v3202_v42 }
0x1541   :  { %v3204_v44 = vmax.f32 %v3203_v43, 0.0 }
0x1542   :  { %v3197_v45 = vpop.f32.mrf.mxu2 }
0x1543   :  { %v3209_v46 = vmul.f32 %v4080_v41, %v3204_v44 }
0x1545   :  { %v3210_v47 = vsel %vm952_vm15, %v3209_v46, 0.0 }
0x1546   :  { %3211 = vadd.xlane.f32.xlu1 %v3210_v47 }
0x15b9   :  { %v3212_v56 = vpop.xlane.xlu1 %3211 }
0x15ba   :  { %v3217_v49 = vadd.f32 %v4081_v48, %v3212_v56 }
0x15bc   :  { %3219 = vst.msk [vmem:[%s4997_s18] sm:$0x3] %vm3218_vm2, %v3217_v49 }
0x15bd   :  { %3224 = vsyncpa [#allocation5], 1 }
0x15be   :  { %3225 = vsyncpa [#allocation7], 1 }
0x15bf   :  { %3226 = vsyncpa [#allocation10], 1 }
0x15c0   :  { %3227 = vsyncpa [#allocation13], 1 }
0x15c1   :  { %3228 = vsyncpa [#allocation16], 1 }

</bundles_post_ra>
